<compile_context>
chip_gen: v7x
topology: tpu7x:2x2x1
jax: 0.10.0
libtpu: 0.0.40
codegen_flags: <defaults>
</compile_context>

<pallas_src>
import jax
import jax.numpy as jnp
from jax.experimental import pallas as pl
from jax.experimental.pallas import tpu as pltpu

COUT = 5          # 4 heatmap channels + 1 edge channel
COUT_PAD = 8      # channels actually stored to HBM (padded 5 -> 8)
MXU_N = 128       # conv matmul N padding (full lane group; same MXU pass count)
LN_EPS = 1e-5     # PyTorch nn.LayerNorm default eps


# ----------------------------------------------------------------------------
# Fused kernel: conv heads (heatmap + edge, sigmoid) + thickness MLP head.
# One grid step == one (image, row-block).
# ----------------------------------------------------------------------------
def _head_kernel(x0_ref, wc_ref, bc_ref, x4_ref, mlpw_ref, mlpv_ref,
                 conv_ref, th_ref, acc_ref):
    r = pl.program_id(1)                       # row-block index within the image
    _, TH, W, _ = conv_ref.shape               # output block (1, TH, W, 8)
    Cin = x0_ref.shape[3]
    M = TH * W
    h0 = r * TH                                # first output row of this block

    # ---------------- conv heads: 3x3, stride 1, pad 1, sigmoid --------------
    # 9 slab matmuls (one per tap) of (M, Cin) x (Cin, 128), M = TH*W >= 256,
    # accumulated into a VMEM f32 scratch.  The shifted slabs are gathered once
    # per block straight from the resident bf16 activation tile.
    for kh in range(3):
        for kw in range(3):
            xs = x0_ref[0, pl.ds(h0 + kh, TH), pl.ds(kw, W), :]     # (TH, W, Cin) bf16
            xs = xs.reshape(M, Cin)                                  # free leading merge
            d = jnp.dot(xs, wc_ref[kh * 3 + kw],
                        preferred_element_type=jnp.float32)          # (M, 128) f32
            if kh == 0 and kw == 0:
                acc_ref[...] = d
            else:
                acc_ref[...] += d

    z = acc_ref[:, :COUT_PAD] + bc_ref[...]                          # (M, 8) f32
    s = pl.reciprocal(1.0 + jnp.exp(-z), approx=True)                # sigmoid on EUP
    conv_ref[...] = s.astype(jnp.bfloat16).reshape(1, TH, W, COUT_PAD)

    # ---------------- thickness head: GAP -> (Linear, LN) x2 -> Linear -------
    _, H4, W4, C = x4_ref.shape
    x4 = x4_ref[0].reshape(H4 * W4, C)                               # free leading merge
    gap = jnp.sum(x4, axis=0, keepdims=True) * (1.0 / float(H4 * W4))  # (1, C)

    vec = mlpv_ref[...]                                              # (8, C) packed params

    def layer_norm(v, g, b):
        mu = jnp.mean(v, axis=-1, keepdims=True)
        vc = v - mu
        var = jnp.mean(vc * vc, axis=-1, keepdims=True)
        return vc * jax.lax.rsqrt(var + LN_EPS) * g + b

    # Tiny (1,C)x(C,C) matmuls: HIGHEST costs nothing here (off the hot path).
    hi = jax.lax.Precision.HIGHEST
    h1 = jnp.dot(gap, mlpw_ref[0], precision=hi,
                 preferred_element_type=jnp.float32) + vec[0:1]
    h1 = layer_norm(h1, vec[1:2], vec[2:3])
    h2 = jnp.dot(h1, mlpw_ref[1], precision=hi,
                 preferred_element_type=jnp.float32) + vec[3:4]
    h2 = layer_norm(h2, vec[4:5], vec[5:6])

    t = jnp.sum(h2 * vec[6:7], axis=-1, keepdims=True) + vec[7:8, 0:1]   # (1, 1)
    th_ref[...] = (t + jnp.zeros((1, COUT_PAD), jnp.float32)).reshape(1, 1, 1, COUT_PAD)


# ----------------------------------------------------------------------------
# Wrapper: layout plumbing + single pallas_call.
# ----------------------------------------------------------------------------
def _pick_row_block(H, W, max_pixels=1024):
    """Largest divisor TH of H with TH*W <= max_pixels (targets M >= 256)."""
    th = 1
    for cand in range(1, H + 1):
        if H % cand == 0 and cand * W <= max_pixels:
            th = cand
    return th


def _forward_impl(x0, x4, params):
    N, C, H, W = x0.shape
    _, _, H4, W4 = x4.shape
    TH = _pick_row_block(H, W)
    RB = H // TH

    # NCHW -> NHWC (channels on lanes), pad H/W by 1, cast to bf16 for DMA.
    x0p = jnp.pad(jnp.transpose(x0, (0, 2, 3, 1)),
                  ((0, 0), (1, 1), (1, 1), (0, 0))).astype(jnp.bfloat16)
    x4n = jnp.transpose(x4, (0, 2, 3, 1))                              # (N, H4, W4, C)

    # Fuse heatmap(4)+edge(1) convs; per-tap weights (9, Cin, 128) bf16.
    w_conv = jnp.concatenate([params["w_hm"], params["w_ed"]], axis=-1)   # (3,3,C,5)
    w_conv = jnp.pad(w_conv, ((0, 0), (0, 0), (0, 0), (0, MXU_N - COUT)))
    w_conv = w_conv.reshape(9, C, MXU_N).astype(jnp.bfloat16)
    b_conv = jnp.pad(jnp.concatenate([params["b_hm"], params["b_ed"]]),
                     (0, COUT_PAD - COUT)).reshape(1, COUT_PAD)

    # Pack the thickness-head parameters into two arrays (fewer tiny DMAs).
    mlp_w = jnp.stack([params["w1"], params["w2"]])                       # (2, C, C)
    mlp_v = jnp.stack([params["b1"], params["g1"], params["be1"],
                       params["b2"], params["g2"], params["be2"],
                       params["w3"],
                       jnp.broadcast_to(params["b3"], (C,))])             # (8, C)

    def _const(shape):
        n = len(shape)
        return pl.BlockSpec(shape, lambda i, r: (0,) * n)

    grid_spec = pltpu.PrefetchScalarGridSpec(
        num_scalar_prefetch=0,
        grid=(N, RB),
        in_specs=[
            # full padded image stays VMEM-resident across all row blocks of i
            pl.BlockSpec((1, H + 2, W + 2, C), lambda i, r: (i, 0, 0, 0)),
            _const((9, C, MXU_N)),                                     # conv weights
            _const((1, COUT_PAD)),                                     # conv bias
            pl.BlockSpec((1, H4, W4, C), lambda i, r: (i, 0, 0, 0)),   # x4
            _const((2, C, C)),                                         # MLP weights
            _const((8, C)),                                            # MLP vectors
        ],
        out_specs=(
            pl.BlockSpec((1, TH, W, COUT_PAD), lambda i, r: (i, r, 0, 0)),
            pl.BlockSpec((1, 1, 1, COUT_PAD), lambda i, r: (i, r, 0, 0)),
        ),
        scratch_shapes=[pltpu.VMEM((TH * W, MXU_N), jnp.float32)],     # conv accumulator
    )

    # VMEM limit sized to the actual (double-buffered) blocks + headroom.
    blk = (2 * (H + 2) * (W + 2) * C * 2 +        # x0p block (bf16)
           2 * 9 * C * MXU_N * 2 +                # conv weights (bf16)
           2 * H4 * W4 * C * 4 +                  # x4 block (f32)
           2 * (2 * C * C + 8 * C + COUT_PAD) * 4 +
           2 * TH * W * COUT_PAD * 2 +            # conv output block (bf16)
           4 * TH * W * MXU_N * 4)                # f32 accumulator + intermediates
    vmem_limit = int(min(64 * 1024 * 1024, max(8 * 1024 * 1024, 2 * blk)))

    conv_out, th_out = pl.pallas_call(
        _head_kernel,
        out_shape=(jax.ShapeDtypeStruct((N, H, W, COUT_PAD), jnp.bfloat16),
                   jax.ShapeDtypeStruct((N, RB, 1, COUT_PAD), jnp.float32)),
        grid_spec=grid_spec,
        compiler_params=pltpu.CompilerParams(
            dimension_semantics=("parallel", "parallel"),
            vmem_limit_bytes=vmem_limit),
    )(x0p, w_conv, b_conv, x4n, mlp_w, mlp_v)

    # Final layout plumbing on a compact bf16 tensor (32x smaller than before).
    heatmap = jnp.transpose(conv_out[..., :4], (0, 3, 1, 2)).astype(jnp.float32)
    edge = conv_out[..., 4].astype(jnp.float32)
    thickness = th_out[:, 0, 0, :1]
    return heatmap, edge, thickness


class HeatmapEdgeThicknessRegHead:
    """Pallas TPU equivalent of the PyTorch HeatmapEdgeThicknessRegHead."""

    def __init__(self, in_c, key):
        self.in_c = in_c
        ks = jax.random.split(key, 14)
        cstd = (1.0 / (9 * in_c)) ** 0.5
        lstd = (1.0 / in_c) ** 0.5
        n = jax.random.normal
        self.params = {
            "w_hm": n(ks[0], (3, 3, in_c, 4), jnp.float32) * cstd,   # HWIO
            "b_hm": n(ks[1], (4,), jnp.float32) * 0.1,
            "w_ed": n(ks[2], (3, 3, in_c, 1), jnp.float32) * cstd,   # HWIO
            "b_ed": n(ks[3], (1,), jnp.float32) * 0.1,
            "w1": n(ks[4], (in_c, in_c), jnp.float32) * lstd,
            "b1": n(ks[5], (in_c,), jnp.float32) * 0.1,
            "g1": 1.0 + 0.1 * n(ks[6], (in_c,), jnp.float32),
            "be1": 0.1 * n(ks[7], (in_c,), jnp.float32),
            "w2": n(ks[8], (in_c, in_c), jnp.float32) * lstd,
            "b2": n(ks[9], (in_c,), jnp.float32) * 0.1,
            "g2": 1.0 + 0.1 * n(ks[10], (in_c,), jnp.float32),
            "be2": 0.1 * n(ks[11], (in_c,), jnp.float32),
            "w3": n(ks[12], (in_c,), jnp.float32) * lstd,
            "b3": 0.1 * n(ks[13], (), jnp.float32),
        }
        self._fwd = jax.jit(_forward_impl)

    def __call__(self, xs):
        # forward(xs: List[Tensor]) -> (heatmap, edge, thickness)
        return self._fwd(xs[0], xs[4], self.params)


# ----------------------------------------------------------------------------
# Pure-JAX reference for correctness checking.
# ----------------------------------------------------------------------------
def _reference_forward(xs, p):
    hi = jax.lax.Precision.HIGHEST
    x0, x4 = xs[0], xs[4]

    def conv(x, w, b):
        y = jax.lax.conv_general_dilated(
            x, w, window_strides=(1, 1), padding=((1, 1), (1, 1)),
            dimension_numbers=("NCHW", "HWIO", "NCHW"), precision=hi)
        return y + b.reshape(1, -1, 1, 1)

    heat = jax.nn.sigmoid(conv(x0, p["w_hm"], p["b_hm"]))           # (N,4,H,W)
    edge = jax.nn.sigmoid(conv(x0, p["w_ed"], p["b_ed"]))[:, 0]     # (N,H,W)

    def ln(v, g, b):
        mu = jnp.mean(v, axis=-1, keepdims=True)
        var = jnp.mean((v - mu) ** 2, axis=-1, keepdims=True)
        return (v - mu) * jax.lax.rsqrt(var + LN_EPS) * g + b

    gap = jnp.mean(x4, axis=(2, 3))                                  # (N,C)
    h = ln(jnp.dot(gap, p["w1"], precision=hi) + p["b1"], p["g1"], p["be1"])
    h = ln(jnp.dot(h, p["w2"], precision=hi) + p["b2"], p["g2"], p["be2"])
    t = jnp.dot(h, p["w3"].reshape(-1, 1), precision=hi) + p["b3"]   # (N,1)
    return heat, edge, t


if __name__ == "__main__":
    key = jax.random.PRNGKey(0)
    k_x, k_p = jax.random.split(key)

    in_c, N = 32, 2
    spatial = [16, 8, 8, 4, 4]          # small multi-scale feature pyramid
    kxs = jax.random.split(k_x, len(spatial))
    xs = [jax.random.normal(kxs[i], (N, in_c, s, s), jnp.float32)
          for i, s in enumerate(spatial)]

    head = HeatmapEdgeThicknessRegHead(in_c, k_p)
    heatmap, edge, thickness = head(xs)
    heatmap = jax.block_until_ready(heatmap)
    edge = jax.block_until_ready(edge)
    thickness = jax.block_until_ready(thickness)

    r_heat, r_edge, r_thick = _reference_forward(xs, head.params)
    assert heatmap.shape == (N, 4, spatial[0], spatial[0]), heatmap.shape
    assert edge.shape == (N, spatial[0], spatial[0]), edge.shape
    assert thickness.shape == (N, 1), thickness.shape
    # conv heads: single-pass bf16 MXU + bf16 output storage (vs f32 HIGHEST ref)
    assert float(jnp.max(jnp.abs(heatmap - r_heat))) < 3e-2, \
        float(jnp.max(jnp.abs(heatmap - r_heat)))
    assert float(jnp.max(jnp.abs(edge - r_edge))) < 3e-2, \
        float(jnp.max(jnp.abs(edge - r_edge)))
    # thickness path stays f32 end-to-end
    assert float(jnp.max(jnp.abs(thickness - r_thick))) < 5e-3, \
        float(jnp.max(jnp.abs(thickness - r_thick)))

    print("KERNEL_OK")
</pallas_src>

<mosaic_0001>
module attributes {stable_mosaic.version = 11 : i64} {
  func.func @_head_kernel(%arg0: i32, %arg1: i32, %arg2: memref<1x18x18x32xbf16, #tpu.memory_space<vmem>>, %arg3: memref<9x32x128xbf16, #tpu.memory_space<vmem>>, %arg4: memref<1x8xf32, #tpu.memory_space<vmem>>, %arg5: memref<1x4x4x32xf32, #tpu.memory_space<vmem>>, %arg6: memref<2x32x32xf32, #tpu.memory_space<vmem>>, %arg7: memref<8x32xf32, #tpu.memory_space<vmem>>, %arg8: memref<1x16x16x8xbf16, #tpu.memory_space<vmem>>, %arg9: memref<1x1x1x8xf32, #tpu.memory_space<vmem>>, %arg10: memref<256x128xf32, #tpu.memory_space<vmem>>) attributes {dimension_semantics = [#tpu.dimension_semantics<parallel>, #tpu.dimension_semantics<parallel>], iteration_bounds = array<i64: 2, 1>, scalar_prefetch = 0 : i64, scratch_operands = 1 : i64, tpu.core_type = #tpu.core_type<tc>, window_params = [{transform_indices = @transform_0, window_bounds = array<i64: 1, 18, 18, 32>}, {pipeline_mode = #tpu.pipeline_mode<synchronous>, transform_indices = @transform_1, window_bounds = array<i64: 9, 32, 128>}, {pipeline_mode = #tpu.pipeline_mode<synchronous>, transform_indices = @transform_2, window_bounds = array<i64: 1, 8>}, {transform_indices = @transform_3, window_bounds = array<i64: 1, 4, 4, 32>}, {pipeline_mode = #tpu.pipeline_mode<synchronous>, transform_indices = @transform_4, window_bounds = array<i64: 2, 32, 32>}, {pipeline_mode = #tpu.pipeline_mode<synchronous>, transform_indices = @transform_5, window_bounds = array<i64: 8, 32>}, {transform_indices = @transform_6, window_bounds = array<i64: 1, 16, 16, 8>}, {transform_indices = @transform_7, window_bounds = array<i64: 1, 1, 1, 8>}]} {
    %c16_i32 = arith.constant 16 : i32
    %0 = arith.muli %arg1, %c16_i32 : i32
    %c0_i32 = arith.constant 0 : i32
    %1 = arith.addi %0, %c0_i32 : i32
    %c0 = arith.constant 0 : index
    %2 = arith.index_cast %1 : i32 to index
    %c0_0 = arith.constant 0 : index
    %c0_1 = arith.constant 0 : index
    %3 = vector.load %arg2[%c0, %2, %c0_0, %c0_1] : memref<1x18x18x32xbf16, #tpu.memory_space<vmem>>, vector<1x16x16x32xbf16>
    %4 = vector.shape_cast %3 : vector<1x16x16x32xbf16> to vector<16x16x32xbf16>
    %5 = vector.shape_cast %4 : vector<16x16x32xbf16> to vector<256x32xbf16>
    %c0_2 = arith.constant 0 : index
    %c0_3 = arith.constant 0 : index
    %c0_4 = arith.constant 0 : index
    %6 = vector.load %arg3[%c0_2, %c0_3, %c0_4] : memref<9x32x128xbf16, #tpu.memory_space<vmem>>, vector<1x32x128xbf16>
    %7 = vector.shape_cast %6 : vector<1x32x128xbf16> to vector<32x128xbf16>
    %cst = arith.constant dense<0.000000e+00> : vector<256x128xf32>
    %8 = tpu.matmul %5, %7, %cst {dimension_numbers = #tpu.dot_dimension_numbers<[1], [0], [0], [1], [0, 0, 1, 1], [], []>} : vector<256x32xbf16>, vector<32x128xbf16>, vector<256x128xf32> -> vector<256x128xf32>
    %c0_5 = arith.constant 0 : index
    %c0_6 = arith.constant 0 : index
    %9 = vector.load %arg10[%c0_5, %c0_6] : memref<256x128xf32, #tpu.memory_space<vmem>>, vector<256x128xf32>
    tpu.vector_store %arg10[%c0_5, %c0_6], %8 {strides = array<i32>} : memref<256x128xf32, #tpu.memory_space<vmem>>, vector<256x128xf32>,
    %c0_i32_7 = arith.constant 0 : i32
    %10 = arith.addi %0, %c0_i32_7 : i32
    %c0_8 = arith.constant 0 : index
    %11 = arith.index_cast %10 : i32 to index
    %c1 = arith.constant 1 : index
    %c0_9 = arith.constant 0 : index
    %12 = vector.load %arg2[%c0_8, %11, %c1, %c0_9] : memref<1x18x18x32xbf16, #tpu.memory_space<vmem>>, vector<1x16x16x32xbf16>
    %13 = vector.shape_cast %12 : vector<1x16x16x32xbf16> to vector<16x16x32xbf16>
    %14 = vector.shape_cast %13 : vector<16x16x32xbf16> to vector<256x32xbf16>
    %c1_10 = arith.constant 1 : index
    %c0_11 = arith.constant 0 : index
    %c0_12 = arith.constant 0 : index
    %15 = vector.load %arg3[%c1_10, %c0_11, %c0_12] : memref<9x32x128xbf16, #tpu.memory_space<vmem>>, vector<1x32x128xbf16>
    %16 = vector.shape_cast %15 : vector<1x32x128xbf16> to vector<32x128xbf16>
    %cst_13 = arith.constant dense<0.000000e+00> : vector<256x128xf32>
    %17 = tpu.matmul %14, %16, %cst_13 {dimension_numbers = #tpu.dot_dimension_numbers<[1], [0], [0], [1], [0, 0, 1, 1], [], []>} : vector<256x32xbf16>, vector<32x128xbf16>, vector<256x128xf32> -> vector<256x128xf32>
    %c0_14 = arith.constant 0 : index
    %c0_15 = arith.constant 0 : index
    %18 = vector.load %arg10[%c0_14, %c0_15] : memref<256x128xf32, #tpu.memory_space<vmem>>, vector<256x128xf32>
    %19 = arith.addf %18, %17 : vector<256x128xf32>
    %c0_16 = arith.constant 0 : index
    %c0_17 = arith.constant 0 : index
    %20 = vector.load %arg10[%c0_16, %c0_17] : memref<256x128xf32, #tpu.memory_space<vmem>>, vector<256x128xf32>
    tpu.vector_store %arg10[%c0_16, %c0_17], %19 {strides = array<i32>} : memref<256x128xf32, #tpu.memory_space<vmem>>, vector<256x128xf32>,
    %c0_i32_18 = arith.constant 0 : i32
    %21 = arith.addi %0, %c0_i32_18 : i32
    %c0_19 = arith.constant 0 : index
    %22 = arith.index_cast %21 : i32 to index
    %c2 = arith.constant 2 : index
    %c0_20 = arith.constant 0 : index
    %23 = vector.load %arg2[%c0_19, %22, %c2, %c0_20] : memref<1x18x18x32xbf16, #tpu.memory_space<vmem>>, vector<1x16x16x32xbf16>
    %24 = vector.shape_cast %23 : vector<1x16x16x32xbf16> to vector<16x16x32xbf16>
    %25 = vector.shape_cast %24 : vector<16x16x32xbf16> to vector<256x32xbf16>
    %c2_21 = arith.constant 2 : index
    %c0_22 = arith.constant 0 : index
    %c0_23 = arith.constant 0 : index
    %26 = vector.load %arg3[%c2_21, %c0_22, %c0_23] : memref<9x32x128xbf16, #tpu.memory_space<vmem>>, vector<1x32x128xbf16>
    %27 = vector.shape_cast %26 : vector<1x32x128xbf16> to vector<32x128xbf16>
    %cst_24 = arith.constant dense<0.000000e+00> : vector<256x128xf32>
    %28 = tpu.matmul %25, %27, %cst_24 {dimension_numbers = #tpu.dot_dimension_numbers<[1], [0], [0], [1], [0, 0, 1, 1], [], []>} : vector<256x32xbf16>, vector<32x128xbf16>, vector<256x128xf32> -> vector<256x128xf32>
    %c0_25 = arith.constant 0 : index
    %c0_26 = arith.constant 0 : index
    %29 = vector.load %arg10[%c0_25, %c0_26] : memref<256x128xf32, #tpu.memory_space<vmem>>, vector<256x128xf32>
    %30 = arith.addf %29, %28 : vector<256x128xf32>
    %c0_27 = arith.constant 0 : index
    %c0_28 = arith.constant 0 : index
    %31 = vector.load %arg10[%c0_27, %c0_28] : memref<256x128xf32, #tpu.memory_space<vmem>>, vector<256x128xf32>
    tpu.vector_store %arg10[%c0_27, %c0_28], %30 {strides = array<i32>} : memref<256x128xf32, #tpu.memory_space<vmem>>, vector<256x128xf32>,
    %c1_i32 = arith.constant 1 : i32
    %32 = arith.addi %0, %c1_i32 : i32
    %c0_29 = arith.constant 0 : index
    %33 = arith.index_cast %32 : i32 to index
    %c0_30 = arith.constant 0 : index
    %c0_31 = arith.constant 0 : index
    %34 = vector.load %arg2[%c0_29, %33, %c0_30, %c0_31] : memref<1x18x18x32xbf16, #tpu.memory_space<vmem>>, vector<1x16x16x32xbf16>
    %35 = vector.shape_cast %34 : vector<1x16x16x32xbf16> to vector<16x16x32xbf16>
    %36 = vector.shape_cast %35 : vector<16x16x32xbf16> to vector<256x32xbf16>
    %c3 = arith.constant 3 : index
    %c0_32 = arith.constant 0 : index
    %c0_33 = arith.constant 0 : index
    %37 = vector.load %arg3[%c3, %c0_32, %c0_33] : memref<9x32x128xbf16, #tpu.memory_space<vmem>>, vector<1x32x128xbf16>
    %38 = vector.shape_cast %37 : vector<1x32x128xbf16> to vector<32x128xbf16>
    %cst_34 = arith.constant dense<0.000000e+00> : vector<256x128xf32>
    %39 = tpu.matmul %36, %38, %cst_34 {dimension_numbers = #tpu.dot_dimension_numbers<[1], [0], [0], [1], [0, 0, 1, 1], [], []>} : vector<256x32xbf16>, vector<32x128xbf16>, vector<256x128xf32> -> vector<256x128xf32>
    %c0_35 = arith.constant 0 : index
    %c0_36 = arith.constant 0 : index
    %40 = vector.load %arg10[%c0_35, %c0_36] : memref<256x128xf32, #tpu.memory_space<vmem>>, vector<256x128xf32>
    %41 = arith.addf %40, %39 : vector<256x128xf32>
    %c0_37 = arith.constant 0 : index
    %c0_38 = arith.constant 0 : index
    %42 = vector.load %arg10[%c0_37, %c0_38] : memref<256x128xf32, #tpu.memory_space<vmem>>, vector<256x128xf32>
    tpu.vector_store %arg10[%c0_37, %c0_38], %41 {strides = array<i32>} : memref<256x128xf32, #tpu.memory_space<vmem>>, vector<256x128xf32>,
    %c1_i32_39 = arith.constant 1 : i32
    %43 = arith.addi %0, %c1_i32_39 : i32
    %c0_40 = arith.constant 0 : index
    %44 = arith.index_cast %43 : i32 to index
    %c1_41 = arith.constant 1 : index
    %c0_42 = arith.constant 0 : index
    %45 = vector.load %arg2[%c0_40, %44, %c1_41, %c0_42] : memref<1x18x18x32xbf16, #tpu.memory_space<vmem>>, vector<1x16x16x32xbf16>
    %46 = vector.shape_cast %45 : vector<1x16x16x32xbf16> to vector<16x16x32xbf16>
    %47 = vector.shape_cast %46 : vector<16x16x32xbf16> to vector<256x32xbf16>
    %c4 = arith.constant 4 : index
    %c0_43 = arith.constant 0 : index
    %c0_44 = arith.constant 0 : index
    %48 = vector.load %arg3[%c4, %c0_43, %c0_44] : memref<9x32x128xbf16, #tpu.memory_space<vmem>>, vector<1x32x128xbf16>
    %49 = vector.shape_cast %48 : vector<1x32x128xbf16> to vector<32x128xbf16>
    %cst_45 = arith.constant dense<0.000000e+00> : vector<256x128xf32>
    %50 = tpu.matmul %47, %49, %cst_45 {dimension_numbers = #tpu.dot_dimension_numbers<[1], [0], [0], [1], [0, 0, 1, 1], [], []>} : vector<256x32xbf16>, vector<32x128xbf16>, vector<256x128xf32> -> vector<256x128xf32>
    %c0_46 = arith.constant 0 : index
    %c0_47 = arith.constant 0 : index
    %51 = vector.load %arg10[%c0_46, %c0_47] : memref<256x128xf32, #tpu.memory_space<vmem>>, vector<256x128xf32>
    %52 = arith.addf %51, %50 : vector<256x128xf32>
    %c0_48 = arith.constant 0 : index
    %c0_49 = arith.constant 0 : index
    %53 = vector.load %arg10[%c0_48, %c0_49] : memref<256x128xf32, #tpu.memory_space<vmem>>, vector<256x128xf32>
    tpu.vector_store %arg10[%c0_48, %c0_49], %52 {strides = array<i32>} : memref<256x128xf32, #tpu.memory_space<vmem>>, vector<256x128xf32>,
    %c1_i32_50 = arith.constant 1 : i32
    %54 = arith.addi %0, %c1_i32_50 : i32
    %c0_51 = arith.constant 0 : index
    %55 = arith.index_cast %54 : i32 to index
    %c2_52 = arith.constant 2 : index
    %c0_53 = arith.constant 0 : index
    %56 = vector.load %arg2[%c0_51, %55, %c2_52, %c0_53] : memref<1x18x18x32xbf16, #tpu.memory_space<vmem>>, vector<1x16x16x32xbf16>
    %57 = vector.shape_cast %56 : vector<1x16x16x32xbf16> to vector<16x16x32xbf16>
    %58 = vector.shape_cast %57 : vector<16x16x32xbf16> to vector<256x32xbf16>
    %c5 = arith.constant 5 : index
    %c0_54 = arith.constant 0 : index
    %c0_55 = arith.constant 0 : index
    %59 = vector.load %arg3[%c5, %c0_54, %c0_55] : memref<9x32x128xbf16, #tpu.memory_space<vmem>>, vector<1x32x128xbf16>
    %60 = vector.shape_cast %59 : vector<1x32x128xbf16> to vector<32x128xbf16>
    %cst_56 = arith.constant dense<0.000000e+00> : vector<256x128xf32>
    %61 = tpu.matmul %58, %60, %cst_56 {dimension_numbers = #tpu.dot_dimension_numbers<[1], [0], [0], [1], [0, 0, 1, 1], [], []>} : vector<256x32xbf16>, vector<32x128xbf16>, vector<256x128xf32> -> vector<256x128xf32>
    %c0_57 = arith.constant 0 : index
    %c0_58 = arith.constant 0 : index
    %62 = vector.load %arg10[%c0_57, %c0_58] : memref<256x128xf32, #tpu.memory_space<vmem>>, vector<256x128xf32>
    %63 = arith.addf %62, %61 : vector<256x128xf32>
    %c0_59 = arith.constant 0 : index
    %c0_60 = arith.constant 0 : index
    %64 = vector.load %arg10[%c0_59, %c0_60] : memref<256x128xf32, #tpu.memory_space<vmem>>, vector<256x128xf32>
    tpu.vector_store %arg10[%c0_59, %c0_60], %63 {strides = array<i32>} : memref<256x128xf32, #tpu.memory_space<vmem>>, vector<256x128xf32>,
    %c2_i32 = arith.constant 2 : i32
    %65 = arith.addi %0, %c2_i32 : i32
    %c0_61 = arith.constant 0 : index
    %66 = arith.index_cast %65 : i32 to index
    %c0_62 = arith.constant 0 : index
    %c0_63 = arith.constant 0 : index
    %67 = vector.load %arg2[%c0_61, %66, %c0_62, %c0_63] : memref<1x18x18x32xbf16, #tpu.memory_space<vmem>>, vector<1x16x16x32xbf16>
    %68 = vector.shape_cast %67 : vector<1x16x16x32xbf16> to vector<16x16x32xbf16>
    %69 = vector.shape_cast %68 : vector<16x16x32xbf16> to vector<256x32xbf16>
    %c6 = arith.constant 6 : index
    %c0_64 = arith.constant 0 : index
    %c0_65 = arith.constant 0 : index
    %70 = vector.load %arg3[%c6, %c0_64, %c0_65] : memref<9x32x128xbf16, #tpu.memory_space<vmem>>, vector<1x32x128xbf16>
    %71 = vector.shape_cast %70 : vector<1x32x128xbf16> to vector<32x128xbf16>
    %cst_66 = arith.constant dense<0.000000e+00> : vector<256x128xf32>
    %72 = tpu.matmul %69, %71, %cst_66 {dimension_numbers = #tpu.dot_dimension_numbers<[1], [0], [0], [1], [0, 0, 1, 1], [], []>} : vector<256x32xbf16>, vector<32x128xbf16>, vector<256x128xf32> -> vector<256x128xf32>
    %c0_67 = arith.constant 0 : index
    %c0_68 = arith.constant 0 : index
    %73 = vector.load %arg10[%c0_67, %c0_68] : memref<256x128xf32, #tpu.memory_space<vmem>>, vector<256x128xf32>
    %74 = arith.addf %73, %72 : vector<256x128xf32>
    %c0_69 = arith.constant 0 : index
    %c0_70 = arith.constant 0 : index
    %75 = vector.load %arg10[%c0_69, %c0_70] : memref<256x128xf32, #tpu.memory_space<vmem>>, vector<256x128xf32>
    tpu.vector_store %arg10[%c0_69, %c0_70], %74 {strides = array<i32>} : memref<256x128xf32, #tpu.memory_space<vmem>>, vector<256x128xf32>,
    %c2_i32_71 = arith.constant 2 : i32
    %76 = arith.addi %0, %c2_i32_71 : i32
    %c0_72 = arith.constant 0 : index
    %77 = arith.index_cast %76 : i32 to index
    %c1_73 = arith.constant 1 : index
    %c0_74 = arith.constant 0 : index
    %78 = vector.load %arg2[%c0_72, %77, %c1_73, %c0_74] : memref<1x18x18x32xbf16, #tpu.memory_space<vmem>>, vector<1x16x16x32xbf16>
    %79 = vector.shape_cast %78 : vector<1x16x16x32xbf16> to vector<16x16x32xbf16>
    %80 = vector.shape_cast %79 : vector<16x16x32xbf16> to vector<256x32xbf16>
    %c7 = arith.constant 7 : index
    %c0_75 = arith.constant 0 : index
    %c0_76 = arith.constant 0 : index
    %81 = vector.load %arg3[%c7, %c0_75, %c0_76] : memref<9x32x128xbf16, #tpu.memory_space<vmem>>, vector<1x32x128xbf16>
    %82 = vector.shape_cast %81 : vector<1x32x128xbf16> to vector<32x128xbf16>
    %cst_77 = arith.constant dense<0.000000e+00> : vector<256x128xf32>
    %83 = tpu.matmul %80, %82, %cst_77 {dimension_numbers = #tpu.dot_dimension_numbers<[1], [0], [0], [1], [0, 0, 1, 1], [], []>} : vector<256x32xbf16>, vector<32x128xbf16>, vector<256x128xf32> -> vector<256x128xf32>
    %c0_78 = arith.constant 0 : index
    %c0_79 = arith.constant 0 : index
    %84 = vector.load %arg10[%c0_78, %c0_79] : memref<256x128xf32, #tpu.memory_space<vmem>>, vector<256x128xf32>
    %85 = arith.addf %84, %83 : vector<256x128xf32>
    %c0_80 = arith.constant 0 : index
    %c0_81 = arith.constant 0 : index
    %86 = vector.load %arg10[%c0_80, %c0_81] : memref<256x128xf32, #tpu.memory_space<vmem>>, vector<256x128xf32>
    tpu.vector_store %arg10[%c0_80, %c0_81], %85 {strides = array<i32>} : memref<256x128xf32, #tpu.memory_space<vmem>>, vector<256x128xf32>,
    %c2_i32_82 = arith.constant 2 : i32
    %87 = arith.addi %0, %c2_i32_82 : i32
    %c0_83 = arith.constant 0 : index
    %88 = arith.index_cast %87 : i32 to index
    %c2_84 = arith.constant 2 : index
    %c0_85 = arith.constant 0 : index
    %89 = vector.load %arg2[%c0_83, %88, %c2_84, %c0_85] : memref<1x18x18x32xbf16, #tpu.memory_space<vmem>>, vector<1x16x16x32xbf16>
    %90 = vector.shape_cast %89 : vector<1x16x16x32xbf16> to vector<16x16x32xbf16>
    %91 = vector.shape_cast %90 : vector<16x16x32xbf16> to vector<256x32xbf16>
    %c8 = arith.constant 8 : index
    %c0_86 = arith.constant 0 : index
    %c0_87 = arith.constant 0 : index
    %92 = vector.load %arg3[%c8, %c0_86, %c0_87] : memref<9x32x128xbf16, #tpu.memory_space<vmem>>, vector<1x32x128xbf16>
    %93 = vector.shape_cast %92 : vector<1x32x128xbf16> to vector<32x128xbf16>
    %cst_88 = arith.constant dense<0.000000e+00> : vector<256x128xf32>
    %94 = tpu.matmul %91, %93, %cst_88 {dimension_numbers = #tpu.dot_dimension_numbers<[1], [0], [0], [1], [0, 0, 1, 1], [], []>} : vector<256x32xbf16>, vector<32x128xbf16>, vector<256x128xf32> -> vector<256x128xf32>
    %c0_89 = arith.constant 0 : index
    %c0_90 = arith.constant 0 : index
    %95 = vector.load %arg10[%c0_89, %c0_90] : memref<256x128xf32, #tpu.memory_space<vmem>>, vector<256x128xf32>
    %96 = arith.addf %95, %94 : vector<256x128xf32>
    %c0_91 = arith.constant 0 : index
    %c0_92 = arith.constant 0 : index
    %97 = vector.load %arg10[%c0_91, %c0_92] : memref<256x128xf32, #tpu.memory_space<vmem>>, vector<256x128xf32>
    tpu.vector_store %arg10[%c0_91, %c0_92], %96 {strides = array<i32>} : memref<256x128xf32, #tpu.memory_space<vmem>>, vector<256x128xf32>,
    %c0_93 = arith.constant 0 : index
    %c0_94 = arith.constant 0 : index
    %98 = vector.load %arg10[%c0_93, %c0_94] : memref<256x128xf32, #tpu.memory_space<vmem>>, vector<256x8xf32>
    %c0_95 = arith.constant 0 : index
    %c0_96 = arith.constant 0 : index
    %99 = vector.load %arg4[%c0_95, %c0_96] : memref<1x8xf32, #tpu.memory_space<vmem>>, vector<1x8xf32>
    %100 = vector.broadcast %99 : vector<1x8xf32> to vector<256x8xf32>
    %101 = arith.addf %98, %100 : vector<256x8xf32>
    %cst_97 = arith.constant 0.000000e+00 : f32
    %102 = vector.broadcast %cst_97 : f32 to vector<256x8xf32>
    %103 = arith.subf %102, %101 : vector<256x8xf32>
    %104 = math.exp %103 : vector<256x8xf32>
    %cst_98 = arith.constant 1.000000e+00 : f32
    %105 = vector.broadcast %cst_98 : f32 to vector<256x8xf32>
    %106 = arith.addf %105, %104 : vector<256x8xf32>
    %107 = tpu.reciprocal %106 {approx = true} : vector<256x8xf32> -> vector<256x8xf32>
    %108 = arith.truncf %107 : vector<256x8xf32> to vector<256x8xbf16>
    %109 = vector.shape_cast %108 : vector<256x8xbf16> to vector<1x16x16x8xbf16>
    %c0_99 = arith.constant 0 : index
    %c0_100 = arith.constant 0 : index
    %c0_101 = arith.constant 0 : index
    %c0_102 = arith.constant 0 : index
    %110 = vector.load %arg8[%c0_99, %c0_100, %c0_101, %c0_102] : memref<1x16x16x8xbf16, #tpu.memory_space<vmem>>, vector<1x16x16x8xbf16>
    tpu.vector_store %arg8[%c0_99, %c0_100, %c0_101, %c0_102], %109 {strides = array<i32>} : memref<1x16x16x8xbf16, #tpu.memory_space<vmem>>, vector<1x16x16x8xbf16>,
    %c0_103 = arith.constant 0 : index
    %c0_104 = arith.constant 0 : index
    %c0_105 = arith.constant 0 : index
    %c0_106 = arith.constant 0 : index
    %111 = vector.load %arg5[%c0_103, %c0_104, %c0_105, %c0_106] : memref<1x4x4x32xf32, #tpu.memory_space<vmem>>, vector<1x4x4x32xf32>
    %112 = vector.shape_cast %111 : vector<1x4x4x32xf32> to vector<4x4x32xf32>
    %113 = vector.shape_cast %112 : vector<4x4x32xf32> to vector<16x32xf32>
    %cst_107 = arith.constant dense<0.000000e+00> : vector<32xf32>
    %114 = vector.multi_reduction <add>, %113, %cst_107 [0] : vector<16x32xf32> to vector<32xf32>
    %115 = vector.shape_cast %114 : vector<32xf32> to vector<1x32xf32>
    %cst_108 = arith.constant 6.250000e-02 : f32
    %116 = vector.broadcast %cst_108 : f32 to vector<1x32xf32>
    %117 = arith.mulf %115, %116 : vector<1x32xf32>
    %c0_109 = arith.constant 0 : index
    %c0_110 = arith.constant 0 : index
    %118 = vector.load %arg7[%c0_109, %c0_110] : memref<8x32xf32, #tpu.memory_space<vmem>>, vector<8x32xf32>
    %c0_111 = arith.constant 0 : index
    %c0_112 = arith.constant 0 : index
    %c0_113 = arith.constant 0 : index
    %119 = vector.load %arg6[%c0_111, %c0_112, %c0_113] : memref<2x32x32xf32, #tpu.memory_space<vmem>>, vector<1x32x32xf32>
    %120 = vector.shape_cast %119 : vector<1x32x32xf32> to vector<32x32xf32>
    %cst_114 = arith.constant dense<0.000000e+00> : vector<1x32xf32>
    %121 = tpu.matmul %117, %120, %cst_114 {dimension_numbers = #tpu.dot_dimension_numbers<[1], [0], [0], [1], [0, 0, 1, 1], [], []>, precision = #tpu.contract_precision<fp32>} : vector<1x32xf32>, vector<32x32xf32>, vector<1x32xf32> -> vector<1x32xf32>
    %122 = vector.extract_strided_slice %118 {offsets = [0, 0], sizes = [1, 32], strides = [1, 1]} : vector<8x32xf32> to vector<1x32xf32>
    %123 = arith.addf %121, %122 : vector<1x32xf32>
    %124 = vector.extract_strided_slice %118 {offsets = [1, 0], sizes = [1, 32], strides = [1, 1]} : vector<8x32xf32> to vector<1x32xf32>
    %125 = vector.extract_strided_slice %118 {offsets = [2, 0], sizes = [1, 32], strides = [1, 1]} : vector<8x32xf32> to vector<1x32xf32>
    %cst_115 = arith.constant dense<0.000000e+00> : vector<1xf32>
    %126 = vector.multi_reduction <add>, %123, %cst_115 [1] : vector<1x32xf32> to vector<1xf32>
    %127 = vector.shape_cast %126 : vector<1xf32> to vector<1x1xf32>
    %cst_116 = arith.constant 3.200000e+01 : f32
    %128 = vector.broadcast %cst_116 : f32 to vector<1x1xf32>
    %129 = arith.divf %127, %128 : vector<1x1xf32>
    %130 = vector.broadcast %129 : vector<1x1xf32> to vector<1x32xf32>
    %131 = arith.subf %123, %130 : vector<1x32xf32>
    %132 = arith.mulf %131, %131 : vector<1x32xf32>
    %cst_117 = arith.constant dense<0.000000e+00> : vector<1xf32>
    %133 = vector.multi_reduction <add>, %132, %cst_117 [1] : vector<1x32xf32> to vector<1xf32>
    %134 = vector.shape_cast %133 : vector<1xf32> to vector<1x1xf32>
    %cst_118 = arith.constant 3.200000e+01 : f32
    %135 = vector.broadcast %cst_118 : f32 to vector<1x1xf32>
    %136 = arith.divf %134, %135 : vector<1x1xf32>
    %cst_119 = arith.constant 9.99999974E-6 : f32
    %137 = vector.broadcast %cst_119 : f32 to vector<1x1xf32>
    %138 = arith.addf %136, %137 : vector<1x1xf32>
    %139 = math.rsqrt %138 : vector<1x1xf32>
    %140 = vector.broadcast %139 : vector<1x1xf32> to vector<1x32xf32>
    %141 = arith.mulf %131, %140 : vector<1x32xf32>
    %142 = arith.mulf %141, %124 : vector<1x32xf32>
    %143 = arith.addf %142, %125 : vector<1x32xf32>
    %c1_120 = arith.constant 1 : index
    %c0_121 = arith.constant 0 : index
    %c0_122 = arith.constant 0 : index
    %144 = vector.load %arg6[%c1_120, %c0_121, %c0_122] : memref<2x32x32xf32, #tpu.memory_space<vmem>>, vector<1x32x32xf32>
    %145 = vector.shape_cast %144 : vector<1x32x32xf32> to vector<32x32xf32>
    %cst_123 = arith.constant dense<0.000000e+00> : vector<1x32xf32>
    %146 = tpu.matmul %143, %145, %cst_123 {dimension_numbers = #tpu.dot_dimension_numbers<[1], [0], [0], [1], [0, 0, 1, 1], [], []>, precision = #tpu.contract_precision<fp32>} : vector<1x32xf32>, vector<32x32xf32>, vector<1x32xf32> -> vector<1x32xf32>
    %147 = vector.extract_strided_slice %118 {offsets = [3, 0], sizes = [1, 32], strides = [1, 1]} : vector<8x32xf32> to vector<1x32xf32>
    %148 = arith.addf %146, %147 : vector<1x32xf32>
    %149 = vector.extract_strided_slice %118 {offsets = [4, 0], sizes = [1, 32], strides = [1, 1]} : vector<8x32xf32> to vector<1x32xf32>
    %150 = vector.extract_strided_slice %118 {offsets = [5, 0], sizes = [1, 32], strides = [1, 1]} : vector<8x32xf32> to vector<1x32xf32>
    %cst_124 = arith.constant dense<0.000000e+00> : vector<1xf32>
    %151 = vector.multi_reduction <add>, %148, %cst_124 [1] : vector<1x32xf32> to vector<1xf32>
    %152 = vector.shape_cast %151 : vector<1xf32> to vector<1x1xf32>
    %cst_125 = arith.constant 3.200000e+01 : f32
    %153 = vector.broadcast %cst_125 : f32 to vector<1x1xf32>
    %154 = arith.divf %152, %153 : vector<1x1xf32>
    %155 = vector.broadcast %154 : vector<1x1xf32> to vector<1x32xf32>
    %156 = arith.subf %148, %155 : vector<1x32xf32>
    %157 = arith.mulf %156, %156 : vector<1x32xf32>
    %cst_126 = arith.constant dense<0.000000e+00> : vector<1xf32>
    %158 = vector.multi_reduction <add>, %157, %cst_126 [1] : vector<1x32xf32> to vector<1xf32>
    %159 = vector.shape_cast %158 : vector<1xf32> to vector<1x1xf32>
    %cst_127 = arith.constant 3.200000e+01 : f32
    %160 = vector.broadcast %cst_127 : f32 to vector<1x1xf32>
    %161 = arith.divf %159, %160 : vector<1x1xf32>
    %cst_128 = arith.constant 9.99999974E-6 : f32
    %162 = vector.broadcast %cst_128 : f32 to vector<1x1xf32>
    %163 = arith.addf %161, %162 : vector<1x1xf32>
    %164 = math.rsqrt %163 : vector<1x1xf32>
    %165 = vector.broadcast %164 : vector<1x1xf32> to vector<1x32xf32>
    %166 = arith.mulf %156, %165 : vector<1x32xf32>
    %167 = arith.mulf %166, %149 : vector<1x32xf32>
    %168 = arith.addf %167, %150 : vector<1x32xf32>
    %169 = vector.extract_strided_slice %118 {offsets = [6, 0], sizes = [1, 32], strides = [1, 1]} : vector<8x32xf32> to vector<1x32xf32>
    %170 = arith.mulf %168, %169 : vector<1x32xf32>
    %cst_129 = arith.constant dense<0.000000e+00> : vector<1xf32>
    %171 = vector.multi_reduction <add>, %170, %cst_129 [1] : vector<1x32xf32> to vector<1xf32>
    %172 = vector.shape_cast %171 : vector<1xf32> to vector<1x1xf32>
    %173 = vector.extract_strided_slice %118 {offsets = [7, 0], sizes = [1, 1], strides = [1, 1]} : vector<8x32xf32> to vector<1x1xf32>
    %174 = arith.addf %172, %173 : vector<1x1xf32>
    %cst_130 = arith.constant 0.000000e+00 : f32
    %175 = vector.broadcast %cst_130 : f32 to vector<1x8xf32>
    %176 = vector.broadcast %174 : vector<1x1xf32> to vector<1x8xf32>
    %177 = arith.addf %176, %175 : vector<1x8xf32>
    %178 = vector.shape_cast %177 : vector<1x8xf32> to vector<1x1x1x8xf32>
    %c0_131 = arith.constant 0 : index
    %c0_132 = arith.constant 0 : index
    %c0_133 = arith.constant 0 : index
    %c0_134 = arith.constant 0 : index
    %179 = vector.load %arg9[%c0_131, %c0_132, %c0_133, %c0_134] : memref<1x1x1x8xf32, #tpu.memory_space<vmem>>, vector<1x1x1x8xf32>
    tpu.vector_store %arg9[%c0_131, %c0_132, %c0_133, %c0_134], %178 {strides = array<i32>} : memref<1x1x1x8xf32, #tpu.memory_space<vmem>>, vector<1x1x1x8xf32>,
    return
  }
  func.func @transform_0(%arg0: i32, %arg1: i32) -> (i32, i32, i32, i32) {
    %c0_i32 = arith.constant 0 : i32
    %c0_i32_0 = arith.constant 0 : i32
    %c0_i32_1 = arith.constant 0 : i32
    %c0_i32_2 = arith.constant 0 : i32
    return %arg0, %c0_i32, %c0_i32_0, %c0_i32_1 : i32, i32, i32, i32
  }
  func.func @transform_1(%arg0: i32, %arg1: i32) -> (i32, i32, i32) {
    %c0_i32 = arith.constant 0 : i32
    %c0_i32_0 = arith.constant 0 : i32
    %c0_i32_1 = arith.constant 0 : i32
    %c0_i32_2 = arith.constant 0 : i32
    return %c0_i32, %c0_i32_0, %c0_i32_1 : i32, i32, i32
  }
  func.func @transform_2(%arg0: i32, %arg1: i32) -> (i32, i32) {
    %c0_i32 = arith.constant 0 : i32
    %c0_i32_0 = arith.constant 0 : i32
    %c0_i32_1 = arith.constant 0 : i32
    return %c0_i32, %c0_i32_0 : i32, i32
  }
  func.func @transform_3(%arg0: i32, %arg1: i32) -> (i32, i32, i32, i32) {
    %c0_i32 = arith.constant 0 : i32
    %c0_i32_0 = arith.constant 0 : i32
    %c0_i32_1 = arith.constant 0 : i32
    %c0_i32_2 = arith.constant 0 : i32
    return %arg0, %c0_i32, %c0_i32_0, %c0_i32_1 : i32, i32, i32, i32
  }
  func.func @transform_4(%arg0: i32, %arg1: i32) -> (i32, i32, i32) {
    %c0_i32 = arith.constant 0 : i32
    %c0_i32_0 = arith.constant 0 : i32
    %c0_i32_1 = arith.constant 0 : i32
    %c0_i32_2 = arith.constant 0 : i32
    return %c0_i32, %c0_i32_0, %c0_i32_1 : i32, i32, i32
  }
  func.func @transform_5(%arg0: i32, %arg1: i32) -> (i32, i32) {
    %c0_i32 = arith.constant 0 : i32
    %c0_i32_0 = arith.constant 0 : i32
    %c0_i32_1 = arith.constant 0 : i32
    return %c0_i32, %c0_i32_0 : i32, i32
  }
  func.func @transform_6(%arg0: i32, %arg1: i32) -> (i32, i32, i32, i32) {
    %c0_i32 = arith.constant 0 : i32
    %c0_i32_0 = arith.constant 0 : i32
    %c0_i32_1 = arith.constant 0 : i32
    return %arg0, %arg1, %c0_i32, %c0_i32_0 : i32, i32, i32, i32
  }
  func.func @transform_7(%arg0: i32, %arg1: i32) -> (i32, i32, i32, i32) {
    %c0_i32 = arith.constant 0 : i32
    %c0_i32_0 = arith.constant 0 : i32
    %c0_i32_1 = arith.constant 0 : i32
    return %arg0, %arg1, %c0_i32, %c0_i32_0 : i32, i32, i32, i32
  }
}

</mosaic_0001>

<bundles_post_ra>
// kernel: _forward_impl.1
= control target key start
LH: loop header
LB: loop body
LE: loop exit
PB: predicated region body
PF: predicated region fallthrough
CT: control target
= control target key end

     0   :  { %s9401_s24 = smov 0   ;;  %s9403_s25 = smov 0   ;;  %s10900_s0 = inlined_call_operand.vmem [shape: bf16[2,18,18,32], index: 0, kind: input, shape index: {}]   ;;  %s10901_s1 = inlined_call_operand.vmem [shape: bf16[9,32,128], index: 1, kind: input, shape index: {}]   ;;  %s10902_s2 = inlined_call_operand.vmem [shape: f32[1,8], index: 2, kind: input, shape index: {}]   ;;  %s10903_s3 = inlined_call_operand.vmem [shape: f32[2,4,4,32], index: 3, kind: input, shape index: {}]   ;;  %s10904_s4 = inlined_call_operand.vmem [shape: f32[2,32,32], index: 4, kind: input, shape index: {}]   ;;  %s10905_s5 = inlined_call_operand.vmem [shape: f32[8,32], index: 5, kind: input, shape index: {}]   ;;  %s10906_s6 = inlined_call_operand.vmem [shape: bf16[2,16,16,8], index: 6, kind: output, shape index: {0}]   ;;  %s10907_s7 = inlined_call_operand.vmem [shape: f32[2,1,1,8], index: 7, kind: output, shape index: {1}]  }
   0x1   :  { %s9405_s26 = smov 0  }
   0x2 LB: > { %s30_s27 = sadd.s32 1, %s9351_s25  ;;  %p7346_p0 = scmp.ge.s32.totalorder %s9355_s26, 1  ;;  %s9355_s26 = sphi %s9405_s26, %s18_s26   ;;  %s9351_s25 = sphi %s9403_s25, %s10913_s25   ;;  %s9347_s24 = sphi %s9401_s24, %s10912_s24  }
   0x3   : > { %p32_p1 = scmp.ge.s32.totalorder %s30_s27, 2  ;;  %p266_p2 = scmp.lt.s32.totalorder %s9355_s26, 3 }
   0x5   : > { %s10915_s27 = smov (%p32_p1, %s30_s27), 0  ;;  %p267_p3 = pnand %p7346_p0, %p266_p2 }
   0x6   : > { %v9130_v0 = vld [vmem:[%s10901_s1] sm:$0xff] (!%p267_p3)   ;;  %p314_p4 = scmp.lt.s32.totalorder (!%p267_p3), %s9347_s24, 1  ;;  %v9131_v1 = vld [vmem:[%s10901_s1 + $0x30] sm:$0xff] (!%p267_p3)   ;;  %v9132_v2 = vld [vmem:[%s10901_s1 + $0x8] sm:$0xff] (!%p267_p3)   ;;  %vm474_vm0 = vcmask (!%p267_p3), 261120   ;;  %vm1617_vm4 = vcmask (!%p267_p3), 1042432  }
   0x7   : > { %270 = sbr.rel (%p267_p3) target bundleno = 1724 (0x6bc), region = 44  ;;  %8289 = vmatprep.subr.bf16.mxu1 (!%p267_p3), %v9130_v0  ;;  %8397 = vmatprep.subr.bf16.mxu0 (!%p267_p3), %v9131_v1  ;;  %v9133_v3 = vld [vmem:[%s10901_s1 + $0x38] sm:$0xff] (!%p267_p3)   ;;  %v9137_v4 = vld [vmem:[%s10901_s1 + $0x10] sm:$0xff] (!%p267_p3)   ;;  %v9143_v5 = vld [vmem:[%s10901_s1 + $0x40] sm:$0xff] (!%p267_p3)   ;;  %vm764_vm1 = vsmask.f32 (!%p267_p3), 3328 }
   0x8   : > { %8290 = vmatpush3.bf16.msra.mxu1 (!%p267_p3), %v9130_v0  ;;  %8398 = vmatpush3.bf16.msra.mxu0 (!%p267_p3), %v9131_v1  ;;  %v9144_v8 = vld [vmem:[%s10901_s1 + $0x48] sm:$0xff] (!%p267_p3)   ;;  %vm765_vm2 = vsmask.f32 (!%p267_p3), 7440  ;;  %vm1618_vm5 = vcmask (!%p267_p3), 1046532   ;;  %vm9358_vm7 = vmmov (!%p267_p3), 0   ;;  %vm6645_vm8 = vcmask (!%p267_p3), 253952  }
   0x9   : > { %8291 = vmatprep.subr.bf16.mxu1 (!%p267_p3), %v9132_v2  ;;  %8399 = vmatprep.subr.bf16.mxu0 (!%p267_p3), %v9133_v3  ;;  %vm9475_vm3 = vmor (!%p267_p3), %vm764_vm1, %vm765_vm2  ;;  %vm6097_vm9 = vcmask (!%p267_p3), 60416   ;;  %vm7196_vm10 = vcmask (!%p267_p3), 57344  }
   0xa   : > { %vm9684_vm6 = vmor (!%p267_p3), %vm1617_vm4, %vm1618_vm5 }
   0xc   : > { %8292 = vmatpush3.bf16.msra.mxu1 (!%p267_p3), %v9132_v2  ;;  %8400 = vmatpush3.bf16.msra.mxu0 (!%p267_p3), %v9133_v3 }
   0xd   : > { %8325 = vmatprep.subr.bf16.mxu1 (!%p267_p3), %v9137_v4  ;;  %8433 = vmatprep.subr.bf16.mxu0 (!%p267_p3), %v9143_v5 }
   0xe   : > { %s10917_s24 = smov (!%p314_p4, %s9347_s24), 1 }
   0xf   : > { %s9099_s13 = smul.u32 216, %s10917_s24  ;;  %s8033_s16 = sshll.u32 %s10917_s24, 4 }
  0x10   : > { %s10137_s19 = scalar_lea.vmem %s10903_s3, %s8033_s16  ;;  %s8034_s11 = sshll.u32 %s10917_s24, 7 }
  0x11   : > { %s9443_s20 = scalar_lea.vmem %s10900_s0, %s9099_s13  ;;  %s10733_s14 = scalar_lea.vmem %s10906_s6, %s8034_s11 }
  0x12   : > { %v9134_v6 = vld [vmem:[%s9443_s20] sm:$0xff]   ;;  %v9135_v7 = vld [vmem:[%s9443_s20 + $0xc] sm:$0xff]   ;;  %v9138_v10 = vld [vmem:[%s9443_s20 + $0x18] sm:$0xff]   ;;  %s340_s30 = scalar_lea.vmem %s10907_s7, %s10917_s24 }
  0x13   : > { %8293 = vmatprep.mubr.msk.bf16.mxu1 %vm474_vm0, %v9134_v6  ;;  %v9136_v9 = vld [vmem:[%s9443_s20 + $0xc] sm:$0xff]   ;;  %8401 = vmatprep.mubr.msk.bf16.mxu0 %vm474_vm0, %v9135_v7  ;;  %v9139_v11 = vld [vmem:[%s9443_s20 + $0x18] sm:$0xff]   ;;  %v9140_v12 = vld [vmem:[%s9443_s20 + $0x24] sm:$0xff]  }
  0x14   : > { %8294 = vmatmul.mubr.msk.bf16.vlgmr.msra.gmra.mrb[0].mxu1 %vm474_vm0, %v9136_v9  ;;  %8402 = vmatmul.mubr.msk.bf16.vlgmr.msra.gmra.mrb[0].mxu0 %vm474_vm0, %v9138_v10  ;;  %v9141_v13 = vld [vmem:[%s9443_s20 + $0x24] sm:$0xff]   ;;  %v9142_v14 = vld [vmem:[%s9443_s20 + $0x30] sm:$0xff]   ;;  %v7548_v16 = vld [vmem:[%s9443_s20 + $0xc] sm:$0xf] }
  0x15   : > { %8326 = vmatpush3.bf16.msra.mxu1 %v9137_v4  ;;  %8297 = vmatprep.mubr.msk.bf16.mxu1 %vm474_vm0, %v9139_v11  ;;  %v9145_v15 = vld [vmem:[%s9443_s20 + $0x30] sm:$0xff]   ;;  %v2589_v19 = vshrl.u32 %v7548_v16, 16  ;;  %v2592_v20 = vshll.u32 %v7548_v16, 16  ;;  %v7551_v26 = vld [vmem:[%s9443_s20 + $0x18] sm:$0xf]  ;;  %v9146_v33 = vld [vmem:[%s9443_s20 + $0x3c] sm:$0xff]  }
  0x16   : > { %8434 = vmatpush3.bf16.msra.mxu0 %v9143_v5  ;;  %8405 = vmatprep.mubr.msk.bf16.mxu0 %vm474_vm0, %v9140_v12  ;;  %v7549_v17 = vld [vmem:[%s9443_s20 + $0x10] sm:$0xf]  ;;  %v7550_v18 = vld [vmem:[%s9443_s20 + $0x14] sm:$0x1]  ;;  %v7552_v30 = vld [vmem:[%s9443_s20 + $0x1c] sm:$0xf] }
  0x17   : > { %8435 = vmatprep.subr.bf16.mxu0 %v9144_v8  ;;  %v2598_v21 = vshll.u32 %v7549_v17, 16  ;;  %v2602_v22 = vshrl.u32 %v7549_v17, 16  ;;  %v2608_v23 = vshll.u32 %v7550_v18, 16  ;;  %v2591_v24 = vrot.slane %v2589_v19, 4  ;;  %v7553_v34 = vld [vmem:[%s9443_s20 + $0x20] sm:$0x1] }
  0x18   : > { %v2594_v25 = vrot.slane %v2592_v20, 5  ;;  %v2613_v31 = vshrl.u32 %v7551_v26, 16  ;;  %v2616_v35 = vshll.u32 %v7551_v26, 16  ;;  %v2622_v36 = vshll.u32 %v7552_v30, 16  ;;  %v9147_v42 = vld [vmem:[%s9443_s20 + $0x48] sm:$0xff]   ;;  %v9148_v9 = vld [vmem:[%s9443_s20 + $0x54] sm:$0xff]  }
  0x19   : > { %v2600_v27 = vrot.slane %v2598_v21, 5  ;;  %v2604_v28 = vrot.slane %v2602_v22, 4  ;;  %v2610_v29 = vrot.slane %v2608_v23, 5  ;;  %v2626_v37 = vshrl.u32 %v7552_v30, 16  ;;  %v7554_v47 = vld [vmem:[%s9443_s20 + $0x24] sm:$0xf] }
  0x1a   : > { %8436 = vmatpush3.bf16.msra.mxu0 %v9144_v8  ;;  %v2595_v32 = vor.u32 %v2594_v25, %v2591_v24  ;;  %v2615_v40 = vrot.slane %v2613_v31, 4  ;;  %v2632_v41 = vshll.u32 %v7553_v34, 16  ;;  %v2618_v44 = vrot.slane %v2616_v35, 5  ;;  %v7555_v50 = vld [vmem:[%s9443_s20 + $0x28] sm:$0xf]  ;;  %v9149_v16 = vld [vmem:[%s9443_s20 + $0x60] sm:$0xff]  }
  0x1b   : > { %v2605_v39 = vor.u32 %v2604_v28, %v2600_v27  ;;  %v2624_v45 = vrot.slane %v2622_v36, 5  ;;  %v2628_v46 = vrot.slane %v2626_v37, 4  ;;  %v7556_v51 = vld [vmem:[%s9443_s20 + $0x2c] sm:$0x1]  ;;  %v2637_v55 = vshrl.u32 %v7554_v47, 16  ;;  %v9151_v18 = vld [vmem:[%s10901_s1 + $0x18] sm:$0xff]  }
  0x1c   : > { %8298 = vmatmul.mubr.msk.bf16.gmra.mrb[4].mxu1 %vm474_vm0, %v9141_v13  ;;  %8406 = vmatmul.mubr.msk.bf16.gmra.mrb[4].mxu0 %vm474_vm0, %v9142_v14  ;;  %v2596_v43 = vrot.slane %v2595_v32, 4  ;;  %v2634_v49 = vrot.slane %v2632_v41, 5  ;;  %v2619_v53 = vor.u32 %v2618_v44, %v2615_v40  ;;  %v2640_v57 = vshll.u32 %v7554_v47, 16  ;;  %v7557_v60 = vld [vmem:[%s9443_s20 + $0x30] sm:$0xf] }
  0x1d   : > { %8301 = vmatprep.mubr.msk.bf16.mxu1 %vm474_vm0, %v9145_v15  ;;  %v2606_v48 = vrot.slane %v2605_v39, 4  ;;  %v2629_v54 = vor.u32 %v2628_v46, %v2624_v45  ;;  %v2646_v58 = vshll.u32 %v7555_v50, 16  ;;  %v2650_v59 = vshrl.u32 %v7555_v50, 16  ;;  %v7558_v1 = vld [vmem:[%s9443_s20 + $0x34] sm:$0xf]  ;;  %8327 = vmatprep.subr.bf16.mxu1 %v9151_v18 }
  0x1e   : > { %v2601_v52 = vsel %vm9475_vm3, %v2596_v43, %v2600_v27  ;;  %v2620_v62 = vrot.slane %v2619_v53, 4  ;;  %v2639_v0 = vrot.slane %v2637_v55, 4  ;;  %v2642_v2 = vrot.slane %v2640_v57, 5  ;;  %v7559_v6 = vld [vmem:[%s9443_s20 + $0x38] sm:$0x1]  ;;  %8328 = vmatpush3.bf16.msra.mxu1 %v9151_v18 }
  0x1f   : > { %v2611_v56 = vsel %vm9475_vm3, %v2606_v48, %v2610_v29  ;;  %v2630_v63 = vrot.slane %v2629_v54, 4  ;;  %v2648_v3 = vrot.slane %v2646_v58, 5  ;;  %v2652_v4 = vrot.slane %v2650_v59, 4  ;;  %v7560_v17 = vld [vmem:[%s9443_s20 + $0x3c] sm:$0xf] }
  0x20   : > { %v7600_v61 = vcombine.low %v2601_v52, %v2611_v56  ;;  %v2656_v5 = vshll.u32 %v7556_v51, 16  ;;  %v2625_v7 = vsel %vm9475_vm3, %v2620_v62, %v2624_v45  ;;  %v2661_v10 = vshrl.u32 %v7557_v60, 16  ;;  %v7561_v23 = vld [vmem:[%s9443_s20 + $0x40] sm:$0xf]  ;;  %v7562_v24 = vld [vmem:[%s9443_s20 + $0x44] sm:$0x1] }
  0x21   : > { %v2635_v8 = vsel %vm9475_vm3, %v2630_v63, %v2634_v49  ;;  %v2664_v11 = vshll.u32 %v7557_v60, 16  ;;  %v2643_v13 = vor.u32 %v2642_v2, %v2639_v0  ;;  %v2653_v14 = vor.u32 %v2652_v4, %v2648_v3  ;;  %v7564_v43 = vld [vmem:[%s9443_s20 + $0x4c] sm:$0xf]  ;;  %v7565_v47 = vld [vmem:[%s9443_s20 + $0x50] sm:$0x1]  ;;  %v9152_v63 = vld [vmem:[%s9443_s20 + $0x78] sm:$0xff]  }
  0x22   : > { %8437 = vmatprep.mubr.msk.bf16.mxu0 %vm474_vm0, %v7600_v61  ;;  %v7601_v12 = vcombine.low %v2625_v7, %v2635_v8  ;;  %v2658_v15 = vrot.slane %v2656_v5, 5  ;;  %v2663_v19 = vrot.slane %v2661_v10, 4  ;;  %v2670_v21 = vshll.u32 %v7558_v1, 16  ;;  %v7566_v57 = vld [vmem:[%s9443_s20 + $0x54] sm:$0xf]  ;;  %v9150_v60 = vld [vmem:[%s9443_s20 + $0x6c] sm:$0xff]  }
  0x23   : > { %v2666_v20 = vrot.slane %v2664_v11, 5  ;;  %v2674_v22 = vshrl.u32 %v7558_v1, 16  ;;  %v2644_v25 = vrot.slane %v2643_v13, 4  ;;  %v2654_v26 = vrot.slane %v2653_v14, 4  ;;  %v7567_v4 = vld [vmem:[%s9443_s20 + $0x58] sm:$0xf] }
  0x24   : > { %8302 = vmatmul.mubr.msk.bf16.gmra.mrb[8].mxu1 %vm474_vm0, %v9146_v33  ;;  %8438 = vmatmul.mubr.msk.bf16.vlgmr.msra.gmra.mrb[0].mxu0 %vm474_vm0, %v7601_v12  ;;  %v2680_v27 = vshll.u32 %v7559_v6, 16  ;;  %v2685_v28 = vshrl.u32 %v7560_v17, 16  ;;  %v2672_v30 = vrot.slane %v2670_v21, 5  ;;  %v2688_v32 = vshll.u32 %v7560_v17, 16  ;;  %v7568_v8 = vld [vmem:[%s9443_s20 + $0x5c] sm:$0x1] }
  0x25   : > { %8305 = vmatprep.mubr.msk.bf16.mxu1 %vm474_vm0, %v9147_v42  ;;  %v2667_v29 = vor.u32 %v2666_v20, %v2663_v19  ;;  %v2676_v31 = vrot.slane %v2674_v22, 4  ;;  %v2649_v33 = vsel %vm9475_vm3, %v2644_v25, %v2648_v3  ;;  %v2659_v34 = vsel %vm9475_vm3, %v2654_v26, %v2658_v15  ;;  %v7563_v42 = vld [vmem:[%s9443_s20 + $0x48] sm:$0xf]  ;;  %v7569_v14 = vld [vmem:[%s9443_s20 + $0x60] sm:$0xf] }
  0x26   : > { %v2682_v35 = vrot.slane %v2680_v27, 5  ;;  %v2687_v36 = vrot.slane %v2685_v28, 4  ;;  %v7602_v37 = vcombine.low %v2649_v33, %v2659_v34  ;;  %v2690_v41 = vrot.slane %v2688_v32, 5  ;;  %v7570_v19 = vld [vmem:[%s9443_s20 + $0x64] sm:$0xf] }
  0x27   : > { %v2668_v39 = vrot.slane %v2667_v29, 4  ;;  %v2677_v40 = vor.u32 %v2676_v31, %v2672_v30  ;;  %v2694_v44 = vshll.u32 %v7561_v23, 16  ;;  %v2698_v45 = vshrl.u32 %v7561_v23, 16  ;;  %v7571_v28 = vld [vmem:[%s9443_s20 + $0x68] sm:$0x1] }
  0x28   : > { %v2704_v46 = vshll.u32 %v7562_v24, 16  ;;  %v2709_v48 = vshrl.u32 %v7563_v42, 16  ;;  %8441 = vmatprep.mubr.msk.bf16.mxu0 %vm474_vm0, %v7602_v37  ;;  %v2691_v51 = vor.u32 %v2690_v41, %v2687_v36  ;;  %v2712_v52 = vshll.u32 %v7563_v42, 16  ;;  %v9153_v32 = vld [vmem:[%s9443_s20 + $0x84] sm:$0xff]   ;;  %v7572_v34 = vld [vmem:[%s9443_s20 + $0x6c] sm:$0xf] }
  0x29   : > { %v2673_v49 = vsel %vm9475_vm3, %v2668_v39, %v2672_v30  ;;  %v2678_v50 = vrot.slane %v2677_v40, 4  ;;  %v2696_v53 = vrot.slane %v2694_v44, 5  ;;  %v2700_v54 = vrot.slane %v2698_v45, 4  ;;  %v9154_v40 = vld [vmem:[%s9443_s20 + $0x90] sm:$0xff]  }
  0x2a   : > { %v2706_v55 = vrot.slane %v2704_v46, 5  ;;  %v2711_v56 = vrot.slane %v2709_v48, 4  ;;  %v2692_v59 = vrot.slane %v2691_v51, 4  ;;  %v2714_v61 = vrot.slane %v2712_v52, 5  ;;  %v7573_v41 = vld [vmem:[%s9443_s20 + $0x70] sm:$0xf] }
  0x2b   : > { %v2683_v58 = vsel %vm9475_vm3, %v2678_v50, %v2682_v35  ;;  %v2718_v62 = vshll.u32 %v7564_v43, 16  ;;  %v2701_v1 = vor.u32 %v2700_v54, %v2696_v53  ;;  %v2722_v2 = vshrl.u32 %v7564_v43, 16  ;;  %v9547_v46 = vld [vmem:[%s10901_s1 + $0x20] sm:$0xff]   ;;  %v9159_v51 = vld [vmem:[%s10901_s1 + $0x50] sm:$0xff]  }
  0x2c   : > { %8306 = vmatmul.mubr.msk.bf16.gmra.mrb[12].mxu1 %vm474_vm0, %v9148_v9  ;;  %v7603_v0 = vcombine.low %v2673_v49, %v2683_v58  ;;  %v2728_v3 = vshll.u32 %v7565_v47, 16  ;;  %v2697_v5 = vsel %vm9475_vm3, %v2692_v59, %v2696_v53  ;;  %v2715_v6 = vor.u32 %v2714_v61, %v2711_v56  ;;  %8361 = vmatprep.subr.bf16.mxu1 %v9547_v46 }
  0x2d   : > { %8309 = vmatprep.mubr.msk.bf16.mxu1 %vm474_vm0, %v9149_v16  ;;  %v2720_v7 = vrot.slane %v2718_v62, 5  ;;  %v2733_v9 = vshrl.u32 %v7566_v57, 16  ;;  %v2702_v10 = vrot.slane %v2701_v1, 4  ;;  %v2724_v11 = vrot.slane %v2722_v2, 4  ;;  %v7575_v62 = vld [vmem:[%s9443_s20 + $0x78] sm:$0xf]  ;;  %8469 = vmatprep.subr.bf16.mxu0 %v9159_v51 }
  0x2e   : > { %8442 = vmatmul.mubr.msk.bf16.gmra.mrb[4].mxu0 %vm474_vm0, %v7603_v0  ;;  %v2730_v12 = vrot.slane %v2728_v3, 5  ;;  %v2736_v13 = vshll.u32 %v7566_v57, 16  ;;  %v2716_v15 = vrot.slane %v2715_v6, 4  ;;  %v2742_v17 = vshll.u32 %v7567_v4, 16  ;;  %v9160_v57 = vld [vmem:[%s10901_s1 + $0x58] sm:$0xff]  }
  0x2f   : > { %v2735_v16 = vrot.slane %v2733_v9, 4  ;;  %v2746_v18 = vshrl.u32 %v7567_v4, 16  ;;  %v2707_v20 = vsel %vm9475_vm3, %v2702_v10, %v2706_v55  ;;  %v2725_v21 = vor.u32 %v2724_v11, %v2720_v7  ;;  %v7574_v55 = vld [vmem:[%s9443_s20 + $0x74] sm:$0x1]  ;;  %8470 = vmatpush3.bf16.msra.mxu0 %v9159_v51  ;;  %v7577_v11 = vld [vmem:[%s9443_s20 + $0x80] sm:$0x1] }
  0x30   : > { %v2738_v22 = vrot.slane %v2736_v13, 5  ;;  %v2752_v23 = vshll.u32 %v7568_v8, 16  ;;  %v7604_v24 = vcombine.low %v2697_v5, %v2707_v20  ;;  %v2721_v25 = vsel %vm9475_vm3, %v2716_v15, %v2720_v7  ;;  %v9155_v8 = vld [vmem:[%s9443_s20 + $0x9c] sm:$0xff]   ;;  %8471 = vmatprep.subr.bf16.mxu0 %v9160_v57 }
  0x31   : > { %v2744_v26 = vrot.slane %v2742_v17, 5  ;;  %v2748_v27 = vrot.slane %v2746_v18, 4  ;;  %v2726_v29 = vrot.slane %v2725_v21, 4  ;;  %v2757_v33 = vshrl.u32 %v7569_v14, 16 }
  0x32   : > { %v2739_v30 = vor.u32 %v2738_v22, %v2735_v16  ;;  %v2754_v31 = vrot.slane %v2752_v23, 5  ;;  %8445 = vmatprep.mubr.msk.bf16.mxu0 %vm474_vm0, %v7604_v24  ;;  %v2760_v36 = vshll.u32 %v7569_v14, 16  ;;  %v2766_v37 = vshll.u32 %v7570_v19, 16  ;;  %v9156_v14 = vld [vmem:[%s9443_s20 + $0xa8] sm:$0xff]  }
  0x33   : > { %v2749_v35 = vor.u32 %v2748_v27, %v2744_v26  ;;  %v2770_v39 = vshrl.u32 %v7570_v19, 16  ;;  %v2731_v42 = vsel %vm9475_vm3, %v2726_v29, %v2730_v12  ;;  %v2759_v44 = vrot.slane %v2757_v33, 4  ;;  %v7578_v19 = vld [vmem:[%s9443_s20 + $0x84] sm:$0xf]  ;;  %v7579_v24 = vld [vmem:[%s9443_s20 + $0x88] sm:$0xf]  ;;  %8472 = vmatpush3.bf16.msra.mxu0 %v9160_v57 }
  0x34   : > { %8310 = vmatmul.mubr.msk.bf16.gmra.mrb[16].mxu1 %vm474_vm0, %v9150_v60  ;;  %v2740_v43 = vrot.slane %v2739_v30, 4  ;;  %v2776_v45 = vshll.u32 %v7571_v28, 16  ;;  %v7605_v47 = vcombine.low %v2721_v25, %v2731_v42  ;;  %v2762_v49 = vrot.slane %v2760_v36, 5  ;;  %v7583_v57 = vld [vmem:[%s9443_s20 + $0x98] sm:$0x1] }
  0x35   : > { %8313 = vmatprep.mubr.msk.bf16.mxu1 %vm474_vm0, %v9152_v63  ;;  %v2750_v48 = vrot.slane %v2749_v35, 4  ;;  %v2768_v50 = vrot.slane %v2766_v37, 5  ;;  %v2772_v53 = vrot.slane %v2770_v39, 4  ;;  %v2781_v56 = vshrl.u32 %v7572_v34, 16  ;;  %v7576_v63 = vld [vmem:[%s9443_s20 + $0x7c] sm:$0xf] }
  0x36   : > { %v2745_v52 = vsel %vm9475_vm3, %v2740_v43, %v2744_v26  ;;  %v2778_v54 = vrot.slane %v2776_v45, 5  ;;  %8446 = vmatmul.mubr.msk.bf16.gmra.mrb[8].mxu0 %vm474_vm0, %v7605_v47  ;;  %v2763_v59 = vor.u32 %v2762_v49, %v2759_v44  ;;  %v2784_v60 = vshll.u32 %v7572_v34, 16  ;;  %v7581_v39 = vld [vmem:[%s9443_s20 + $0x90] sm:$0xf]  ;;  %v7582_v44 = vld [vmem:[%s9443_s20 + $0x94] sm:$0xf] }
  0x37   : > { %v2755_v58 = vsel %vm9475_vm3, %v2750_v48, %v2754_v31  ;;  %v2790_v61 = vshll.u32 %v7573_v41, 16  ;;  %v2773_v1 = vor.u32 %v2772_v53, %v2768_v50  ;;  %v2783_v2 = vrot.slane %v2781_v56, 4  ;;  %v9157_v56 = vld [vmem:[%s9443_s20 + $0xb4] sm:$0xff]  }
  0x38   : > { %v7606_v0 = vcombine.low %v2745_v52, %v2755_v58  ;;  %v2794_v3 = vshrl.u32 %v7573_v41, 16  ;;  %v2764_v4 = vrot.slane %v2763_v59, 4  ;;  %v2786_v5 = vrot.slane %v2784_v60, 5 }
  0x39   : > { %v2792_v6 = vrot.slane %v2790_v61, 5  ;;  %v2800_v7 = vshll.u32 %v7574_v55, 16  ;;  %v2774_v9 = vrot.slane %v2773_v1, 4  ;;  %v2805_v12 = vshrl.u32 %v7575_v62, 16 }
  0x3a   : > { %8449 = vmatprep.mubr.msk.bf16.mxu0 %vm474_vm0, %v7606_v0  ;;  %v2796_v10 = vrot.slane %v2794_v3, 4  ;;  %v2808_v13 = vshll.u32 %v7575_v62, 16  ;;  %v2769_v15 = vsel %vm9475_vm3, %v2764_v4, %v2768_v50  ;;  %v2787_v16 = vor.u32 %v2786_v5, %v2783_v2  ;;  %v716_v0 = vld [vmem:[%s9443_s20] sm:$0xf]  ;;  %v717_v5 = vld [vmem:[%s9443_s20 + $0x4] sm:$0xf] }
  0x3b   : > { %v2802_v17 = vrot.slane %v2800_v7, 5  ;;  %v2814_v18 = vshll.u32 %v7576_v63, 16  ;;  %v2779_v20 = vsel %vm9475_vm3, %v2774_v9, %v2778_v54  ;;  %v2807_v22 = vrot.slane %v2805_v12, 4  ;;  %v718_v12 = vld [vmem:[%s9443_s20 + $0x8] sm:$0x1] }
  0x3c   : > { %8314 = vmatmul.mubr.msk.bf16.gmra.mrb[20].mxu1 %vm474_vm0, %v9153_v32  ;;  %v2797_v21 = vor.u32 %v2796_v10, %v2792_v6  ;;  %v2810_v23 = vrot.slane %v2808_v13, 5  ;;  %v7607_v25 = vcombine.low %v2769_v15, %v2779_v20  ;;  %v2788_v26 = vrot.slane %v2787_v16, 4  ;;  %v7580_v32 = vld [vmem:[%s9443_s20 + $0x8c] sm:$0x1] }
  0x3d   : > { %8317 = vmatprep.mubr.msk.bf16.mxu1 %vm474_vm0, %v9154_v40  ;;  %v2816_v27 = vrot.slane %v2814_v18, 5  ;;  %v2818_v28 = vshrl.u32 %v7576_v63, 16  ;;  %v2824_v31 = vshll.u32 %v7577_v11, 16  ;;  %v2829_v33 = vshrl.u32 %v7578_v19, 16 }
  0x3e   : > { %v2798_v29 = vrot.slane %v2797_v21, 4  ;;  %v2811_v30 = vor.u32 %v2810_v23, %v2807_v22  ;;  %8450 = vmatmul.mubr.msk.bf16.gmra.mrb[12].mxu0 %vm474_vm0, %v7607_v25  ;;  %v2793_v34 = vsel %vm9475_vm3, %v2788_v26, %v2792_v6  ;;  %v2832_v36 = vshll.u32 %v7578_v19, 16  ;;  %v9603_v19 = vld [vmem:[%s10901_s1 + $0x60] sm:$0xff]  }
  0x3f   : > { %v2820_v35 = vrot.slane %v2818_v28, 4  ;;  %v2838_v37 = vshll.u32 %v7579_v24, 16  ;;  %v2826_v42 = vrot.slane %v2824_v31, 5  ;;  %v2831_v43 = vrot.slane %v2829_v33, 4  ;;  %8505 = vmatprep.subr.bf16.mxu0 %v9603_v19 }
  0x40   : > { %v2803_v40 = vsel %vm9475_vm3, %v2798_v29, %v2802_v17  ;;  %v2812_v41 = vrot.slane %v2811_v30, 4  ;;  %v2834_v48 = vrot.slane %v2832_v36, 5  ;;  %v2842_v51 = vshrl.u32 %v7579_v24, 16  ;;  %v7584_v24 = vld [vmem:[%s9443_s20 + $0x9c] sm:$0xf] }
  0x41   : > { %v7608_v45 = vcombine.low %v2793_v34, %v2803_v40  ;;  %v2821_v47 = vor.u32 %v2820_v35, %v2816_v27  ;;  %v2840_v49 = vrot.slane %v2838_v37, 5  ;;  %v2848_v52 = vshll.u32 %v7580_v32, 16  ;;  %v7585_v29 = vld [vmem:[%s9443_s20 + $0xa0] sm:$0xf]  ;;  %v7586_v34 = vld [vmem:[%s9443_s20 + $0xa4] sm:$0x1] }
  0x42   : > { %v2817_v50 = vsel %vm9475_vm3, %v2812_v41, %v2816_v27  ;;  %v2853_v53 = vshrl.u32 %v7581_v39, 16  ;;  %v2835_v55 = vor.u32 %v2834_v48, %v2831_v43  ;;  %v2856_v58 = vshll.u32 %v7581_v39, 16  ;;  %v719_v40 = vld [vmem:[%s9443_s20 + $0xc] sm:$0xf] }
  0x43   : > { %8453 = vmatprep.mubr.msk.bf16.mxu0 %vm474_vm0, %v7608_v45  ;;  %v2822_v54 = vrot.slane %v2821_v47, 4  ;;  %v2862_v59 = vshll.u32 %v7582_v44, 16  ;;  %v2844_v60 = vrot.slane %v2842_v51, 4  ;;  %v2850_v61 = vrot.slane %v2848_v52, 5 }
  0x44   : > { %8318 = vmatmul.mubr.msk.bf16.gmra.mrb[24].mxu1 %vm474_vm0, %v9155_v8  ;;  %v2855_v62 = vrot.slane %v2853_v53, 4  ;;  %v2866_v63 = vshrl.u32 %v7582_v44, 16  ;;  %v2836_v2 = vrot.slane %v2835_v55, 4  ;;  %v2858_v3 = vrot.slane %v2856_v58, 5 }
  0x45   : > { %8321 = vmatprep.mubr.msk.bf16.mxu1 %vm474_vm0, %v9156_v14  ;;  %v2827_v1 = vsel %vm9475_vm3, %v2822_v54, %v2826_v42  ;;  %v2864_v4 = vrot.slane %v2862_v59, 5  ;;  %v2845_v7 = vor.u32 %v2844_v60, %v2840_v49  ;;  %v2872_v9 = vshll.u32 %v7583_v57, 16  ;;  %v721_v54 = vld [vmem:[%s9443_s20 + $0x14] sm:$0x1]  ;;  %v7587_v60 = vld [vmem:[%s9443_s20 + $0xa8] sm:$0xf] }
  0x46   : > { %v7609_v6 = vcombine.low %v2817_v50, %v2827_v1  ;;  %v2868_v8 = vrot.slane %v2866_v63, 4  ;;  %v2841_v10 = vsel %vm9475_vm3, %v2836_v2, %v2840_v49  ;;  %v2859_v11 = vor.u32 %v2858_v3, %v2855_v62  ;;  %v720_v50 = vld [vmem:[%s9443_s20 + $0x10] sm:$0xf] }
  0x47   : > { %v768_v13 = vshrl.u32 %v716_v0, 16  ;;  %v771_v14 = vshll.u32 %v716_v0, 16  ;;  %v2846_v15 = vrot.slane %v2845_v7, 4  ;;  %v2874_v17 = vrot.slane %v2872_v9, 5 }
  0x48   : > { %8454 = vmatmul.mubr.msk.bf16.gmra.mrb[16].mxu0 %vm474_vm0, %v7609_v6  ;;  %v2869_v16 = vor.u32 %v2868_v8, %v2864_v4  ;;  %v777_v18 = vshll.u32 %v717_v5, 16  ;;  %v2860_v20 = vrot.slane %v2859_v11, 4  ;;  %v781_v23 = vshrl.u32 %v717_v5, 16  ;;  %v7588_v5 = vld [vmem:[%s9443_s20 + $0xac] sm:$0xf] }
  0x49   : > { %v770_v21 = vrot.slane %v768_v13, 4  ;;  %v773_v22 = vrot.slane %v771_v14, 5  ;;  %v2851_v25 = vsel %vm9475_vm3, %v2846_v15, %v2850_v61  ;;  %v787_v28 = vshll.u32 %v718_v12, 16  ;;  %v7589_v6 = vld [vmem:[%s9443_s20 + $0xb0] sm:$0x1] }
  0x4a   : > { %v2870_v26 = vrot.slane %v2869_v16, 4  ;;  %v779_v27 = vrot.slane %v777_v18, 5  ;;  %v7610_v30 = vcombine.low %v2841_v10, %v2851_v25  ;;  %v2865_v31 = vsel %vm9475_vm3, %v2860_v20, %v2864_v4  ;;  %v722_v11 = vld [vmem:[%s9443_s20 + $0x18] sm:$0xf]  ;;  %v723_v25 = vld [vmem:[%s9443_s20 + $0x1c] sm:$0xf] }
  0x4b   : > { %v774_v32 = vor.u32 %v773_v22, %v770_v21  ;;  %v783_v33 = vrot.slane %v781_v23, 4  ;;  %v789_v36 = vrot.slane %v787_v28, 5  ;;  %v2877_v37 = vshrl.u32 %v7584_v24, 16 }
  0x4c   : > { %8322 = vmatmul.mubr.msk.bf16.gmra.mrb[28].mxu1 %vm474_vm0, %v9157_v56  ;;  %v2875_v35 = vsel %vm9475_vm3, %v2870_v26, %v2874_v17  ;;  %v2880_v39 = vshll.u32 %v7584_v24, 16  ;;  %8457 = vmatprep.mubr.msk.bf16.mxu0 %vm474_vm0, %v7610_v30  ;;  %v2886_v44 = vshll.u32 %v7585_v29, 16  ;;  %v2890_v48 = vshrl.u32 %v7585_v29, 16 }
  0x4d   : > { %v7611_v41 = vcombine.low %v2865_v31, %v2875_v35  ;;  %v775_v42 = vrot.slane %v774_v32, 4  ;;  %v784_v43 = vor.u32 %v783_v33, %v779_v27  ;;  %v2879_v45 = vrot.slane %v2877_v37, 4  ;;  %v724_v33 = vld [vmem:[%s9443_s20 + $0x20] sm:$0x1] }
  0x4e   : > { %v2882_v47 = vrot.slane %v2880_v39, 5  ;;  %v2896_v49 = vshll.u32 %v7586_v34, 16  ;;  %v2888_v53 = vrot.slane %v2886_v44, 5  ;;  %v792_v55 = vshrl.u32 %v719_v40, 16 }
  0x4f   : > { %v780_v51 = vsel %vm9475_vm3, %v775_v42, %v779_v27  ;;  %v785_v52 = vrot.slane %v784_v43, 4  ;;  %v2892_v57 = vrot.slane %v2890_v48, 4  ;;  %v795_v59 = vshll.u32 %v719_v40, 16  ;;  %v7590_v40 = vld [vmem:[%s9443_s20 + $0xb4] sm:$0xf] }
  0x50   : > { %8458 = vmatmul.mubr.msk.bf16.gmra.mrb[20].mxu0 %vm474_vm0, %v7611_v41  ;;  %v2883_v56 = vor.u32 %v2882_v47, %v2879_v45  ;;  %v2898_v58 = vrot.slane %v2896_v49, 5  ;;  %v794_v62 = vrot.slane %v792_v55, 4  ;;  %v801_v63 = vshll.u32 %v720_v50, 16  ;;  %v7591_v45 = vld [vmem:[%s9443_s20 + $0xb8] sm:$0xf]  ;;  %v9161_v47 = vld [vmem:[%s10901_s1 + $0x28] sm:$0xff]  }
  0x51   : > { %v790_v61 = vsel %vm9475_vm3, %v785_v52, %v789_v36  ;;  %v805_v0 = vshrl.u32 %v720_v50, 16  ;;  %v2893_v3 = vor.u32 %v2892_v57, %v2888_v53  ;;  %v797_v4 = vrot.slane %v795_v59, 5 }
  0x52   : > { %v7390_v1 = vcombine.low %v780_v51, %v790_v61  ;;  %v2884_v2 = vrot.slane %v2883_v56, 4  ;;  %v803_v7 = vrot.slane %v801_v63, 5  ;;  %v811_v9 = vshll.u32 %v721_v54, 16  ;;  %v7592_v54 = vld [vmem:[%s9443_s20 + $0xbc] sm:$0x1] }
  0x53   : > { %v807_v8 = vrot.slane %v805_v0, 4  ;;  %v2901_v10 = vshrl.u32 %v7587_v60, 16  ;;  %v2894_v13 = vrot.slane %v2893_v3, 4  ;;  %v798_v14 = vor.u32 %v797_v4, %v794_v62  ;;  %v725_v61 = vld [vmem:[%s9443_s20 + $0x24] sm:$0xf] }
  0x54   : > { %8329 = vmatprep.mubr.msk.bf16.mxu1 %vm474_vm0, %v7390_v1  ;;  %v2889_v12 = vsel %vm9475_vm3, %v2884_v2, %v2888_v53  ;;  %v2904_v15 = vshll.u32 %v7587_v60, 16  ;;  %v813_v17 = vrot.slane %v811_v9, 5  ;;  %v2910_v20 = vshll.u32 %v7588_v5, 16  ;;  %v726_v2 = vld [vmem:[%s9443_s20 + $0x28] sm:$0xf] }
  0x55   : > { %v808_v16 = vor.u32 %v807_v8, %v803_v7  ;;  %v2903_v18 = vrot.slane %v2901_v10, 4  ;;  %v2899_v21 = vsel %vm9475_vm3, %v2894_v13, %v2898_v58  ;;  %v799_v22 = vrot.slane %v798_v14, 4 }
  0x56   : > { %v2906_v23 = vrot.slane %v2904_v15, 5  ;;  %v2914_v24 = vshrl.u32 %v7588_v5, 16  ;;  %v7612_v26 = vcombine.low %v2889_v12, %v2899_v21  ;;  %v2912_v28 = vrot.slane %v2910_v20, 5  ;;  %v727_v12 = vld [vmem:[%s9443_s20 + $0x2c] sm:$0x1]  ;;  %v9330_v21 = vld [vmem:[%s10901_s1 + $0x30] sm:$0xff]  }
  0x57   : > { %v809_v27 = vrot.slane %v808_v16, 4  ;;  %v2920_v29 = vshll.u32 %v7589_v6, 16  ;;  %v804_v30 = vsel %vm9475_vm3, %v799_v22, %v803_v7  ;;  %v816_v34 = vshrl.u32 %v722_v11, 16  ;;  %v7593_v20 = vld [vmem:[%s9443_s20 + $0xc0] sm:$0xf] }
  0x58   : > { %v2907_v31 = vor.u32 %v2906_v23, %v2903_v18  ;;  %v2916_v32 = vrot.slane %v2914_v24, 4  ;;  %8461 = vmatprep.mubr.msk.bf16.mxu0 %vm474_vm0, %v7612_v26  ;;  %v819_v37 = vshll.u32 %v722_v11, 16  ;;  %v825_v39 = vshll.u32 %v723_v25, 16  ;;  %v7594_v26 = vld [vmem:[%s9443_s20 + $0xc4] sm:$0xf] }
  0x59   : > { %v814_v35 = vsel %vm9475_vm3, %v809_v27, %v813_v17  ;;  %v2922_v36 = vrot.slane %v2920_v29, 5  ;;  %v818_v44 = vrot.slane %v816_v34, 4  ;;  %v829_v50 = vshrl.u32 %v723_v25, 16 }
  0x5a   : > { %v7391_v41 = vcombine.low %v804_v30, %v814_v35  ;;  %v2908_v42 = vrot.slane %v2907_v31, 4  ;;  %v2917_v43 = vor.u32 %v2916_v32, %v2912_v28  ;;  %v821_v48 = vrot.slane %v819_v37, 5 }
  0x5b   : > { %v827_v49 = vrot.slane %v825_v39, 5  ;;  %v835_v51 = vshll.u32 %v724_v33, 16  ;;  %v2925_v55 = vshrl.u32 %v7590_v40, 16  ;;  %v2928_v56 = vshll.u32 %v7590_v40, 16  ;;  %v7595_v33 = vld [vmem:[%s9443_s20 + $0xc8] sm:$0x1] }
  0x5c   : > { %8330 = vmatmul.mubr.msk.bf16.vlgmr.msra.gmra.mrb[0].mxu1 %vm474_vm0, %v7391_v41  ;;  %v2913_v52 = vsel %vm9475_vm3, %v2908_v42, %v2912_v28  ;;  %v2918_v53 = vrot.slane %v2917_v43, 4  ;;  %v822_v57 = vor.u32 %v821_v48, %v818_v44  ;;  %v831_v58 = vrot.slane %v829_v50, 4  ;;  %v728_v41 = vld [vmem:[%s9443_s20 + $0x30] sm:$0xf] }
  0x5d   : > { %8362 = vmatpush3.bf16.msra.mxu1 %v9547_v46  ;;  %v837_v59 = vrot.slane %v835_v51, 5  ;;  %v2934_v60 = vshll.u32 %v7591_v45, 16  ;;  %v2927_v63 = vrot.slane %v2925_v55, 4  ;;  %v2930_v0 = vrot.slane %v2928_v56, 5 }
  0x5e   : > { %v2923_v62 = vsel %vm9475_vm3, %v2918_v53, %v2922_v36  ;;  %v2938_v1 = vshrl.u32 %v7591_v45, 16  ;;  %8363 = vmatprep.subr.bf16.mxu1 %v9161_v47  ;;  %v823_v4 = vrot.slane %v822_v57, 4  ;;  %v832_v5 = vor.u32 %v831_v58, %v827_v49 }
  0x5f   : > { %v7613_v3 = vcombine.low %v2913_v52, %v2923_v62  ;;  %v2936_v6 = vrot.slane %v2934_v60, 5  ;;  %v2931_v46 = vor.u32 %v2930_v0, %v2927_v63  ;;  %v2944_v8 = vshll.u32 %v7592_v54, 16  ;;  %v730_v54 = vld [vmem:[%s9443_s20 + $0x38] sm:$0x1]  ;;  %v7635_v62 = vld [vmem:[%s9443_s20 + $0x10] sm:$0xf] }
  0x60   : > { %v2940_v7 = vrot.slane %v2938_v1, 4  ;;  %v840_v9 = vshrl.u32 %v725_v61, 16  ;;  %v828_v10 = vsel %vm9475_vm3, %v823_v4, %v827_v49  ;;  %v833_v11 = vrot.slane %v832_v5, 4 }
  0x61   : > { %8462 = vmatmul.mubr.msk.bf16.gmra.mrb[24].mxu0 %vm474_vm0, %v7613_v3  ;;  %v843_v13 = vshll.u32 %v725_v61, 16  ;;  %v849_v14 = vshll.u32 %v726_v2, 16  ;;  %8364 = vmatpush3.bf16.msra.mxu1 %v9161_v47  ;;  %v2932_v15 = vrot.slane %v2931_v46, 4  ;;  %v2946_v17 = vrot.slane %v2944_v8, 5  ;;  %v729_v47 = vld [vmem:[%s9443_s20 + $0x34] sm:$0xf] }
  0x62   : > { %v2941_v16 = vor.u32 %v2940_v7, %v2936_v6  ;;  %v842_v18 = vrot.slane %v840_v9, 4  ;;  %8817 = vmatprep.subr.bf16.mxu1 %v9330_v21  ;;  %v838_v22 = vsel %vm9475_vm3, %v833_v11, %v837_v59  ;;  %v853_v25 = vshrl.u32 %v726_v2, 16  ;;  %v7634_v61 = vld [vmem:[%s9443_s20 + $0xc] sm:$0xe]  ;;  %v7636_v3 = vld [vmem:[%s9443_s20 + $0x14] sm:$0x1] }
  0x63   : > { %v845_v23 = vrot.slane %v843_v13, 5  ;;  %v851_v24 = vrot.slane %v849_v14, 5  ;;  %v7392_v27 = vcombine.low %v828_v10, %v838_v22  ;;  %v2937_v28 = vsel %vm9475_vm3, %v2932_v15, %v2936_v6 }
  0x64   : > { %v2942_v29 = vrot.slane %v2941_v16, 4  ;;  %v859_v30 = vshll.u32 %v727_v12, 16  ;;  %v855_v32 = vrot.slane %v853_v25, 4  ;;  %v2949_v34 = vshrl.u32 %v7593_v20, 16  ;;  %v731_v12 = vld [vmem:[%s9443_s20 + $0x3c] sm:$0xf] }
  0x65   : > { %v846_v31 = vor.u32 %v845_v23, %v842_v18  ;;  %v2952_v35 = vshll.u32 %v7593_v20, 16  ;;  %8333 = vmatprep.mubr.msk.bf16.mxu1 %vm474_vm0, %v7392_v27  ;;  %v2958_v39 = vshll.u32 %v7594_v26, 16  ;;  %v2962_v40 = vshrl.u32 %v7594_v26, 16  ;;  %v733_v18 = vld [vmem:[%s9443_s20 + $0x44] sm:$0x1] }
  0x66   : > { %v2947_v36 = vsel %vm9475_vm3, %v2942_v29, %v2946_v17  ;;  %v861_v37 = vrot.slane %v859_v30, 5  ;;  %v856_v44 = vor.u32 %v855_v32, %v851_v24  ;;  %v2951_v45 = vrot.slane %v2949_v34, 4  ;;  %v732_v17 = vld [vmem:[%s9443_s20 + $0x40] sm:$0xf]  ;;  %v7638_v29 = vld [vmem:[%s9443_s20 + $0x1c] sm:$0xf] }
  0x67   : > { %v7614_v42 = vcombine.low %v2937_v28, %v2947_v36  ;;  %v847_v43 = vrot.slane %v846_v31, 4  ;;  %v2954_v48 = vrot.slane %v2952_v35, 5  ;;  %v2960_v49 = vrot.slane %v2958_v39, 5  ;;  %v7639_v34 = vld [vmem:[%s9443_s20 + $0x20] sm:$0x1] }
  0x68   : > { %v2964_v50 = vrot.slane %v2962_v40, 4  ;;  %v2968_v51 = vshll.u32 %v7595_v33, 16  ;;  %v857_v53 = vrot.slane %v856_v44, 4  ;;  %v864_v55 = vshrl.u32 %v728_v41, 16  ;;  %v734_v40 = vld [vmem:[%s9443_s20 + $0x48] sm:$0xf] }
  0x69   : > { %8465 = vmatprep.mubr.msk.bf16.mxu0 %vm474_vm0, %v7614_v42  ;;  %v852_v52 = vsel %vm9475_vm3, %v847_v43, %v851_v24  ;;  %v867_v56 = vshll.u32 %v728_v41, 16  ;;  %v2955_v57 = vor.u32 %v2954_v48, %v2951_v45  ;;  %v873_v60 = vshll.u32 %v729_v47, 16  ;;  %v7637_v24 = vld [vmem:[%s9443_s20 + $0x18] sm:$0xe]  ;;  %v735_v45 = vld [vmem:[%s9443_s20 + $0x4c] sm:$0xf] }
  0x6a   : > { %v2965_v58 = vor.u32 %v2964_v50, %v2960_v49  ;;  %v2970_v59 = vrot.slane %v2968_v51, 5  ;;  %v862_v63 = vsel %vm9475_vm3, %v857_v53, %v861_v37  ;;  %v866_v0 = vrot.slane %v864_v55, 4  ;;  %v736_v51 = vld [vmem:[%s9443_s20 + $0x50] sm:$0x1] }
  0x6b   : > { %v869_v1 = vrot.slane %v867_v56, 5  ;;  %v877_v2 = vshrl.u32 %v729_v47, 16  ;;  %v7393_v4 = vcombine.low %v852_v52, %v862_v63  ;;  %v2956_v5 = vrot.slane %v2955_v57, 4  ;;  %v7640_v56 = vld [vmem:[%s9443_s20 + $0x24] sm:$0xe] }
  0x6c   : > { %v2966_v6 = vrot.slane %v2965_v58, 4  ;;  %v875_v46 = vrot.slane %v873_v60, 5  ;;  %v883_v9 = vshll.u32 %v730_v54, 16  ;;  %v7682_v11 = vrot.slane %v7634_v61, 9  ;;  %v7641_v61 = vld [vmem:[%s9443_s20 + $0x28] sm:$0xf] }
  0x6d   : > { %v870_v7 = vor.u32 %v869_v1, %v866_v0  ;;  %v879_v8 = vrot.slane %v877_v2, 4  ;;  %8334 = vmatmul.mubr.msk.bf16.gmra.mrb[4].mxu1 %vm474_vm0, %v7393_v4  ;;  %v2961_v13 = vsel %vm9475_vm3, %v2956_v5, %v2960_v49  ;;  %v3440_v15 = vrot.slane %v7635_v62, 5  ;;  %v7642_v2 = vld [vmem:[%s9443_s20 + $0x2c] sm:$0x1] }
  0x6e   : > { %v2971_v14 = vsel %vm9475_vm3, %v2966_v6, %v2970_v59  ;;  %v3443_v16 = vrot.slane %v7636_v3, 5  ;;  %v885_v23 = vrot.slane %v883_v9, 5  ;;  %v888_v27 = vshrl.u32 %v731_v12, 16 }
  0x6f   : > { %v7615_v20 = vcombine.low %v2961_v13, %v2971_v14  ;;  %v871_v21 = vrot.slane %v870_v7, 4  ;;  %v880_v22 = vor.u32 %v879_v8, %v875_v46  ;;  %v3441_v25 = vsel %vm9684_vm6, %v7682_v11, %v3440_v15 }
  0x70   : > { %v3442_v26 = vrot.slane %v3440_v15, 4  ;;  %v891_v28 = vshll.u32 %v731_v12, 16  ;;  %v897_v32 = vshll.u32 %v732_v17, 16  ;;  %v901_v33 = vshrl.u32 %v732_v17, 16  ;;  %v738_v12 = vld [vmem:[%s9443_s20 + $0x58] sm:$0xf] }
  0x71   : > { %8466 = vmatmul.mubr.msk.bf16.gmra.mrb[28].mxu0 %vm474_vm0, %v7615_v20  ;;  %v876_v30 = vsel %vm9475_vm3, %v871_v21, %v875_v46  ;;  %v881_v31 = vrot.slane %v880_v22, 4  ;;  %v890_v36 = vrot.slane %v888_v27, 4  ;;  %v907_v39 = vshll.u32 %v733_v18, 16  ;;  %v737_v46 = vld [vmem:[%s9443_s20 + $0x54] sm:$0xf]  ;;  %v9163_v17 = vld [vmem:[%s10901_s1 + $0x68] sm:$0xff]  }
  0x72   : > { %v3444_v35 = vsel %vm9684_vm6, %v3442_v26, %v3443_v16  ;;  %v893_v37 = vrot.slane %v891_v28, 5  ;;  %v899_v43 = vrot.slane %v897_v32, 5  ;;  %v903_v44 = vrot.slane %v901_v33, 4  ;;  %v739_v22 = vld [vmem:[%s9443_s20 + $0x5c] sm:$0x1] }
  0x73   : > { %v886_v41 = vsel %vm9475_vm3, %v881_v31, %v885_v23  ;;  %v7702_v42 = vcombine.low %v3441_v25, %v3444_v35  ;;  %v909_v49 = vrot.slane %v907_v39, 5  ;;  %v7683_v50 = vrot.slane %v7637_v24, 9  ;;  %v7643_v28 = vld [vmem:[%s9443_s20 + $0x30] sm:$0xe]  ;;  %v7644_v33 = vld [vmem:[%s9443_s20 + $0x34] sm:$0xf] }
  0x74   : > { %v7394_v47 = vcombine.low %v876_v30, %v886_v41  ;;  %v894_v48 = vor.u32 %v893_v37, %v890_v36  ;;  %v904_v52 = vor.u32 %v903_v44, %v899_v43  ;;  %v3447_v53 = vrot.slane %v7638_v29, 5  ;;  %v7645_v39 = vld [vmem:[%s9443_s20 + $0x38] sm:$0x1] }
  0x75   : > { %8473 = vmatprep.mubr.msk.bf16.mxu0 %vm474_vm0, %v7702_v42  ;;  %v3450_v54 = vrot.slane %v7639_v34, 5  ;;  %v912_v55 = vshrl.u32 %v734_v40, 16  ;;  %v915_v58 = vshll.u32 %v734_v40, 16  ;;  %v921_v59 = vshll.u32 %v735_v45, 16  ;;  %v740_v40 = vld [vmem:[%s9443_s20 + $0x60] sm:$0xf] }
  0x76   : > { %8337 = vmatprep.mubr.msk.bf16.mxu1 %vm474_vm0, %v7394_v47  ;;  %v895_v57 = vrot.slane %v894_v48, 4  ;;  %v925_v60 = vshrl.u32 %v735_v45, 16  ;;  %v905_v62 = vrot.slane %v904_v52, 4  ;;  %v3448_v63 = vsel %vm9684_vm6, %v7683_v50, %v3447_v53 }
  0x77   : > { %v3449_v0 = vrot.slane %v3447_v53, 4  ;;  %v914_v1 = vrot.slane %v912_v55, 4  ;;  %v917_v4 = vrot.slane %v915_v58, 5  ;;  %v923_v5 = vrot.slane %v921_v59, 5  ;;  %v742_v53 = vld [vmem:[%s9443_s20 + $0x68] sm:$0x1] }
  0x78   : > { %v900_v3 = vsel %vm9475_vm3, %v895_v57, %v899_v43  ;;  %v927_v6 = vrot.slane %v925_v60, 4  ;;  %v910_v7 = vsel %vm9475_vm3, %v905_v62, %v909_v49  ;;  %v931_v9 = vshll.u32 %v736_v51, 16  ;;  %v741_v49 = vld [vmem:[%s9443_s20 + $0x64] sm:$0xf]  ;;  %v7646_v59 = vld [vmem:[%s9443_s20 + $0x3c] sm:$0xe] }
  0x79   : > { %v3451_v8 = vsel %vm9684_vm6, %v3449_v0, %v3450_v54  ;;  %v7684_v11 = vrot.slane %v7640_v56, 9  ;;  %v7395_v13 = vcombine.low %v900_v3, %v910_v7  ;;  %v918_v15 = vor.u32 %v917_v4, %v914_v1  ;;  %v7647_v0 = vld [vmem:[%s9443_s20 + $0x40] sm:$0xf] }
  0x7a   : > { %v7703_v14 = vcombine.low %v3448_v63, %v3451_v8  ;;  %v928_v16 = vor.u32 %v927_v6, %v923_v5  ;;  %v933_v18 = vrot.slane %v931_v9, 5  ;;  %v3454_v20 = vrot.slane %v7641_v61, 5  ;;  %v743_v6 = vld [vmem:[%s9443_s20 + $0x6c] sm:$0xf] }
  0x7b   : > { %v3457_v21 = vrot.slane %v7642_v2, 5  ;;  %v936_v23 = vshrl.u32 %v737_v46, 16  ;;  %8338 = vmatmul.mubr.msk.bf16.gmra.mrb[8].mxu1 %vm474_vm0, %v7395_v13  ;;  %v919_v24 = vrot.slane %v918_v15, 4  ;;  %v939_v26 = vshll.u32 %v737_v46, 16 }
  0x7c   : > { %8474 = vmatmul.mubr.msk.bf16.vlgmr.msra.gmra.mrb[0].mxu0 %vm474_vm0, %v7703_v14  ;;  %v929_v25 = vrot.slane %v928_v16, 4  ;;  %v945_v27 = vshll.u32 %v738_v12, 16  ;;  %v3455_v29 = vsel %vm9684_vm6, %v7684_v11, %v3454_v20  ;;  %v3456_v30 = vrot.slane %v3454_v20, 4  ;;  %v744_v11 = vld [vmem:[%s9443_s20 + $0x70] sm:$0xf] }
  0x7d   : > { %v938_v31 = vrot.slane %v936_v23, 4  ;;  %v949_v32 = vshrl.u32 %v738_v12, 16  ;;  %8506 = vmatpush3.bf16.msra.mxu0 %v9603_v19  ;;  %v924_v34 = vsel %vm9475_vm3, %v919_v24, %v923_v5  ;;  %v941_v36 = vrot.slane %v939_v26, 5  ;;  %v7648_v5 = vld [vmem:[%s9443_s20 + $0x44] sm:$0x1] }
  0x7e   : > { %v934_v35 = vsel %vm9475_vm3, %v929_v25, %v933_v18  ;;  %v947_v37 = vrot.slane %v945_v27, 5  ;;  %8507 = vmatprep.subr.bf16.mxu0 %v9163_v17  ;;  %v3458_v42 = vsel %vm9684_vm6, %v3456_v30, %v3457_v21  ;;  %v955_v44 = vshll.u32 %v739_v22, 16  ;;  %v745_v16 = vld [vmem:[%s9443_s20 + $0x74] sm:$0x1]  ;;  %v7649_v22 = vld [vmem:[%s9443_s20 + $0x48] sm:$0xe] }
  0x7f   : > { %v7396_v41 = vcombine.low %v924_v34, %v934_v35  ;;  %v951_v43 = vrot.slane %v949_v32, 4  ;;  %v7704_v19 = vcombine.low %v3455_v29, %v3458_v42  ;;  %v942_v45 = vor.u32 %v941_v36, %v938_v31  ;;  %v7650_v27 = vld [vmem:[%s9443_s20 + $0x4c] sm:$0xf]  ;;  %v7651_v32 = vld [vmem:[%s9443_s20 + $0x50] sm:$0x1] }
  0x80   : > { %v7685_v47 = vrot.slane %v7643_v28, 9  ;;  %v3461_v48 = vrot.slane %v7644_v33, 5  ;;  %v957_v51 = vrot.slane %v955_v44, 5  ;;  %v3464_v52 = vrot.slane %v7645_v39, 5 }
  0x81   : > { %8341 = vmatprep.mubr.msk.bf16.mxu1 %vm474_vm0, %v7396_v41  ;;  %v952_v50 = vor.u32 %v951_v43, %v947_v37  ;;  %v960_v54 = vshrl.u32 %v740_v40, 16  ;;  %8508 = vmatpush3.bf16.msra.mxu0 %v9163_v17  ;;  %v943_v55 = vrot.slane %v942_v45, 4  ;;  %v963_v58 = vshll.u32 %v740_v40, 16  ;;  %v747_v43 = vld [vmem:[%s9443_s20 + $0x7c] sm:$0xf] }
  0x82   : > { %8477 = vmatprep.mubr.msk.bf16.mxu0 %vm474_vm0, %v7704_v19  ;;  %v3462_v56 = vsel %vm9684_vm6, %v7685_v47, %v3461_v48  ;;  %v3463_v57 = vrot.slane %v3461_v48, 4  ;;  %v969_v62 = vshll.u32 %v741_v49, 16  ;;  %v973_v63 = vshrl.u32 %v741_v49, 16 }
  0x83   : > { %v953_v60 = vrot.slane %v952_v50, 4  ;;  %v962_v61 = vrot.slane %v960_v54, 4  ;;  %v948_v1 = vsel %vm9475_vm3, %v943_v55, %v947_v37  ;;  %v965_v3 = vrot.slane %v963_v58, 5  ;;  %v746_v37 = vld [vmem:[%s9443_s20 + $0x78] sm:$0xf] }
  0x84   : > { %v3465_v2 = vsel %vm9684_vm6, %v3463_v57, %v3464_v52  ;;  %v979_v4 = vshll.u32 %v742_v53, 16  ;;  %v971_v8 = vrot.slane %v969_v62, 5  ;;  %v975_v9 = vrot.slane %v973_v63, 4  ;;  %v7652_v57 = vld [vmem:[%s9443_s20 + $0x54] sm:$0xe] }
  0x85   : > { %v958_v46 = vsel %vm9475_vm3, %v953_v60, %v957_v51  ;;  %v7705_v7 = vcombine.low %v3462_v56, %v3465_v2  ;;  %v966_v13 = vor.u32 %v965_v3, %v962_v61  ;;  %v7686_v15 = vrot.slane %v7646_v59, 9  ;;  %v748_v51 = vld [vmem:[%s9443_s20 + $0x80] sm:$0x1]  ;;  %v7653_v62 = vld [vmem:[%s9443_s20 + $0x58] sm:$0xf] }
  0x86   : > { %v7397_v12 = vcombine.low %v948_v1, %v958_v46  ;;  %v981_v14 = vrot.slane %v979_v4, 5  ;;  %v976_v17 = vor.u32 %v975_v9, %v971_v8  ;;  %v3468_v18 = vrot.slane %v7647_v0, 5  ;;  %v7654_v3 = vld [vmem:[%s9443_s20 + $0x5c] sm:$0x1]  ;;  %v749_v4 = vld [vmem:[%s9443_s20 + $0x84] sm:$0xf] }
  0x87   : > { %8478 = vmatmul.mubr.msk.bf16.gmra.mrb[4].mxu0 %vm474_vm0, %v7705_v7  ;;  %v3471_v20 = vrot.slane %v7648_v5, 5  ;;  %v984_v21 = vshrl.u32 %v743_v6, 16  ;;  %v967_v23 = vrot.slane %v966_v13, 4  ;;  %v987_v24 = vshll.u32 %v743_v6, 16  ;;  %v750_v13 = vld [vmem:[%s9443_s20 + $0x88] sm:$0xf] }
  0x88   : > { %8342 = vmatmul.mubr.msk.bf16.gmra.mrb[12].mxu1 %vm474_vm0, %v7397_v12  ;;  %v993_v25 = vshll.u32 %v744_v11, 16  ;;  %v997_v26 = vshrl.u32 %v744_v11, 16  ;;  %v977_v28 = vrot.slane %v976_v17, 4  ;;  %v3469_v29 = vsel %vm9684_vm6, %v7686_v15, %v3468_v18  ;;  %v751_v17 = vld [vmem:[%s9443_s20 + $0x8c] sm:$0x1] }
  0x89   : > { %v3470_v30 = vrot.slane %v3468_v18, 4  ;;  %v986_v31 = vrot.slane %v984_v21, 4  ;;  %v972_v33 = vsel %vm9475_vm3, %v967_v23, %v971_v8  ;;  %v989_v34 = vrot.slane %v987_v24, 5  ;;  %v7655_v24 = vld [vmem:[%s9443_s20 + $0x60] sm:$0xe] }
  0x8a   : > { %v995_v35 = vrot.slane %v993_v25, 5  ;;  %v999_v36 = vrot.slane %v997_v26, 4  ;;  %v982_v39 = vsel %vm9475_vm3, %v977_v28, %v981_v14  ;;  %v1003_v41 = vshll.u32 %v745_v16, 16 }
  0x8b   : > { %v3472_v40 = vsel %vm9684_vm6, %v3470_v30, %v3471_v20  ;;  %v7687_v42 = vrot.slane %v7649_v22, 9  ;;  %v7398_v44 = vcombine.low %v972_v33, %v982_v39  ;;  %v990_v45 = vor.u32 %v989_v34, %v986_v31  ;;  %v7657_v34 = vld [vmem:[%s9443_s20 + $0x68] sm:$0x1] }
  0x8c   : > { %v7706_v19 = vcombine.low %v3469_v29, %v3472_v40  ;;  %v1000_v47 = vor.u32 %v999_v36, %v995_v35  ;;  %v1005_v48 = vrot.slane %v1003_v41, 5  ;;  %v3475_v49 = vrot.slane %v7650_v27, 5  ;;  %v7656_v29 = vld [vmem:[%s9443_s20 + $0x64] sm:$0xf]  ;;  %v753_v41 = vld [vmem:[%s9443_s20 + $0x94] sm:$0xf] }
  0x8d   : > { %v3478_v50 = vrot.slane %v7651_v32, 5  ;;  %v1008_v52 = vshrl.u32 %v746_v37, 16  ;;  %8345 = vmatprep.mubr.msk.bf16.mxu1 %vm474_vm0, %v7398_v44  ;;  %v991_v53 = vrot.slane %v990_v45, 4  ;;  %v1011_v55 = vshll.u32 %v746_v37, 16  ;;  %v754_v45 = vld [vmem:[%s9443_s20 + $0x98] sm:$0x1] }
  0x8e   : > { %8481 = vmatprep.mubr.msk.bf16.mxu0 %vm474_vm0, %v7706_v19  ;;  %v1001_v54 = vrot.slane %v1000_v47, 4  ;;  %v1017_v56 = vshll.u32 %v747_v43, 16  ;;  %v3476_v58 = vsel %vm9684_vm6, %v7687_v42, %v3475_v49  ;;  %v3477_v59 = vrot.slane %v3475_v49, 4 }
  0x8f   : > { %v1010_v60 = vrot.slane %v1008_v52, 4  ;;  %v1021_v61 = vshrl.u32 %v747_v43, 16  ;;  %v996_v63 = vsel %vm9475_vm3, %v991_v53, %v995_v35  ;;  %v1013_v1 = vrot.slane %v1011_v55, 5  ;;  %v752_v35 = vld [vmem:[%s9443_s20 + $0x90] sm:$0xf] }
  0x90   : > { %v1006_v0 = vsel %vm9475_vm3, %v1001_v54, %v1005_v48  ;;  %v1019_v2 = vrot.slane %v1017_v56, 5  ;;  %v3479_v6 = vsel %vm9684_vm6, %v3477_v59, %v3478_v50  ;;  %v1027_v7 = vshll.u32 %v748_v51, 16  ;;  %v7658_v51 = vld [vmem:[%s9443_s20 + $0x6c] sm:$0xe]  ;;  %v9816_v52 = vld [vmem:[%s10901_s1 + $0x70] sm:$0xff]  }
  0x91   : > { %v7399_v5 = vcombine.low %v996_v63, %v1006_v0  ;;  %v1023_v46 = vrot.slane %v1021_v61, 4  ;;  %v7707_v8 = vcombine.low %v3476_v58, %v3479_v6  ;;  %v1014_v9 = vor.u32 %v1013_v1, %v1010_v60  ;;  %v7660_v58 = vld [vmem:[%s9443_s20 + $0x74] sm:$0x1]  ;;  %v755_v59 = vld [vmem:[%s9443_s20 + $0x9c] sm:$0xf]  ;;  %8541 = vmatprep.subr.bf16.mxu0 %v9816_v52 }
  0x92   : > { %v7688_v11 = vrot.slane %v7652_v57, 9  ;;  %v3482_v12 = vrot.slane %v7653_v62, 5  ;;  %v1029_v15 = vrot.slane %v1027_v7, 5  ;;  %v3485_v16 = vrot.slane %v7654_v3, 5  ;;  %v7659_v57 = vld [vmem:[%s9443_s20 + $0x70] sm:$0xf] }
  0x93   : > { %8346 = vmatmul.mubr.msk.bf16.gmra.mrb[16].mxu1 %vm474_vm0, %v7399_v5  ;;  %v1024_v14 = vor.u32 %v1023_v46, %v1019_v2  ;;  %v1032_v18 = vshrl.u32 %v749_v4, 16  ;;  %8482 = vmatmul.mubr.msk.bf16.gmra.mrb[8].mxu0 %vm474_vm0, %v7707_v8  ;;  %v1015_v20 = vrot.slane %v1014_v9, 4  ;;  %v1035_v23 = vshll.u32 %v749_v4, 16  ;;  %v756_v0 = vld [vmem:[%s9443_s20 + $0xa0] sm:$0xf] }
  0x94   : > { %v3483_v21 = vsel %vm9684_vm6, %v7688_v11, %v3482_v12  ;;  %v3484_v22 = vrot.slane %v3482_v12, 4  ;;  %v1041_v27 = vshll.u32 %v750_v13, 16  ;;  %v1045_v28 = vshrl.u32 %v750_v13, 16  ;;  %v757_v13 = vld [vmem:[%s9443_s20 + $0xa4] sm:$0x1] }
  0x95   : > { %v1025_v25 = vrot.slane %v1024_v14, 4  ;;  %v1034_v26 = vrot.slane %v1032_v18, 4  ;;  %v1020_v30 = vsel %vm9475_vm3, %v1015_v20, %v1019_v2  ;;  %v1037_v32 = vrot.slane %v1035_v23, 5  ;;  %v7661_v18 = vld [vmem:[%s9443_s20 + $0x78] sm:$0xe] }
  0x96   : > { %v3486_v31 = vsel %vm9684_vm6, %v3484_v22, %v3485_v16  ;;  %v1051_v33 = vshll.u32 %v751_v17, 16  ;;  %v1043_v39 = vrot.slane %v1041_v27, 5  ;;  %v1047_v40 = vrot.slane %v1045_v28, 4  ;;  %v7662_v20 = vld [vmem:[%s9443_s20 + $0x7c] sm:$0xf] }
  0x97   : > { %v1030_v36 = vsel %vm9475_vm3, %v1025_v25, %v1029_v15  ;;  %v7708_v37 = vcombine.low %v3483_v21, %v3486_v31  ;;  %v1038_v43 = vor.u32 %v1037_v32, %v1034_v26  ;;  %v7689_v19 = vrot.slane %v7655_v24, 9 }
  0x98   : > { %v7400_v42 = vcombine.low %v1020_v30, %v1030_v36  ;;  %v1053_v44 = vrot.slane %v1051_v33, 5  ;;  %v1048_v47 = vor.u32 %v1047_v40, %v1043_v39  ;;  %v3489_v48 = vrot.slane %v7656_v29, 5  ;;  %v7663_v33 = vld [vmem:[%s9443_s20 + $0x80] sm:$0x1]  ;;  %v759_v40 = vld [vmem:[%s9443_s20 + $0xac] sm:$0xf] }
  0x99   : > { %8485 = vmatprep.mubr.msk.bf16.mxu0 %vm474_vm0, %v7708_v37  ;;  %v3492_v49 = vrot.slane %v7657_v34, 5  ;;  %v1056_v50 = vshrl.u32 %v752_v35, 16  ;;  %v1039_v53 = vrot.slane %v1038_v43, 4  ;;  %v1059_v54 = vshll.u32 %v752_v35, 16  ;;  %v758_v34 = vld [vmem:[%s9443_s20 + $0xa8] sm:$0xf] }
  0x9a   : > { %8349 = vmatprep.mubr.msk.bf16.mxu1 %vm474_vm0, %v7400_v42  ;;  %v1065_v55 = vshll.u32 %v753_v41, 16  ;;  %v1069_v56 = vshrl.u32 %v753_v41, 16  ;;  %v1049_v60 = vrot.slane %v1048_v47, 4  ;;  %v3490_v61 = vsel %vm9684_vm6, %v7689_v19, %v3489_v48  ;;  %v760_v19 = vld [vmem:[%s9443_s20 + $0xb0] sm:$0x1] }
  0x9b   : > { %v3491_v62 = vrot.slane %v3489_v48, 4  ;;  %v1058_v63 = vrot.slane %v1056_v50, 4  ;;  %v1044_v1 = vsel %vm9475_vm3, %v1039_v53, %v1043_v39  ;;  %v1061_v2 = vrot.slane %v1059_v54, 5  ;;  %v7664_v50 = vld [vmem:[%s9443_s20 + $0x84] sm:$0xe] }
  0x9c   : > { %v1067_v3 = vrot.slane %v1065_v55, 5  ;;  %v1071_v4 = vrot.slane %v1069_v56, 4  ;;  %v1054_v5 = vsel %vm9475_vm3, %v1049_v60, %v1053_v44  ;;  %v1075_v46 = vshll.u32 %v754_v45, 16  ;;  %v7665_v56 = vld [vmem:[%s9443_s20 + $0x88] sm:$0xf] }
  0x9d   : > { %v3493_v6 = vsel %vm9684_vm6, %v3491_v62, %v3492_v49  ;;  %v7690_v7 = vrot.slane %v7658_v51, 9  ;;  %v7401_v8 = vcombine.low %v1044_v1, %v1054_v5  ;;  %v1062_v11 = vor.u32 %v1061_v2, %v1058_v63  ;;  %v761_v2 = vld [vmem:[%s9443_s20 + $0xb4] sm:$0xf] }
  0x9e   : > { %v7709_v9 = vcombine.low %v3490_v61, %v3493_v6  ;;  %v1072_v12 = vor.u32 %v1071_v4, %v1067_v3  ;;  %v1077_v14 = vrot.slane %v1075_v46, 5  ;;  %v3496_v15 = vrot.slane %v7659_v57, 5  ;;  %v7666_v57 = vld [vmem:[%s9443_s20 + $0x8c] sm:$0x1]  ;;  %v762_v46 = vld [vmem:[%s9443_s20 + $0xb8] sm:$0xf] }
  0x9f   : > { %v3499_v16 = vrot.slane %v7660_v58, 5  ;;  %v1080_v17 = vshrl.u32 %v755_v59, 16  ;;  %8350 = vmatmul.mubr.msk.bf16.gmra.mrb[20].mxu1 %vm474_vm0, %v7401_v8  ;;  %v1063_v21 = vrot.slane %v1062_v11, 4  ;;  %v1083_v23 = vshll.u32 %v755_v59, 16 }
  0xa0   : > { %8486 = vmatmul.mubr.msk.bf16.gmra.mrb[12].mxu0 %vm474_vm0, %v7709_v9  ;;  %v1073_v22 = vrot.slane %v1072_v12, 4  ;;  %v1089_v24 = vshll.u32 %v756_v0, 16  ;;  %v3497_v25 = vsel %vm9684_vm6, %v7690_v7, %v3496_v15  ;;  %v3498_v26 = vrot.slane %v3496_v15, 4  ;;  %v763_v12 = vld [vmem:[%s9443_s20 + $0xbc] sm:$0x1] }
  0xa1   : > { %v1082_v27 = vrot.slane %v1080_v17, 4  ;;  %v1093_v28 = vshrl.u32 %v756_v0, 16  ;;  %v1068_v29 = vsel %vm9475_vm3, %v1063_v21, %v1067_v3  ;;  %v1085_v31 = vrot.slane %v1083_v23, 5  ;;  %v7667_v17 = vld [vmem:[%s9443_s20 + $0x90] sm:$0xe] }
  0xa2   : > { %v1078_v30 = vsel %vm9475_vm3, %v1073_v22, %v1077_v14  ;;  %v1091_v32 = vrot.slane %v1089_v24, 5  ;;  %v3500_v36 = vsel %vm9684_vm6, %v3498_v26, %v3499_v16  ;;  %v1099_v39 = vshll.u32 %v757_v13, 16  ;;  %v7668_v23 = vld [vmem:[%s9443_s20 + $0x94] sm:$0xf]  ;;  %v7669_v24 = vld [vmem:[%s9443_s20 + $0x98] sm:$0x1] }
  0xa3   : > { %v7402_v35 = vcombine.low %v1068_v29, %v1078_v30  ;;  %v1095_v37 = vrot.slane %v1093_v28, 4  ;;  %v7710_v41 = vcombine.low %v3497_v25, %v3500_v36  ;;  %v1086_v42 = vor.u32 %v1085_v31, %v1082_v27  ;;  %v1521_v25 = vld [vmem:[%s9443_s20] sm:$0xe]  ;;  %v1522_v30 = vld [vmem:[%s9443_s20 + $0x4] sm:$0xf] }
  0xa4   : > { %v7691_v43 = vrot.slane %v7661_v18, 9  ;;  %v3503_v44 = vrot.slane %v7662_v20, 5  ;;  %v1101_v47 = vrot.slane %v1099_v39, 5  ;;  %v3506_v48 = vrot.slane %v7663_v33, 5 }
  0xa5   : > { %8353 = vmatprep.mubr.msk.bf16.mxu1 %vm474_vm0, %v7402_v35  ;;  %v1096_v45 = vor.u32 %v1095_v37, %v1091_v32  ;;  %v1104_v49 = vshrl.u32 %v758_v34, 16  ;;  %8489 = vmatprep.mubr.msk.bf16.mxu0 %vm474_vm0, %v7710_v41  ;;  %v1087_v51 = vrot.slane %v1086_v42, 4  ;;  %v1107_v55 = vshll.u32 %v758_v34, 16 }
  0xa6   : > { %v3504_v53 = vsel %vm9684_vm6, %v7691_v43, %v3503_v44  ;;  %v3505_v54 = vrot.slane %v3503_v44, 4  ;;  %v1113_v60 = vshll.u32 %v759_v40, 16  ;;  %v1117_v61 = vshrl.u32 %v759_v40, 16  ;;  %v1523_v40 = vld [vmem:[%s9443_s20 + $0x8] sm:$0x1] }
  0xa7   : > { %v1097_v58 = vrot.slane %v1096_v45, 4  ;;  %v1106_v59 = vrot.slane %v1104_v49, 4  ;;  %v1092_v62 = vsel %vm9475_vm3, %v1087_v51, %v1091_v32  ;;  %v1109_v0 = vrot.slane %v1107_v55, 5  ;;  %v7671_v45 = vld [vmem:[%s9443_s20 + $0xa0] sm:$0xf] }
  0xa8   : > { %v3507_v63 = vsel %vm9684_vm6, %v3505_v54, %v3506_v48  ;;  %v1123_v1 = vshll.u32 %v760_v19, 16  ;;  %v1115_v5 = vrot.slane %v1113_v60, 5  ;;  %v1119_v6 = vrot.slane %v1117_v61, 4  ;;  %v7670_v19 = vld [vmem:[%s9443_s20 + $0x9c] sm:$0xe] }
  0xa9   : > { %v1102_v3 = vsel %vm9475_vm3, %v1097_v58, %v1101_v47  ;;  %v7711_v4 = vcombine.low %v3504_v53, %v3507_v63  ;;  %v1110_v8 = vor.u32 %v1109_v0, %v1106_v59  ;;  %v7692_v11 = vrot.slane %v7664_v50, 9  ;;  %v7672_v51 = vld [vmem:[%s9443_s20 + $0xa4] sm:$0x1]  ;;  %v1524_v53 = vld [vmem:[%s9443_s20 + $0xc] sm:$0xe] }
  0xaa   : > { %v7403_v7 = vcombine.low %v1092_v62, %v1102_v3  ;;  %v1125_v9 = vrot.slane %v1123_v1, 5  ;;  %v1120_v13 = vor.u32 %v1119_v6, %v1115_v5  ;;  %v3510_v14 = vrot.slane %v7665_v56, 5  ;;  %v1525_v58 = vld [vmem:[%s9443_s20 + $0x10] sm:$0xf]  ;;  %v1526_v59 = vld [vmem:[%s9443_s20 + $0x14] sm:$0x1] }
  0xab   : > { %8490 = vmatmul.mubr.msk.bf16.gmra.mrb[16].mxu0 %vm474_vm0, %v7711_v4  ;;  %v3513_v15 = vrot.slane %v7666_v57, 5  ;;  %v1128_v16 = vshrl.u32 %v761_v2, 16  ;;  %v1111_v18 = vrot.slane %v1110_v8, 4  ;;  %v1131_v20 = vshll.u32 %v761_v2, 16  ;;  %v7673_v60 = vld [vmem:[%s9443_s20 + $0xa8] sm:$0xe] }
  0xac   : > { %8354 = vmatmul.mubr.msk.bf16.gmra.mrb[24].mxu1 %vm474_vm0, %v7403_v7  ;;  %v1137_v21 = vshll.u32 %v762_v46, 16  ;;  %v1141_v22 = vshrl.u32 %v762_v46, 16  ;;  %v1121_v26 = vrot.slane %v1120_v13, 4  ;;  %v3511_v27 = vsel %vm9684_vm6, %v7692_v11, %v3510_v14  ;;  %v7674_v1 = vld [vmem:[%s9443_s20 + $0xac] sm:$0xf] }
  0xad   : > { %v3512_v28 = vrot.slane %v3510_v14, 4  ;;  %v1130_v29 = vrot.slane %v1128_v16, 4  ;;  %v1116_v31 = vsel %vm9475_vm3, %v1111_v18, %v1115_v5  ;;  %v1133_v32 = vrot.slane %v1131_v20, 5  ;;  %v7675_v2 = vld [vmem:[%s9443_s20 + $0xb0] sm:$0x1] }
  0xae   : > { %v1139_v33 = vrot.slane %v1137_v21, 5  ;;  %v1143_v34 = vrot.slane %v1141_v22, 4  ;;  %v1126_v35 = vsel %vm9475_vm3, %v1121_v26, %v1125_v9  ;;  %v1147_v37 = vshll.u32 %v763_v12, 16  ;;  %v1527_v3 = vld [vmem:[%s9443_s20 + $0x18] sm:$0xe] }
  0xaf   : > { %v3514_v36 = vsel %vm9684_vm6, %v3512_v28, %v3513_v15  ;;  %v7693_v39 = vrot.slane %v7667_v17, 9  ;;  %v7404_v41 = vcombine.low %v1116_v31, %v1126_v35  ;;  %v1134_v43 = vor.u32 %v1133_v32, %v1130_v29  ;;  %v1528_v7 = vld [vmem:[%s9443_s20 + $0x1c] sm:$0xf]  ;;  %v1529_v13 = vld [vmem:[%s9443_s20 + $0x20] sm:$0x1] }
  0xb0   : > { %v7712_v42 = vcombine.low %v3511_v27, %v3514_v36  ;;  %v1144_v44 = vor.u32 %v1143_v34, %v1139_v33  ;;  %v1149_v47 = vrot.slane %v1147_v37, 5  ;;  %v3517_v48 = vrot.slane %v7668_v23, 5  ;;  %v7676_v18 = vld [vmem:[%s9443_s20 + $0xb4] sm:$0xe]  ;;  %v7677_v20 = vld [vmem:[%s9443_s20 + $0xb8] sm:$0xf] }
  0xb1   : > { %v3520_v49 = vrot.slane %v7669_v24, 5  ;;  %v7424_v50 = vrot.slane %v1521_v25, 9  ;;  %8357 = vmatprep.mubr.msk.bf16.mxu1 %vm474_vm0, %v7404_v41  ;;  %v1135_v54 = vrot.slane %v1134_v43, 4  ;;  %v1622_v56 = vrot.slane %v1522_v30, 5  ;;  %v7678_v25 = vld [vmem:[%s9443_s20 + $0xbc] sm:$0x1] }
  0xb2   : > { %8493 = vmatprep.mubr.msk.bf16.mxu0 %vm474_vm0, %v7712_v42  ;;  %v1145_v55 = vrot.slane %v1144_v44, 4  ;;  %v1625_v57 = vrot.slane %v1523_v40, 5  ;;  %v3518_v61 = vsel %vm9684_vm6, %v7693_v39, %v3517_v48  ;;  %v3519_v62 = vrot.slane %v3517_v48, 4  ;;  %v1530_v26 = vld [vmem:[%s9443_s20 + $0x24] sm:$0xe] }
  0xb3   : > { %v7694_v63 = vrot.slane %v7670_v19, 9  ;;  %v3524_v0 = vrot.slane %v7671_v45, 5  ;;  %v1140_v4 = vsel %vm9475_vm3, %v1135_v54, %v1139_v33  ;;  %v1623_v6 = vsel %vm9684_vm6, %v7424_v50, %v1622_v56  ;;  %v1531_v35 = vld [vmem:[%s9443_s20 + $0x28] sm:$0xf]  ;;  %v1532_v36 = vld [vmem:[%s9443_s20 + $0x2c] sm:$0x1] }
  0xb4   : > { %v1150_v5 = vsel %vm9475_vm3, %v1145_v55, %v1149_v47  ;;  %v1624_v46 = vrot.slane %v1622_v56, 4  ;;  %v3521_v9 = vsel %vm9684_vm6, %v3519_v62, %v3520_v49  ;;  %v3527_v16 = vrot.slane %v7672_v51, 5  ;;  %v7679_v37 = vld [vmem:[%s9443_s20 + $0xc0] sm:$0xe]  ;;  %v7680_v43 = vld [vmem:[%s9443_s20 + $0xc4] sm:$0xf] }
  0xb5   : > { %v7405_v8 = vcombine.low %v1140_v4, %v1150_v5  ;;  %v3525_v11 = vsel %vm9684_vm6, %v7694_v63, %v3524_v0  ;;  %v3526_v12 = vrot.slane %v3524_v0, 4  ;;  %v7713_v14 = vcombine.low %v3518_v61, %v3521_v9  ;;  %v7681_v44 = vld [vmem:[%s9443_s20 + $0xc8] sm:$0x1]  ;;  %v1533_v54 = vld [vmem:[%s9443_s20 + $0x30] sm:$0xe] }
  0xb6   : > { %v1626_v15 = vsel %vm9684_vm6, %v1624_v46, %v1625_v57  ;;  %v7425_v17 = vrot.slane %v1524_v53, 9  ;;  %v1629_v22 = vrot.slane %v1525_v58, 5  ;;  %v1632_v23 = vrot.slane %v1526_v59, 5  ;;  %v1534_v55 = vld [vmem:[%s9443_s20 + $0x34] sm:$0xf] }
  0xb7   : > { %8358 = vmatmul.mubr.msk.bf16.gmra.mrb[28].mxu1 %vm474_vm0, %v7405_v8  ;;  %v7444_v21 = vcombine.low %v1623_v6, %v1626_v15  ;;  %v7695_v24 = vrot.slane %v7673_v60, 9  ;;  %8494 = vmatmul.mubr.msk.bf16.gmra.mrb[20].mxu0 %vm474_vm0, %v7713_v14  ;;  %v3528_v27 = vsel %vm9684_vm6, %v3526_v12, %v3527_v16  ;;  %v3531_v28 = vrot.slane %v7674_v1, 5  ;;  %v1535_v60 = vld [vmem:[%s9443_s20 + $0x38] sm:$0x1]  ;;  %v1536_v1 = vld [vmem:[%s9443_s20 + $0x3c] sm:$0xe] }
  0xb8   : > { %v3534_v29 = vrot.slane %v7675_v2, 5  ;;  %v7426_v30 = vrot.slane %v1527_v3, 9  ;;  %v7714_v31 = vcombine.low %v3525_v11, %v3528_v27  ;;  %v1630_v32 = vsel %vm9684_vm6, %v7425_v17, %v1629_v22  ;;  %v1537_v6 = vld [vmem:[%s9443_s20 + $0x40] sm:$0xf]  ;;  %v9331_v46 = vld [vmem:[%s10901_s1 + $0x30] sm:$0xff]  }
  0xb9   : > { %8365 = vmatprep.mubr.msk.bf16.mxu1 %vm474_vm0, %v7444_v21  ;;  %v1631_v33 = vrot.slane %v1629_v22, 4  ;;  %v1636_v34 = vrot.slane %v1528_v7, 5  ;;  %v3532_v39 = vsel %vm9684_vm6, %v7695_v24, %v3531_v28  ;;  %v3533_v40 = vrot.slane %v3531_v28, 4  ;;  %v1538_v12 = vld [vmem:[%s9443_s20 + $0x44] sm:$0x1] }
  0xba   : > { %v1639_v41 = vrot.slane %v1529_v13, 5  ;;  %v7696_v42 = vrot.slane %v7676_v18, 9  ;;  %8497 = vmatprep.mubr.msk.bf16.mxu0 %vm474_vm0, %v7714_v31  ;;  %v3538_v48 = vrot.slane %v7677_v20, 5  ;;  %v3541_v51 = vrot.slane %v7678_v25, 5  ;;  %v1539_v13 = vld [vmem:[%s9443_s20 + $0x48] sm:$0xe] }
  0xbb   : > { %v1633_v19 = vsel %vm9684_vm6, %v1631_v33, %v1632_v23  ;;  %v1637_v45 = vsel %vm9684_vm6, %v7426_v30, %v1636_v34  ;;  %v1638_v47 = vrot.slane %v1636_v34, 4  ;;  %v3535_v50 = vsel %vm9684_vm6, %v3533_v40, %v3534_v29  ;;  %v1540_v17 = vld [vmem:[%s9443_s20 + $0x4c] sm:$0xf]  ;;  %v9332_v18 = vld [vmem:[%s10901_s1 + $0x38] sm:$0xff]   ;;  %v1541_v24 = vld [vmem:[%s9443_s20 + $0x50] sm:$0x1] }
  0xbc   : > { %v7445_v49 = vcombine.low %v1630_v32, %v1633_v19  ;;  %v7427_v53 = vrot.slane %v1530_v26, 9  ;;  %v7715_v56 = vcombine.low %v3532_v39, %v3535_v50  ;;  %v3539_v58 = vsel %vm9684_vm6, %v7696_v42, %v3538_v48  ;;  %v1543_v28 = vld [vmem:[%s9443_s20 + $0x58] sm:$0xf]  ;;  %v1546_v39 = vld [vmem:[%s9443_s20 + $0x64] sm:$0xf] }
  0xbd   : > { %v1640_v57 = vsel %vm9684_vm6, %v1638_v47, %v1639_v41  ;;  %v3540_v59 = vrot.slane %v3538_v48, 4  ;;  %v1643_v62 = vrot.slane %v1531_v35, 5  ;;  %v1646_v63 = vrot.slane %v1532_v36, 5  ;;  %v9164_v34 = vld [vmem:[%s9443_s20 + $0x18] sm:$0xff]   ;;  %v1542_v41 = vld [vmem:[%s9443_s20 + $0x54] sm:$0xe] }
  0xbe   : > { %v7446_v61 = vcombine.low %v1637_v45, %v1640_v57  ;;  %v7697_v0 = vrot.slane %v7679_v37, 9  ;;  %v3545_v3 = vrot.slane %v7680_v43, 5  ;;  %v3548_v4 = vrot.slane %v7681_v44, 5  ;;  %v1544_v42 = vld [vmem:[%s9443_s20 + $0x5c] sm:$0x1]  ;;  %v9165_v50 = vld [vmem:[%s9443_s20 + $0x24] sm:$0xff]  }
  0xbf   : > { %8366 = vmatmul.mubr.msk.bf16.vlgmr.msra.gmra.mrb[0].mxu1 %vm474_vm0, %v7445_v49  ;;  %v3542_v2 = vsel %vm9684_vm6, %v3540_v59, %v3541_v51  ;;  %v7428_v5 = vrot.slane %v1533_v54, 9  ;;  %8498 = vmatmul.mubr.msk.bf16.gmra.mrb[24].mxu0 %vm474_vm0, %v7715_v56  ;;  %v1644_v8 = vsel %vm9684_vm6, %v7427_v53, %v1643_v62  ;;  %v1645_v9 = vrot.slane %v1643_v62, 4  ;;  %v1545_v45 = vld [vmem:[%s9443_s20 + $0x60] sm:$0xe]  ;;  %v1547_v51 = vld [vmem:[%s9443_s20 + $0x68] sm:$0x1] }
  0xc0   : > { %8819 = vmatpush3.bf16.msra.mxu1 %v9331_v46  ;;  %v7716_v7 = vcombine.low %v3539_v58, %v3542_v2  ;;  %v1650_v11 = vrot.slane %v1534_v55, 5  ;;  %8369 = vmatprep.mubr.msk.bf16.mxu1 %vm474_vm0, %v7446_v61  ;;  %v3546_v14 = vsel %vm9684_vm6, %v7697_v0, %v3545_v3  ;;  %v3547_v15 = vrot.slane %v3545_v3, 4  ;;  %v1549_v54 = vld [vmem:[%s9443_s20 + $0x70] sm:$0xf]  ;;  %v1552_v0 = vld [vmem:[%s9443_s20 + $0x7c] sm:$0xf] }
  0xc1   : > { %v1653_v16 = vrot.slane %v1535_v60, 5  ;;  %8818 = vmatprep.subr.bf16.mxu1 %v9332_v18  ;;  %v1647_v20 = vsel %vm9684_vm6, %v1645_v9, %v1646_v63  ;;  %v1657_v23 = vrot.slane %v1537_v6, 5  ;;  %v7429_v27 = vrot.slane %v1536_v1, 9  ;;  %v9166_v56 = vld [vmem:[%s9443_s20 + $0x30] sm:$0xff]   ;;  %v9185_v63 = vld [vmem:[%s10901_s1 + $0x78] sm:$0xff]  }
  0xc2   : > { %8501 = vmatprep.mubr.msk.bf16.mxu0 %vm474_vm0, %v7716_v7  ;;  %v1651_v21 = vsel %vm9684_vm6, %v7428_v5, %v1650_v11  ;;  %v1652_v22 = vrot.slane %v1650_v11, 4  ;;  %v7447_v25 = vcombine.low %v1644_v8, %v1647_v20  ;;  %v3549_v26 = vsel %vm9684_vm6, %v3547_v15, %v3548_v4  ;;  %v1548_v1 = vld [vmem:[%s9443_s20 + $0x6c] sm:$0xe]  ;;  %v1550_v2 = vld [vmem:[%s9443_s20 + $0x74] sm:$0x1]  ;;  %v10017_v11 = vld [vmem:[%s10901_s1 + $0x80] sm:$0xff]  }
  0xc3   : > { %v7717_v29 = vcombine.low %v3546_v14, %v3549_v26  ;;  %v1659_v31 = vrot.slane %v1657_v23, 4  ;;  %v1660_v32 = vrot.slane %v1538_v12, 5  ;;  %v7430_v35 = vrot.slane %v1539_v13, 9  ;;  %v1551_v6 = vld [vmem:[%s9443_s20 + $0x78] sm:$0xe]  ;;  %v9167_v14 = vld [vmem:[%s9443_s20 + $0x3c] sm:$0xff]  }
  0xc4   : > { %v1654_v30 = vsel %vm9684_vm6, %v1652_v22, %v1653_v16  ;;  %8820 = vmatpush3.bf16.msra.mxu1 %v9332_v18  ;;  %v1664_v36 = vrot.slane %v1540_v17, 5  ;;  %v1667_v37 = vrot.slane %v1541_v24, 5  ;;  %v1658_v43 = vsel %vm9684_vm6, %v7429_v27, %v1657_v23  ;;  %v1553_v46 = vld [vmem:[%s9443_s20 + $0x80] sm:$0x1]  ;;  %v1555_v18 = vld [vmem:[%s9443_s20 + $0x88] sm:$0xf] }
  0xc5   : > { %v7448_v33 = vcombine.low %v1651_v21, %v1654_v30  ;;  %v1661_v44 = vsel %vm9684_vm6, %v1659_v31, %v1660_v32  ;;  %v1671_v19 = vrot.slane %v1543_v28, 5  ;;  %v1678_v49 = vrot.slane %v1546_v39, 5  ;;  %v9168_v20 = vld [vmem:[%s9443_s20 + $0x48] sm:$0xff]   ;;  %v1558_v24 = vld [vmem:[%s9443_s20 + $0x94] sm:$0xf] }
  0xc6   : > { %v1666_v40 = vrot.slane %v1664_v36, 4  ;;  %v1665_v47 = vsel %vm9684_vm6, %v7430_v35, %v1664_v36  ;;  %v7449_v53 = vcombine.low %v1658_v43, %v1661_v44  ;;  %v7431_v57 = vrot.slane %v1542_v41, 9  ;;  %v1554_v27 = vld [vmem:[%s9443_s20 + $0x84] sm:$0xe]  ;;  %v1556_v31 = vld [vmem:[%s9443_s20 + $0x8c] sm:$0x1] }
  0xc7   : > { %8370 = vmatmul.mubr.msk.bf16.gmra.mrb[4].mxu1 %vm474_vm0, %v7447_v25  ;;  %8502 = vmatmul.mubr.msk.bf16.gmra.mrb[28].mxu0 %vm474_vm0, %v7717_v29  ;;  %v1673_v58 = vrot.slane %v1671_v19, 4  ;;  %v1674_v59 = vrot.slane %v1544_v42, 5  ;;  %v7432_v60 = vrot.slane %v1545_v45, 9  ;;  %v1680_v61 = vrot.slane %v1678_v49, 4  ;;  %v1561_v36 = vld [vmem:[%s9443_s20 + $0xa0] sm:$0xf] }
  0xc8   : > { %8373 = vmatprep.mubr.msk.bf16.mxu1 %vm474_vm0, %v7448_v33  ;;  %8509 = vmatprep.mubr.msk.bf16.mxu0 %vm474_vm0, %v9164_v34  ;;  %v1668_v48 = vsel %vm9684_vm6, %v1666_v40, %v1667_v37  ;;  %v1681_v62 = vrot.slane %v1547_v51, 5  ;;  %v1672_v3 = vsel %vm9684_vm6, %v7431_v57, %v1671_v19  ;;  %v1685_v5 = vrot.slane %v1549_v54, 5  ;;  %v1557_v33 = vld [vmem:[%s9443_s20 + $0x90] sm:$0xe]  ;;  %v1559_v34 = vld [vmem:[%s9443_s20 + $0x98] sm:$0x1] }
  0xc9   : > { %v7450_v55 = vcombine.low %v1665_v47, %v1668_v48  ;;  %v1675_v4 = vsel %vm9684_vm6, %v1673_v58, %v1674_v59  ;;  %v1679_v7 = vsel %vm9684_vm6, %v7432_v60, %v1678_v49  ;;  %v1692_v9 = vrot.slane %v1552_v0, 5  ;;  %v1564_v37 = vld [vmem:[%s9443_s20 + $0xac] sm:$0xf]  ;;  %v9169_v39 = vld [vmem:[%s9443_s20 + $0x54] sm:$0xff]   ;;  %v9170_v44 = vld [vmem:[%s9443_s20 + $0x60] sm:$0xff]  }
  0xca   : > { %v1682_v8 = vsel %vm9684_vm6, %v1680_v61, %v1681_v62  ;;  %v7451_v12 = vcombine.low %v1672_v3, %v1675_v4  ;;  %v7433_v13 = vrot.slane %v1548_v1, 9  ;;  %v1687_v16 = vrot.slane %v1685_v5, 4  ;;  %v1560_v48 = vld [vmem:[%s9443_s20 + $0x9c] sm:$0xe]  ;;  %v1563_v57 = vld [vmem:[%s9443_s20 + $0xa8] sm:$0xe] }
  0xcb   : > { %v7452_v15 = vcombine.low %v1679_v7, %v1682_v8  ;;  %v1688_v17 = vrot.slane %v1550_v2, 5  ;;  %v7434_v21 = vrot.slane %v1551_v6, 9  ;;  %v1694_v22 = vrot.slane %v1692_v9, 4  ;;  %v1565_v58 = vld [vmem:[%s9443_s20 + $0xb0] sm:$0x1]  ;;  %v9172_v7 = vld [vmem:[%s9443_s20 + $0x78] sm:$0xff]  }
  0xcc   : > { %v1695_v23 = vrot.slane %v1553_v46, 5  ;;  %v1686_v25 = vsel %vm9684_vm6, %v7433_v13, %v1685_v5  ;;  %v1699_v28 = vrot.slane %v1555_v18, 5  ;;  %v1706_v32 = vrot.slane %v1558_v24, 5  ;;  %v10062_v59 = vld [vmem:[%s9443_s20 + $0xb4] sm:$0xe]  ;;  %v9171_v2 = vld [vmem:[%s9443_s20 + $0x6c] sm:$0xff]  }
  0xcd   : > { %v1689_v26 = vsel %vm9684_vm6, %v1687_v16, %v1688_v17  ;;  %v1693_v29 = vsel %vm9684_vm6, %v7434_v21, %v1692_v9  ;;  %v7435_v41 = vrot.slane %v1554_v27, 9  ;;  %v1702_v43 = vrot.slane %v1556_v31, 5  ;;  %v10065_v61 = vld [vmem:[%s9443_s20 + $0xb8] sm:$0xf]  ;;  %v10068_v62 = vld [vmem:[%s9443_s20 + $0xbc] sm:$0x1] }
  0xce   : > { %v1696_v30 = vsel %vm9684_vm6, %v1694_v22, %v1695_v23  ;;  %v7453_v35 = vcombine.low %v1686_v25, %v1689_v26  ;;  %v1701_v42 = vrot.slane %v1699_v28, 4  ;;  %v7436_v19 = vrot.slane %v1557_v33, 9  ;;  %v7806_v46 = vld [vmem:[%s9443_s20 + $0x18] sm:$0xf]  ;;  %v7807_v9 = vld [vmem:[%s9443_s20 + $0x1c] sm:$0xf] }
  0xcf   : > { %8374 = vmatmul.mubr.msk.bf16.gmra.mrb[8].mxu1 %vm474_vm0, %v7449_v53  ;;  %8510 = vmatmul.mubr.msk.bf16.vlgmr.msra.gmra.mrb[0].mxu0 %vm474_vm0, %v9165_v50  ;;  %v7454_v40 = vcombine.low %v1693_v29, %v1696_v30  ;;  %v1708_v45 = vrot.slane %v1706_v32, 4  ;;  %v1709_v47 = vrot.slane %v1559_v34, 5  ;;  %v1713_v49 = vrot.slane %v1561_v36, 5  ;;  %v1562_v53 = vld [vmem:[%s9443_s20 + $0xa4] sm:$0x1] }
  0xd0   : > { %8377 = vmatprep.mubr.msk.bf16.mxu1 %vm474_vm0, %v7450_v55  ;;  %8513 = vmatprep.mubr.msk.bf16.mxu0 %vm474_vm0, %v9166_v56  ;;  %v1700_v50 = vsel %vm9684_vm6, %v7435_v41, %v1699_v28  ;;  %v1703_v51 = vsel %vm9684_vm6, %v1701_v42, %v1702_v43  ;;  %v1720_v54 = vrot.slane %v1564_v37, 5  ;;  %v1707_v55 = vsel %vm9684_vm6, %v7436_v19, %v1706_v32  ;;  %v7812_v21 = vld [vmem:[%s9443_s20 + $0x30] sm:$0xf]  ;;  %v7813_v26 = vld [vmem:[%s9443_s20 + $0x34] sm:$0xf]  ;;  %v9173_v33 = vld [vmem:[%s9443_s20 + $0x84] sm:$0xff]  }
  0xd1   : > { %8542 = vmatpush3.bf16.msra.mxu0 %v9816_v52  ;;  %v9357_v52 = vmov 0.0|0.0   ;;  %v1710_v56 = vsel %vm9684_vm6, %v1708_v45, %v1709_v47  ;;  %v7437_v60 = vrot.slane %v1560_v48, 9  ;;  %v1715_v0 = vrot.slane %v1713_v49, 4  ;;  %v7808_v27 = vld [vmem:[%s9443_s20 + $0x20] sm:$0x1]  ;;  %v9174_v43 = vld [vmem:[%s9443_s20 + $0x90] sm:$0xff]  }
  0xd2   : > { %8543 = vmatprep.subr.bf16.mxu0 %v9185_v63  ;;  %8745 = vmatprep.subr.bf16.mxu1 %v9357_v52  ;;  %v1716_v1 = vrot.slane %v1562_v53, 5  ;;  %v7456_v3 = vcombine.low %v1707_v55, %v1710_v56  ;;  %v7438_v4 = vrot.slane %v1563_v57, 9  ;;  %v1722_v5 = vrot.slane %v1720_v54, 4 }
  0xd3   : > { %v1723_v6 = vrot.slane %v1565_v58, 5  ;;  %v7439_v8 = vrot.slane %v10062_v59, 9  ;;  %v1730_v13 = vrot.slane %v10068_v62, 5  ;;  %v1714_v16 = vsel %vm9684_vm6, %v7437_v60, %v1713_v49  ;;  %v7811_v49 = vld [vmem:[%s9443_s20 + $0x2c] sm:$0x1] }
  0xd4   : > { %v1717_v17 = vsel %vm9684_vm6, %v1715_v0, %v1716_v1  ;;  %v4407_v18 = vshrl.u32 %v7806_v46, 16  ;;  %v1721_v22 = vsel %vm9684_vm6, %v7438_v4, %v1720_v54  ;;  %v4416_v24 = vshll.u32 %v7807_v9, 16  ;;  %v7814_v59 = vld [vmem:[%s9443_s20 + $0x38] sm:$0x1]  ;;  %v7815_v62 = vld [vmem:[%s9443_s20 + $0x3c] sm:$0xf] }
  0xd5   : > { %8544 = vmatpush3.bf16.msra.mxu0 %v9185_v63  ;;  %v7455_v63 = vcombine.low %v1700_v50, %v1703_v51  ;;  %v1724_v23 = vsel %vm9684_vm6, %v1722_v5, %v1723_v6  ;;  %v4420_v25 = vshrl.u32 %v7807_v9, 16  ;;  %v7457_v32 = vcombine.low %v1714_v16, %v1717_v17 }
  0xd6   : > { %8577 = vmatprep.subr.bf16.mxu0 %v10017_v11  ;;  %v4458_v36 = vshll.u32 %v7812_v21, 16  ;;  %v7458_v37 = vcombine.low %v1721_v22, %v1724_v23  ;;  %v4464_v41 = vshll.u32 %v7813_v26, 16  ;;  %v4468_v42 = vshrl.u32 %v7813_v26, 16 }
  0xd7   : > { %8378 = vmatmul.mubr.msk.bf16.gmra.mrb[12].mxu1 %vm474_vm0, %v7451_v12  ;;  %8514 = vmatmul.mubr.msk.bf16.gmra.mrb[4].mxu0 %vm474_vm0, %v9167_v14  ;;  %v1727_v12 = vrot.slane %v10065_v61, 5  ;;  %v7809_v14 = vld [vmem:[%s9443_s20 + $0x24] sm:$0xf]  ;;  %v10106_v45 = vrot.slane %v4416_v24, 5  ;;  %v4422_v47 = vrot.slane %v4420_v25, 4  ;;  %v4426_v48 = vshll.u32 %v7808_v27, 16 }
  0xd8   : > { %8381 = vmatprep.mubr.msk.bf16.mxu1 %vm474_vm0, %v7452_v15  ;;  %8517 = vmatprep.mubr.msk.bf16.mxu0 %vm474_vm0, %v9168_v20  ;;  %v7810_v15 = vld [vmem:[%s9443_s20 + $0x28] sm:$0xf]  ;;  %v4410_v20 = vshll.u32 %v7806_v46, 16  ;;  %v4431_v28 = vshrl.u32 %v7809_v14, 16  ;;  %v4434_v29 = vshll.u32 %v7809_v14, 16  ;;  %v4460_v57 = vrot.slane %v4458_v36, 5 }
  0xd9   : > { %v4440_v30 = vshll.u32 %v7810_v15, 16  ;;  %v4444_v31 = vshrl.u32 %v7810_v15, 16  ;;  %v1729_v34 = vrot.slane %v1727_v12, 4  ;;  %v1728_v58 = vsel %vm9684_vm6, %v7439_v8, %v1727_v12  ;;  %v9176_v8 = vld [vmem:[%s9443_s20 + $0x3c] sm:$0xff]   ;;  %v7818_v15 = vld [vmem:[%s9443_s20 + $0x48] sm:$0xf] }
  0xda   : > { %v4412_v19 = vrot.slane %v4410_v20, 5  ;;  %v4433_v50 = vrot.slane %v4431_v28, 4  ;;  %v4436_v51 = vrot.slane %v4434_v29, 5  ;;  %v10117_v60 = vrot.slane %v4464_v41, 5  ;;  %v9177_v24 = vld [vmem:[%s9443_s20 + $0xa8] sm:$0xff]  }
  0xdb   : > { %v10109_v53 = vrot.slane %v4440_v30, 5  ;;  %v4446_v54 = vrot.slane %v4444_v31, 4  ;;  %v4470_v61 = vrot.slane %v4468_v42, 4  ;;  %v4423_v4 = vor.u32 %v4422_v47, %v10106_v45  ;;  %v6155_v42 = vld [vmem:[%s10904_s4 + $0x10] sm:$0xff] }
  0xdc   : > { %v10128_v5 = vrot.slane %v4426_v48, 5  ;;  %v4437_v6 = vor.u32 %v4436_v51, %v4433_v50  ;;  %v4474_v12 = vshll.u32 %v7814_v59, 16  ;;  %v4482_v14 = vshll.u32 %v7815_v62, 16  ;;  %v7820_v47 = vld [vmem:[%s9443_s20 + $0x50] sm:$0x1] }
  0xdd   : > { %v4447_v46 = vor.u32 %v4446_v54, %v10109_v53  ;;  %v4471_v17 = vor.u32 %v4470_v61, %v10117_v60  ;;  %v4424_v25 = vrot.slane %v4423_v4, 4  ;;  %v4503_v27 = vshrl.u32 %v7818_v15, 16  ;;  %v7821_v50 = vld [vmem:[%s9443_s20 + $0x54] sm:$0xf]  ;;  %v9181_v4 = vld [vmem:[%s9443_s20 + $0xc0] sm:$0xff]  }
  0xde   : > { %v4438_v26 = vrot.slane %v4437_v6, 4  ;;  %v4506_v28 = vshll.u32 %v7818_v15, 16 }
  0xdf   : > { %8382 = vmatmul.mubr.msk.bf16.gmra.mrb[16].mxu1 %vm474_vm0, %v7453_v35  ;;  %8518 = vmatmul.mubr.msk.bf16.gmra.mrb[8].mxu0 %vm474_vm0, %v9169_v39  ;;  %v4455_v35 = vshrl.u32 %v7812_v21, 16  ;;  %v10098_v39 = vld [vmem:[%s10904_s4] sm:$0xff]  ;;  %v4448_v29 = vrot.slane %v4447_v46, 4  ;;  %v4505_v48 = vrot.slane %v4503_v27, 4 }
  0xe0   : > { %8385 = vmatprep.mubr.msk.bf16.mxu1 %vm474_vm0, %v7454_v40  ;;  %8521 = vmatprep.mubr.msk.bf16.mxu0 %vm474_vm0, %v9170_v44  ;;  %v4409_v40 = vrot.slane %v4407_v18, 4  ;;  %v10104_v44 = vld [vmem:[%s10904_s4 + $0x8] sm:$0xff]  ;;  %v6161_v55 = vand.u32 4294901760, %v10098_v39 }
  0xe1   : > { %v4457_v56 = vrot.slane %v4455_v35, 4  ;;  %v6164_v0 = vand.u32 4294901760, %v10104_v44  ;;  %v7817_v35 = vld [vmem:[%s9443_s20 + $0x44] sm:$0x1] }
  0xe2   : > { %v4413_v1 = vor.u32 %v4412_v19, %v4409_v40  ;;  %v10141_v21 = vsub.f32 %v10098_v39, %v6161_v55  ;;  %v7819_v19 = vld [vmem:[%s9443_s20 + $0x4c] sm:$0xf] }
  0xe3   : > { %v4461_v9 = vor.u32 %v4460_v57, %v4457_v56  ;;  %v10150_v39 = vpack.c.bf16 %v6164_v0, %v6161_v55  ;;  %v10153_v40 = vsub.f32 %v10104_v44, %v6164_v0  ;;  %v4429_v44 = vsel %vm9475_vm3, %v4424_v25, %v10128_v5  ;;  %v9178_v57 = vld [vmem:[%s9443_s20 + $0x48] sm:$0xff]   ;;  %v9180_v0 = vld [vmem:[%s9443_s20 + $0x54] sm:$0xff]  }
  0xe4   : > { %v4414_v22 = vrot.slane %v4413_v1, 4  ;;  %v4498_v56 = vshll.u32 %v7817_v35, 16  ;;  %v4512_v59 = vshll.u32 %v7819_v19, 16  ;;  %v4516_v61 = vshrl.u32 %v7819_v19, 16  ;;  %v7830_v35 = vld [vmem:[%s9443_s20 + $0x78] sm:$0xf] }
  0xe5   : > { %v4462_v30 = vrot.slane %v4461_v9, 4  ;;  %v6167_v1 = vand.u32 4294901760, %v6155_v42  ;;  %v9194_v9 = vld [vmem:[%s10137_s19] sm:$0xff]  }
  0xe6   : > { %v4419_v41 = vsel %vm9475_vm3, %v4414_v22, %v10106_v45  ;;  %v4443_v45 = vsel %vm9475_vm3, %v4438_v26, %v10109_v53  ;;  %v4518_v22 = vrot.slane %v4516_v61, 4 }
  0xe7   : > { %8386 = vmatmul.mubr.msk.bf16.gmra.mrb[20].mxu1 %vm474_vm0, %v7455_v63  ;;  %8522 = vmatmul.mubr.msk.bf16.gmra.mrb[12].mxu0 %vm474_vm0, %v9171_v2  ;;  %v1731_v63 = vsel %vm9684_vm6, %v1729_v34, %v1730_v13  ;;  %v4450_v2 = vshll.u32 %v7811_v49, 16  ;;  %v4479_v13 = vshrl.u32 %v7815_v62, 16  ;;  %v4476_v34 = vrot.slane %v4474_v12, 5  ;;  %v7822_v62 = vld [vmem:[%s9443_s20 + $0x58] sm:$0xf] }
  0xe8   : > { %8389 = vmatprep.mubr.msk.bf16.mxu1 %vm474_vm0, %v7456_v3  ;;  %8525 = vmatprep.mubr.msk.bf16.mxu0 %vm474_vm0, %v9172_v7  ;;  %v7816_v3 = vld [vmem:[%s9443_s20 + $0x40] sm:$0xf]  ;;  %v7459_v16 = vcombine.low %v1728_v58, %v1731_v63  ;;  %v4508_v49 = vrot.slane %v4506_v28, 5  ;;  %v4467_v54 = vsel %vm9475_vm3, %v4462_v30, %v10117_v60  ;;  %v9179_v63 = vld [vmem:[%s9443_s20 + $0xb4] sm:$0xff]   ;;  %v10190_v5 = vcombine.low %v4419_v41, %v4429_v44  ;;  %v7828_v30 = vld [vmem:[%s9443_s20 + $0x70] sm:$0xf] }
  0xe9   : > { %v9175_v7 = vld [vmem:[%s9443_s20 + $0x9c] sm:$0xff]   ;;  %v4488_v18 = vshll.u32 %v7816_v3, 16  ;;  %v4492_v20 = vshrl.u32 %v7816_v3, 16  ;;  %v4452_v23 = vrot.slane %v4450_v2, 5  ;;  %v4481_v31 = vrot.slane %v4479_v13, 4  ;;  %v9183_v41 = vld [vmem:[%s9443_s20 + $0xcc] sm:$0xff]  }
  0xea   : > { %v4522_v2 = vshll.u32 %v7820_v47, 16  ;;  %v4527_v3 = vshrl.u32 %v7821_v50, 16  ;;  %v4509_v46 = vor.u32 %v4508_v49, %v4505_v48  ;;  %v4536_v15 = vshll.u32 %v7822_v62, 16  ;;  %v7831_v47 = vld [vmem:[%s9443_s20 + $0x7c] sm:$0xf] }
  0xeb   : > { %v10146_v36 = vrot.slane %v4488_v18, 5  ;;  %v4453_v51 = vsel %vm9475_vm3, %v4448_v29, %v4452_v23  ;;  %v4540_v23 = vshrl.u32 %v7822_v62, 16  ;;  %v10218_v26 = vsub.f32 %v6155_v42, %v6167_v1  ;;  %v7827_v29 = vld [vmem:[%s9443_s20 + $0x6c] sm:$0xf] }
  0xec   : > { %v10192_v6 = vcombine.low %v4443_v45, %v4453_v51  ;;  %v10220_v27 = vrot.slane %v4522_v2, 5  ;;  %v4529_v28 = vrot.slane %v4527_v3, 4  ;;  %v9186_v42 = vld [vmem:[%s9443_s20 + $0x6c] sm:$0xff]   ;;  %v10235_v19 = vrot.slane %v4536_v15, 5 }
  0xed   : > { %v4588_v61 = vshrl.u32 %v7828_v30, 16  ;;  %v4599_v2 = vshrl.u32 %v7830_v35, 16  ;;  %v4602_v3 = vshll.u32 %v7830_v35, 16 }
  0xef   : > { %8390 = vmatmul.mubr.msk.bf16.gmra.mrb[24].mxu1 %vm474_vm0, %v7457_v32  ;;  %8526 = vmatmul.mubr.msk.bf16.gmra.mrb[16].mxu0 %vm474_vm0, %v9173_v33  ;;  %v4484_v32 = vrot.slane %v4482_v14, 5  ;;  %v4472_v33 = vrot.slane %v4471_v17, 4  ;;  %v10202_v14 = vrot.slane %v4498_v56, 5  ;;  %v9195_v17 = vld [vmem:[%s10137_s19 + $0x8] sm:$0xff]   ;;  %v4601_v35 = vrot.slane %v4599_v2, 4 }
  0xf0   : > { %8393 = vmatprep.mubr.msk.bf16.mxu1 %vm474_vm0, %v7458_v37  ;;  %8529 = vmatprep.mubr.msk.bf16.mxu0 %vm474_vm0, %v9174_v43  ;;  %v4494_v37 = vrot.slane %v4492_v20, 4  ;;  %v10164_v43 = vld [vmem:[%s10904_s4 + $0x18] sm:$0xff]  ;;  %v10209_v20 = vrot.slane %v4512_v59, 5  ;;  %v6143_v48 = vsel %vm474_vm0, %v9195_v17, 0.0  ;;  %v4584_v59 = vshll.u32 %v7828_v30, 16 }
  0xf1   : > { %v4485_v55 = vor.u32 %v4484_v32, %v4481_v31  ;;  %v4477_v53 = vsel %vm9475_vm3, %v4472_v33, %v4476_v34  ;;  %v6170_v60 = vand.u32 4294901760, %v10164_v43  ;;  %v9182_v31 = vld [vmem:[%s9443_s20 + $0x60] sm:$0xff]   ;;  %v10227_v32 = vrot.slane %v4509_v46, 4  ;;  %v7826_v17 = vld [vmem:[%s9443_s20 + $0x68] sm:$0x1] }
  0xf2   : > { %v4495_v58 = vor.u32 %v4494_v37, %v10146_v36  ;;  %v10198_v12 = vcombine.low %v4467_v54, %v4477_v53  ;;  %v6142_v37 = vsel %vm474_vm0, %v9194_v9, 0.0  ;;  %v4519_v56 = vor.u32 %v4518_v22, %v10209_v20 }
  0xf3   : > { %v10200_v13 = vrot.slane %v4485_v55, 4  ;;  %v10216_v25 = vpack.c.bf16 %v6170_v60, %v6167_v1  ;;  %v6144_v54 = vadd.f32 %v6143_v48, %v6142_v37  ;;  %v4575_v53 = vshrl.u32 %v7827_v29, 16  ;;  %v9187_v37 = vld [vmem:[%s9443_s20 + $0x78] sm:$0xff]  }
  0xf4   : > { %v10207_v18 = vrot.slane %v4495_v58, 4  ;;  %v4578_v58 = vshll.u32 %v7827_v29, 16  ;;  %v4612_v46 = vshrl.u32 %v7831_v47, 16  ;;  %v4520_v29 = vrot.slane %v4519_v56, 4  ;;  %v7832_v56 = vld [vmem:[%s9443_s20 + $0x80] sm:$0x1] }
  0xf5   : > { %v4491_v49 = vsel %vm9475_vm3, %v10200_v13, %v10146_v36  ;;  %v6145_v62 = vrot.slane %v6144_v54, 4 }
  0xf6   : > { %v4501_v55 = vsel %vm9475_vm3, %v10207_v18, %v10202_v14  ;;  %v4580_v22 = vrot.slane %v4578_v58, 5 }
  0xf7   : > { %8394 = vmatmul.mubr.msk.bf16.gmra.mrb[28].mxu1 %vm474_vm0, %v7459_v16  ;;  %8530 = vmatmul.mubr.msk.bf16.gmra.mrb[20].mxu0 %vm474_vm0, %v9175_v7  ;;  %v10195_v7 = vld [vmem:[%s9443_s20 + $0x5c] sm:$0x1]  ;;  %v7824_v16 = vld [vmem:[%s9443_s20 + $0x60] sm:$0xf] }
  0xf8   : > { %8409 = vmatprep.mubr.msk.bf16.mxu1 %vm474_vm0, %v9176_v8  ;;  %8533 = vmatprep.mubr.msk.bf16.mxu0 %vm474_vm0, %v9177_v24  ;;  %v4530_v8 = vshll.u32 %v7821_v50, 16  ;;  %v7825_v24 = vld [vmem:[%s9443_s20 + $0x64] sm:$0xf]  ;;  %v4546_v34 = vshll.u32 %v10195_v7, 16  ;;  %v4551_v44 = vshrl.u32 %v7824_v16, 16  ;;  %v4554_v45 = vshll.u32 %v7824_v16, 16 }
  0xf9   : > { %v4542_v50 = vrot.slane %v4540_v23, 4  ;;  %v4560_v51 = vshll.u32 %v7825_v24, 16  ;;  %v6146_v7 = vadd.f32 %v6145_v62, %v6144_v54  ;;  %v4577_v16 = vrot.slane %v4575_v53, 4 }
  0xfa   : > { %v4532_v33 = vrot.slane %v4530_v8, 5  ;;  %v4556_v1 = vrot.slane %v4554_v45, 5  ;;  %v10259_v23 = vrot.slane %v4584_v59, 5  ;;  %v7833_v45 = vld [vmem:[%s9443_s20 + $0x84] sm:$0xf]  ;;  %v4570_v54 = vshll.u32 %v7826_v17, 16 }
  0xfb   : > { %v4543_v8 = vor.u32 %v4542_v50, %v10235_v19  ;;  %v10254_v9 = vrot.slane %v4560_v51, 5  ;;  %v4515_v59 = vsel %vm9475_vm3, %v10227_v32, %v10209_v20  ;;  %v4623_v62 = vshrl.u32 %v7833_v45, 16 }
  0xfc   : > { %v4618_v32 = vshll.u32 %v7832_v56, 16 }
  0xfd   : > { %v4544_v48 = vrot.slane %v4543_v8, 4  ;;  %v4625_v17 = vrot.slane %v4623_v62, 4  ;;  %v6256_v62 = vand.u32 4294901760, %v10218_v26 }
  0xff   : > { %8410 = vmatmul.mubr.msk.bf16.vlgmr.msra.gmra.mrb[8].mxu1 %vm474_vm0, %v9178_v57  ;;  %8534 = vmatmul.mubr.msk.bf16.gmra.mrb[24].mxu0 %vm474_vm0, %v9179_v63  ;;  %v4564_v57 = vshrl.u32 %v7825_v24, 16  ;;  %v4533_v63 = vor.u32 %v4532_v33, %v4529_v28  ;;  %v4590_v24 = vrot.slane %v4588_v61, 4  ;;  %v6147_v28 = vrot.slane %v6146_v7, 2  ;;  %v7829_v33 = vld [vmem:[%s9443_s20 + $0x74] sm:$0x1] }
 0x100   : > { %8747 = vmatpush3.bf16.msra.mxu1 %v10150_v39  ;;  %8413 = vmatprep.mubr.msk.bf16.mxu1 %vm474_vm0, %v9180_v0  ;;  %v4553_v0 = vrot.slane %v4551_v44, 4  ;;  %v4614_v44 = vrot.slane %v4612_v46, 4  ;;  %v4594_v53 = vshll.u32 %v7829_v33, 16  ;;  %v4525_v61 = vsel %vm9475_vm3, %v4520_v29, %v10220_v27  ;;  %v9189_v29 = vld [vmem:[%s9443_s20 + $0x90] sm:$0xff]  }
 0x101   : > { %8537 = vmatprep.mubr.msk.bf16.mxu0 %vm474_vm0, %v9181_v4  ;;  %8748 = vmatprep.subr.bf16.mxu1 %v9357_v52  ;;  %v4608_v4 = vshll.u32 %v7831_v47, 16  ;;  %v4566_v15 = vrot.slane %v4564_v57, 4  ;;  %v4534_v30 = vrot.slane %v4533_v63, 4  ;;  %v9188_v47 = vld [vmem:[%s9443_s20 + $0x84] sm:$0xff]   ;;  %v4581_v57 = vor.u32 %v4580_v22, %v4577_v16 }
 0x102   : > { %v4557_v50 = vor.u32 %v4556_v1, %v4553_v0  ;;  %v4626_v63 = vshll.u32 %v7833_v45, 16  ;;  %v9197_v0 = vld [vmem:[%s10901_s1 + $0x88] sm:$0xff]   ;;  %v4572_v46 = vrot.slane %v4570_v54, 5  ;;  %v4596_v16 = vrot.slane %v4594_v53, 5  ;;  %v7836_v45 = vld [vmem:[%s9443_s20 + $0x90] sm:$0xf] }
 0x103   : > { %v4567_v51 = vor.u32 %v4566_v15, %v10254_v9  ;;  %v4539_v1 = vsel %vm9475_vm3, %v4534_v30, %v10235_v19  ;;  %v4582_v8 = vrot.slane %v4581_v57, 4  ;;  %v4620_v33 = vrot.slane %v4618_v32, 5  ;;  %v7839_v53 = vld [vmem:[%s9443_s20 + $0x9c] sm:$0xf] }
 0x104   : > { %8750 = vmatpush3.bf16.msra.mxu1 %v10216_v25  ;;  %v4558_v27 = vrot.slane %v4557_v50, 4  ;;  %v4628_v22 = vrot.slane %v4626_v63, 5  ;;  %v4650_v54 = vshll.u32 %v7836_v45, 16  ;;  %v7840_v63 = vld [vmem:[%s9443_s20 + $0xa0] sm:$0xf] }
 0x105   : > { %8751 = vmatprep.subr.bf16.mxu1 %v9357_v52  ;;  %v4587_v14 = vsel %vm9475_vm3, %v4582_v8, %v10259_v23  ;;  %v7842_v8 = vld [vmem:[%s9443_s20 + $0xa8] sm:$0xf] }
 0x106   : > { %v4629_v13 = vor.u32 %v4628_v22, %v4625_v17  ;;  %v4684_v17 = vshrl.u32 %v7840_v63, 16  ;;  %v7843_v22 = vld [vmem:[%s9443_s20 + $0xac] sm:$0xf] }
 0x107   : > { %8414 = vmatmul.mubr.msk.bf16.gmra.mrb[12].mxu1 %vm474_vm0, %v9182_v31  ;;  %8538 = vmatmul.mubr.msk.bf16.gmra.mrb[28].mxu0 %vm474_vm0, %v9183_v41  ;;  %v4548_v31 = vrot.slane %v4546_v34, 5  ;;  %v4604_v41 = vrot.slane %v4602_v3, 5  ;;  %v4591_v34 = vor.u32 %v4590_v24, %v10259_v23  ;;  %v7834_v3 = vld [vmem:[%s9443_s20 + $0x88] sm:$0xf] }
 0x108   : > { %8417 = vmatprep.mubr.msk.bf16.mxu1 %vm474_vm0, %v9186_v42  ;;  %8545 = vmatprep.mubr.msk.bf16.mxu0 %vm474_vm0, %v10190_v5  ;;  %v10263_v42 = vrot.slane %v4608_v4, 5  ;;  %v6148_v5 = vadd.f32 %v6147_v28, %v6146_v7  ;;  %v4568_v4 = vrot.slane %v4567_v51, 4  ;;  %v4632_v24 = vshll.u32 %v7834_v3, 16 }
 0x109   : > { %v4605_v2 = vor.u32 %v4604_v41, %v4601_v35  ;;  %v4549_v19 = vsel %vm9475_vm3, %v4544_v48, %v4548_v31  ;;  %v4592_v15 = vrot.slane %v4591_v34, 4  ;;  %v4636_v28 = vshrl.u32 %v7834_v3, 16  ;;  %v9190_v35 = vld [vmem:[%s9443_s20 + $0x9c] sm:$0xff]  }
 0x10a   : > { %v6149_v58 = vrot.slane %v6148_v5, 1  ;;  %v4615_v20 = vor.u32 %v4614_v44, %v10263_v42  ;;  %v7862_v41 = vcombine.low %v4515_v59, %v4525_v61  ;;  %v7863_v44 = vcombine.low %v4539_v1, %v4549_v19  ;;  %v9192_v1 = vld [vmem:[%s9443_s20 + $0xb4] sm:$0xff]  }
 0x10b   : > { %v4606_v30 = vrot.slane %v4605_v2, 4  ;;  %v4597_v36 = vsel %vm9475_vm3, %v4592_v15, %v4596_v16  ;;  %v6242_v48 = vand.u32 4294901760, %v10141_v21  ;;  %v4647_v51 = vshrl.u32 %v7836_v45, 16 }
 0x10c   : > { %v6150_v7 = vadd.f32 %v6149_v58, %v6148_v5  ;;  %v4616_v31 = vrot.slane %v4615_v20, 4  ;;  %v7837_v5 = vld [vmem:[%s9443_s20 + $0x94] sm:$0xf]  ;;  %v10342_v58 = vrot.slane %v4629_v13, 4  ;;  %v6249_v61 = vand.u32 4294901760, %v10153_v40 }
 0x10d   : > { %v4656_v56 = vshll.u32 %v7837_v5, 16  ;;  %v4660_v34 = vshrl.u32 %v7837_v5, 16  ;;  %v6243_v32 = vsub.f32 %v10141_v21, %v6242_v48  ;;  %v4671_v19 = vshrl.u32 %v7839_v53, 16 }
 0x10e   : > { %v4621_v23 = vsel %vm9475_vm3, %v4616_v31, %v4620_v33  ;;  %v4674_v16 = vshll.u32 %v7839_v53, 16 }
 0x10f   : > { %8418 = vmatmul.mubr.msk.bf16.gmra.mrb[16].mxu1 %vm474_vm0, %v9187_v37  ;;  %8546 = vmatmul.mubr.msk.bf16.vlgmr.msra.gmra.mrb[0].mxu0 %vm474_vm0, %v10192_v6  ;;  %v7835_v6 = vld [vmem:[%s9443_s20 + $0x8c] sm:$0x1]  ;;  %v6151_v37 = vmul.f32 0.0625, %v6150_v7  ;;  %v10359_v7 = vrot.slane %v4656_v56, 5  ;;  %v4662_v15 = vrot.slane %v4660_v34, 4  ;;  %v6244_v13 = vand.u32 4294901760, %v6243_v32 }
 0x110   : > { %8421 = vmatprep.mubr.msk.bf16.mxu1 %vm474_vm0, %v9188_v47  ;;  %8549 = vmatprep.mubr.msk.bf16.mxu0 %vm474_vm0, %v10198_v12  ;;  %v10299_v12 = vsub.f32 %v10164_v43, %v6170_v60  ;;  %v4563_v43 = vsel %vm9475_vm3, %v4558_v27, %v10254_v9  ;;  %v4573_v60 = vsel %vm9475_vm3, %v4568_v4, %v4572_v46  ;;  %v4642_v18 = vshll.u32 %v7835_v6, 16  ;;  %v7838_v27 = vld [vmem:[%s9443_s20 + $0x98] sm:$0x1] }
 0x111   : > { %8578 = vmatpush3.bf16.msra.mxu0 %v10017_v11  ;;  %v7861_v11 = vcombine.low %v4491_v49, %v4501_v55  ;;  %v10324_v49 = vrot.slane %v4632_v24, 5  ;;  %v4638_v55 = vrot.slane %v4636_v28, 4  ;;  %v7864_v9 = vcombine.low %v4563_v43, %v4573_v60 }
 0x112   : > { %8579 = vmatprep.subr.bf16.mxu0 %v9197_v0  ;;  %v4611_v47 = vsel %vm9475_vm3, %v4606_v30, %v10263_v42  ;;  %v6158_v50 = vsel %vm474_vm0, %v6151_v37, 0  ;;  %v10337_v42 = vcombine.low %v4587_v14, %v4597_v36  ;;  %v10339_v57 = vrot.slane %v4642_v18, 5 }
 0x113   : > { %v4639_v59 = vor.u32 %v4638_v55, %v10324_v49  ;;  %v10350_v2 = vcombine.low %v4611_v47, %v4621_v23  ;;  %v10352_v20 = vand.u32 4294901760, %v6158_v50  ;;  %v6263_v3 = vand.u32 4294901760, %v10299_v12  ;;  %v9193_v47 = vld [vmem:[%s9443_s20 + $0xc0] sm:$0xff]  }
 0x114   : > { %v4649_v4 = vrot.slane %v4647_v51, 4  ;;  %v4652_v46 = vrot.slane %v4650_v54, 5  ;;  %v4680_v6 = vshll.u32 %v7840_v63, 16  ;;  %v4635_v24 = vsel %vm9475_vm3, %v10342_v58, %v10324_v49 }
 0x115   : > { %8580 = vmatpush3.bf16.msra.mxu0 %v9197_v0  ;;  %v9191_v0 = vld [vmem:[%s9443_s20 + $0xa8] sm:$0xff]   ;;  %v4640_v28 = vrot.slane %v4639_v59, 4  ;;  %v10373_v30 = vsub.f32 %v10218_v26, %v6256_v62  ;;  %v10377_v31 = vsub.f32 %v6158_v50, %v10352_v20  ;;  %v4666_v33 = vshll.u32 %v7838_v27, 16  ;;  %v7844_v50 = vld [vmem:[%s9443_s20 + $0xb0] sm:$0x1] }
 0x116   : > { %v4698_v43 = vshll.u32 %v7842_v8, 16  ;;  %v4653_v60 = vor.u32 %v4652_v46, %v4649_v4  ;;  %v4673_v37 = vrot.slane %v4671_v19, 4  ;;  %v4708_v14 = vshrl.u32 %v7843_v22, 16  ;;  %v7845_v59 = vld [vmem:[%s9443_s20 + $0xb4] sm:$0xf] }
 0x117   : > { %8422 = vmatmul.mubr.msk.bf16.gmra.mrb[20].mxu1 %vm474_vm0, %v9189_v29  ;;  %8550 = vmatmul.mubr.msk.bf16.gmra.mrb[4].mxu0 %vm474_vm0, %v7861_v11  ;;  %v6250_v29 = vsub.f32 %v10153_v40, %v6249_v61  ;;  %v7841_v11 = vld [vmem:[%s9443_s20 + $0xa4] sm:$0x1]  ;;  %v4663_v18 = vor.u32 %v4662_v15, %v10359_v7  ;;  %v4676_v45 = vrot.slane %v4674_v16, 5  ;;  %v10384_v5 = vrot.slane %v4680_v6, 5 }
 0x118   : > { %8425 = vmatprep.mubr.msk.bf16.mxu1 %vm474_vm0, %v9190_v35  ;;  %8553 = vmatprep.mubr.msk.bf16.mxu0 %vm474_vm0, %v7862_v41  ;;  %v4695_v35 = vshrl.u32 %v7842_v8, 16  ;;  %v4704_v41 = vshll.u32 %v7843_v22, 16  ;;  %v4686_v36 = vrot.slane %v4684_v17, 4  ;;  %v4690_v55 = vshll.u32 %v7841_v11, 16  ;;  %v7848_v17 = vld [vmem:[%s9443_s20 + $0xc0] sm:$0xf] }
 0x119   : > { %v6251_v49 = vand.u32 4294901760, %v6250_v29  ;;  %v6231_v23 = vand.u32 4294901760, %v10377_v31  ;;  %v4700_v54 = vrot.slane %v4698_v43, 5  ;;  %v6258_v56 = vand.u32 4294901760, %v10373_v30  ;;  %v7849_v22 = vld [vmem:[%s9443_s20 + $0xc4] sm:$0xf] }
 0x11a   : > { %v4697_v51 = vrot.slane %v4695_v35, 4  ;;  %v4668_v34 = vrot.slane %v4666_v33, 5  ;;  %v10398_v53 = vrot.slane %v4704_v41, 5  ;;  %v4710_v58 = vrot.slane %v4708_v14, 4 }
 0x11b   : > { %v4654_v63 = vrot.slane %v4653_v60, 4  ;;  %v4687_v32 = vor.u32 %v4686_v36, %v10384_v5  ;;  %v8752_v4 = vpack.c.bf16 %v6251_v49, %v6244_v13  ;;  %v10404_v19 = vrot.slane %v4690_v55, 5 }
 0x11c   : > { %v6232_v8 = vsub.f32 %v10377_v31, %v6231_v23  ;;  %v4701_v15 = vor.u32 %v4700_v54, %v4697_v51  ;;  %v4714_v16 = vshll.u32 %v7844_v50, 16  ;;  %v4719_v6 = vshrl.u32 %v7845_v59, 16 }
 0x11d   : > { %v4722_v29 = vshll.u32 %v7845_v59, 16  ;;  %v4659_v11 = vsel %vm9475_vm3, %v4654_v63, %v10359_v7  ;;  %v4688_v43 = vrot.slane %v4687_v32, 4  ;;  %v4743_v60 = vshrl.u32 %v7848_v17, 16  ;;  %v7850_v32 = vld [vmem:[%s9443_s20 + $0xc8] sm:$0x1] }
 0x11e   : > { %v4752_v41 = vshll.u32 %v7849_v22, 16  ;;  %v4756_v14 = vshrl.u32 %v7849_v22, 16  ;;  %v4716_v36 = vrot.slane %v4714_v16, 5 }
 0x11f   : > { %8426 = vmatmul.mubr.msk.bf16.gmra.mrb[24].mxu1 %vm474_vm0, %v9191_v0  ;;  %8554 = vmatmul.mubr.msk.bf16.gmra.mrb[8].mxu0 %vm474_vm0, %v7863_v44  ;;  %v10389_v44 = vsub.f32 %v10299_v12, %v6263_v3  ;;  %v4664_v0 = vrot.slane %v4663_v18, 4  ;;  %v6233_v18 = vand.u32 4294901760, %v6232_v8  ;;  %v4724_v49 = vrot.slane %v4722_v29, 5 }
 0x120   : > { %8429 = vmatprep.mubr.msk.bf16.mxu1 %vm474_vm0, %v9192_v1  ;;  %8557 = vmatprep.mubr.msk.bf16.mxu0 %vm474_vm0, %v7864_v9  ;;  %v4645_v9 = vsel %vm9475_vm3, %v4640_v28, %v10339_v57  ;;  %v4677_v1 = vor.u32 %v4676_v45, %v4673_v37  ;;  %v7846_v57 = vld [vmem:[%s9443_s20 + $0xb8] sm:$0xf]  ;;  %v4711_v28 = vor.u32 %v4710_v58, %v10398_v53  ;;  %v4746_v37 = vshll.u32 %v7848_v17, 16  ;;  %v7852_v58 = vld [vmem:[%s9443_s20 + $0xd0] sm:$0xf] }
 0x121   : > { %v7867_v27 = vcombine.low %v4635_v24, %v4645_v9  ;;  %v6265_v46 = vand.u32 4294901760, %v10389_v44  ;;  %v9359_v24 = vmov 0.0   ;;  %v4728_v30 = vshll.u32 %v7846_v57, 16  ;;  %v7851_v9 = vld [vmem:[%s9443_s20 + $0xcc] sm:$0xf] }
 0x122   : > { %v4732_v33 = vshrl.u32 %v7846_v57, 16  ;;  %v4678_v35 = vrot.slane %v4677_v1, 4  ;;  %v4702_v45 = vrot.slane %v4701_v15, 4  ;;  %v4712_v13 = vrot.slane %v4711_v28, 4 }
 0x123   : > { %v10424_v7 = vrot.slane %v4728_v30, 5  ;;  %v4745_v50 = vrot.slane %v4743_v60, 4  ;;  %v4748_v51 = vrot.slane %v4746_v37, 5  ;;  %v10428_v54 = vrot.slane %v4752_v41, 5  ;;  %v7853_v41 = vld [vmem:[%s9443_s20 + $0xd4] sm:$0x1] }
 0x124   : > { %v4734_v44 = vrot.slane %v4732_v33, 4  ;;  %v8755_v59 = vpack.c.bf16 %v6265_v46, %v6258_v56  ;;  %v4683_v63 = vsel %vm9475_vm3, %v4678_v35, %v10384_v5  ;;  %v4707_v1 = vsel %vm9475_vm3, %v4702_v45, %v10398_v53 }
 0x125   : > { %v4717_v57 = vsel %vm9475_vm3, %v4712_v13, %v4716_v36  ;;  %v4767_v5 = vshrl.u32 %v7851_v9, 16  ;;  %v4776_v15 = vshll.u32 %v7852_v58, 16  ;;  %v4780_v16 = vshrl.u32 %v7852_v58, 16 }
 0x126   : > { %v4735_v46 = vor.u32 %v4734_v44, %v10424_v7  ;;  %v4749_v53 = vor.u32 %v4748_v51, %v4745_v50  ;;  %v8758_v17 = vpack.c.bf16 %v10153_v40, %v10141_v21  ;;  %v7870_v22 = vcombine.low %v4707_v1, %v4717_v57  ;;  %v7896_v1 = vld [vmem:[%s9443_s20 + $0x28] sm:$0xf]  ;;  %v7905_v21 = vld [vmem:[%s9443_s20 + $0x4c] sm:$0xf] }
 0x127   : > { %8430 = vmatmul.mubr.msk.bf16.gmra.mrb[28].mxu1 %vm474_vm0, %v9193_v47  ;;  %8558 = vmatmul.mubr.msk.bf16.gmra.mrb[12].mxu0 %vm474_vm0, %v10337_v42  ;;  %v4669_v42 = vsel %vm9475_vm3, %v4664_v0, %v4668_v34  ;;  %v7847_v47 = vld [vmem:[%s9443_s20 + $0xbc] sm:$0x1]  ;;  %v4758_v34 = vrot.slane %v4756_v14, 4  ;;  %v4693_v0 = vsel %vm9475_vm3, %v4688_v43, %v10404_v19  ;;  %v4770_v19 = vshll.u32 %v7851_v9, 16  ;;  %v7894_v9 = vld [vmem:[%s9443_s20 + $0x20] sm:$0x1] }
 0x128   : > { %8621 = vmatprep.mubr.msk.f32.mxu1 %vm9358_vm7, %v9359_v24  ;;  %8561 = vmatprep.mubr.msk.bf16.mxu0 %vm474_vm0, %v10350_v2  ;;  %v4721_v2 = vrot.slane %v4719_v6, 4  ;;  %v7868_v55 = vcombine.low %v4659_v11, %v4669_v42  ;;  %v4738_v8 = vshll.u32 %v7847_v47, 16  ;;  %v7869_v6 = vcombine.low %v4683_v63, %v4693_v0  ;;  %v7893_v14 = vld [vmem:[%s9443_s20 + $0x1c] sm:$0xf]  ;;  %v7892_v47 = vld [vmem:[%s9443_s20 + $0x18] sm:$0xe] }
 0x129   : > { %v4736_v29 = vrot.slane %v4735_v46, 4  ;;  %v4769_v33 = vrot.slane %v4767_v5, 4  ;;  %v4772_v11 = vrot.slane %v4770_v19, 5  ;;  %v4778_v42 = vrot.slane %v4776_v15, 5  ;;  %v7895_v19 = vld [vmem:[%s9443_s20 + $0x24] sm:$0xe] }
 0x12a   : > { %v4725_v56 = vor.u32 %v4724_v49, %v4721_v2  ;;  %v4740_v30 = vrot.slane %v4738_v8, 5  ;;  %v4782_v35 = vrot.slane %v4780_v16, 4  ;;  %v4750_v43 = vrot.slane %v4749_v53, 4  ;;  %v7897_v15 = vld [vmem:[%s9443_s20 + $0x2c] sm:$0x1] }
 0x12b   : > { %v4773_v2 = vor.u32 %v4772_v11, %v4769_v33  ;;  %v4786_v49 = vshll.u32 %v7853_v41, 16  ;;  %v7940_v63 = vrot.slane %v7892_v47, 9  ;;  %v5265_v46 = vrot.slane %v7896_v1, 5  ;;  %v7898_v53 = vld [vmem:[%s9443_s20 + $0x30] sm:$0xe] }
 0x12c   : > { %v4726_v28 = vrot.slane %v4725_v56, 4  ;;  %v4741_v36 = vsel %vm9475_vm3, %v4736_v29, %v4740_v30  ;;  %v4783_v13 = vor.u32 %v4782_v35, %v4778_v42  ;;  %v4755_v44 = vsel %vm9475_vm3, %v4750_v43, %v10428_v54  ;;  %v7902_v11 = vld [vmem:[%s9443_s20 + $0x40] sm:$0xf]  ;;  %v7906_v35 = vld [vmem:[%s9443_s20 + $0x50] sm:$0x1] }
 0x12d   : > { %v7942_v29 = vrot.slane %v7898_v53, 9  ;;  %v8773_v40 = vpack.c.bf16 %v6263_v3, %v6256_v62  ;;  %v7901_v62 = vld [vmem:[%s9443_s20 + $0x3c] sm:$0xe]  ;;  %v7903_v3 = vld [vmem:[%s9443_s20 + $0x44] sm:$0x1] }
 0x12e   : > { %v4731_v45 = vsel %vm9475_vm3, %v4726_v28, %v10424_v7  ;;  %v4784_v58 = vrot.slane %v4783_v13, 4  ;;  %v5268_v28 = vrot.slane %v7897_v15, 5  ;;  %v7911_v13 = vld [vmem:[%s9443_s20 + $0x64] sm:$0xf]  ;;  %v7907_v47 = vld [vmem:[%s9443_s20 + $0x54] sm:$0xe] }
 0x12f   : > { %8622 = vmatmul.mubr.f32.vlgmr.msra.gmra.mrb[32].mxu1 %v6233_v18  ;;  %8562 = vmatmul.mubr.msk.bf16.gmra.mrb[16].mxu0 %vm474_vm0, %v7867_v27  ;;  %v4759_v27 = vor.u32 %v4758_v34, %v10428_v54  ;;  %v8761_v18 = vpack.c.bf16 %v10299_v12, %v10218_v26  ;;  %v7871_v50 = vcombine.low %v4731_v45, %v4741_v36  ;;  %v4774_v34 = vrot.slane %v4773_v2, 4  ;;  %v7908_v2 = vld [vmem:[%s9443_s20 + $0x58] sm:$0xf]  ;;  %v7913_v15 = vld [vmem:[%s9443_s20 + $0x6c] sm:$0xe] }
 0x130   : > { %8753 = vmatpush3.bf16.msra.mxu1 %v8752_v4  ;;  %8565 = vmatprep.mubr.msk.bf16.mxu0 %vm474_vm0, %v7868_v55  ;;  %v4762_v4 = vshll.u32 %v7850_v32, 16  ;;  %v5258_v55 = vrot.slane %v7893_v14, 5  ;;  %v5261_v54 = vrot.slane %v7894_v9, 5  ;;  %v7899_v32 = vld [vmem:[%s9443_s20 + $0x34] sm:$0xf]  ;;  %v5282_v14 = vrot.slane %v7903_v3, 5 }
 0x131   : > { %8754 = vmatprep.subr.bf16.mxu1 %v9357_v52  ;;  %8632 = vmatprep.mubr.msk.f32.mxu1 %vm9358_vm7, %v9359_v24  ;;  %v4760_v60 = vrot.slane %v4759_v27, 4  ;;  %v4779_v57 = vsel %vm9475_vm3, %v4774_v34, %v4778_v42  ;;  %v5272_v16 = vrot.slane %v7899_v32, 5  ;;  %v7900_v27 = vld [vmem:[%s9443_s20 + $0x38] sm:$0x1]  ;;  %v7904_v42 = vld [vmem:[%s9443_s20 + $0x48] sm:$0xe] }
 0x132   : > { %v4764_v37 = vrot.slane %v4762_v4, 5  ;;  %v5260_v0 = vrot.slane %v5258_v55, 4  ;;  %v5259_v8 = vsel %vm9684_vm6, %v7940_v63, %v5258_v55  ;;  %v8770_v4 = vpack.c.bf16 %v6249_v61, %v6242_v48  ;;  %v7909_v9 = vld [vmem:[%s9443_s20 + $0x5c] sm:$0x1]  ;;  %v7912_v34 = vld [vmem:[%s9443_s20 + $0x68] sm:$0x1] }
 0x133   : > { %v5274_v30 = vrot.slane %v5272_v16, 4  ;;  %v5275_v33 = vrot.slane %v7900_v27, 5  ;;  %v5273_v26 = vsel %vm9684_vm6, %v7942_v29, %v5272_v16  ;;  %v5289_v36 = vrot.slane %v7906_v35, 5  ;;  %v7915_v16 = vld [vmem:[%s9443_s20 + $0x74] sm:$0x1] }
 0x134   : > { %8756 = vmatpush3.bf16.msra.mxu1 %v8755_v59  ;;  %v4765_v7 = vsel %vm9475_vm3, %v4760_v60, %v4764_v37  ;;  %v4788_v59 = vrot.slane %v4786_v49, 5  ;;  %v5262_v5 = vsel %vm9684_vm6, %v5260_v0, %v5261_v54  ;;  %v7943_v37 = vrot.slane %v7901_v62, 9  ;;  %v7916_v27 = vld [vmem:[%s9443_s20 + $0x78] sm:$0xe]  ;;  %v7921_v62 = vld [vmem:[%s9443_s20 + $0x8c] sm:$0x1] }
 0x135   : > { %8757 = vmatprep.subr.bf16.mxu1 %v9357_v52  ;;  %v7872_v51 = vcombine.low %v4755_v44, %v4765_v7  ;;  %v5276_v12 = vsel %vm9684_vm6, %v5274_v30, %v5275_v33  ;;  %v5293_v7 = vrot.slane %v7908_v2, 5  ;;  %v7945_v63 = vrot.slane %v7907_v47, 9  ;;  %v7929_v2 = vld [vmem:[%s9443_s20 + $0xac] sm:$0xf]  ;;  %v7927_v47 = vld [vmem:[%s9443_s20 + $0xa4] sm:$0x1] }
 0x136   : > { %v4789_v56 = vsel %vm9475_vm3, %v4784_v58, %v4788_v59  ;;  %v7962_v60 = vcombine.low %v5273_v26, %v5276_v12  ;;  %v5296_v54 = vrot.slane %v7909_v9, 5  ;;  %v7948_v29 = vrot.slane %v7916_v27, 9  ;;  %v7919_v12 = vld [vmem:[%s9443_s20 + $0x84] sm:$0xe]  ;;  %v7936_v27 = vld [vmem:[%s9443_s20 + $0xc8] sm:$0x1] }
 0x137   : > { %8633 = vmatmul.mubr.f32.vlgmr.msra.gmra.mrb[32].mxu1 %v10352_v20  ;;  %8566 = vmatmul.mubr.msk.bf16.gmra.mrb[20].mxu0 %vm474_vm0, %v7869_v6  ;;  %v7873_v38 = vcombine.low %v4779_v57, %v4789_v56  ;;  %v7960_v6 = vcombine.low %v5259_v8, %v5262_v5  ;;  %v5295_v0 = vrot.slane %v5293_v7, 4  ;;  %v5303_v57 = vrot.slane %v7912_v34, 5  ;;  %v7914_v56 = vld [vmem:[%s9443_s20 + $0x70] sm:$0xf] }
 0x138   : > { %8759 = vmatpush3.bf16.msra.mxu1 %v8758_v17  ;;  %8569 = vmatprep.mubr.msk.bf16.mxu0 %vm474_vm0, %v7870_v22  ;;  %v7941_v17 = vrot.slane %v7895_v19, 9  ;;  %v5267_v22 = vrot.slane %v5265_v46, 4  ;;  %v5307_v5 = vrot.slane %v7914_v56, 5  ;;  %v5342_v9 = vrot.slane %v7929_v2, 5  ;;  %v7935_v56 = vld [vmem:[%s9443_s20 + $0xc4] sm:$0xf] }
 0x139   : > { %8760 = vmatprep.subr.bf16.mxu1 %v9357_v52  ;;  %8643 = vmatprep.mubr.msk.f32.mxu1 %vm9358_vm7, %v9359_v24  ;;  %v5297_v8 = vsel %vm9684_vm6, %v5295_v0, %v5296_v54  ;;  %v5338_v0 = vrot.slane %v7927_v47, 5 }
 0x13a   : > { %v5266_v48 = vsel %vm9684_vm6, %v7941_v17, %v5265_v46  ;;  %v5269_v61 = vsel %vm9684_vm6, %v5267_v22, %v5268_v28  ;;  %v7917_v46 = vld [vmem:[%s9443_s20 + $0x7c] sm:$0xf]  ;;  %v7947_v17 = vrot.slane %v7913_v15, 9  ;;  %v5309_v22 = vrot.slane %v5307_v5, 4 }
 0x13b   : > { %v7961_v43 = vcombine.low %v5266_v48, %v5269_v61  ;;  %v5314_v53 = vrot.slane %v7917_v46, 5  ;;  %v5310_v28 = vrot.slane %v7915_v16, 5  ;;  %v7933_v15 = vld [vmem:[%s9443_s20 + $0xbc] sm:$0x1]  ;;  %v5356_v16 = vrot.slane %v7935_v56, 5 }
 0x13c   : > { %8762 = vmatpush3.bf16.msra.mxu1 %v8761_v18  ;;  %v7944_v18 = vrot.slane %v7904_v42, 9  ;;  %v7924_v42 = vld [vmem:[%s9443_s20 + $0x98] sm:$0x1] }
 0x13d   : > { %8763 = vmatprep.subr.bf16.mxu1 %v9357_v52  ;;  %v5316_v30 = vrot.slane %v5314_v53, 4  ;;  %v5311_v48 = vsel %vm9684_vm6, %v5309_v22, %v5310_v28  ;;  %v5352_v22 = vrot.slane %v7933_v15, 5 }
 0x13f   : > { %8644 = vmatmul.mubr.f32.vlgmr.msra.gmra.mrb[32].mxu1 %v10377_v31  ;;  %8570 = vmatmul.mubr.msk.bf16.gmra.mrb[24].mxu0 %vm474_vm0, %v7871_v50  ;;  %v5279_v31 = vrot.slane %v7902_v11, 5  ;;  %v5300_v50 = vrot.slane %v7911_v13, 5  ;;  %v7920_v11 = vld [vmem:[%s9443_s20 + $0x88] sm:$0xf] }
 0x140   : > { %8765 = vmatpush3.bf16.msra.mxu1 %v10150_v39  ;;  %8573 = vmatprep.mubr.msk.bf16.mxu0 %vm474_vm0, %v7872_v51  ;;  %v7910_v51 = vld [vmem:[%s9443_s20 + $0x60] sm:$0xe]  ;;  %v5321_v61 = vrot.slane %v7920_v11, 5 }
 0x141   : > { %8766 = vmatprep.subr.bf16.mxu1 %v9357_v52  ;;  %8654 = vmatprep.mubr.msk.f32.mxu1 %vm9358_vm7, %v9359_v24  ;;  %v5281_v41 = vrot.slane %v5279_v31, 4  ;;  %v5280_v49 = vsel %vm9684_vm6, %v7943_v37, %v5279_v31  ;;  %v7946_v1 = vrot.slane %v7910_v51, 9  ;;  %v5302_v32 = vrot.slane %v5300_v50, 4  ;;  %v7930_v51 = vld [vmem:[%s9443_s20 + $0xb0] sm:$0x1] }
 0x142   : > { %v5315_v31 = vsel %vm9684_vm6, %v7948_v29, %v5314_v53  ;;  %v5323_v37 = vrot.slane %v5321_v61, 4  ;;  %v7934_v53 = vld [vmem:[%s9443_s20 + $0xc0] sm:$0xe]  ;;  %v5358_v29 = vrot.slane %v5356_v16, 4 }
 0x143   : > { %v5283_v44 = vsel %vm9684_vm6, %v5281_v41, %v5282_v14  ;;  %v5301_v19 = vsel %vm9684_vm6, %v7946_v1, %v5300_v50  ;;  %v5324_v41 = vrot.slane %v7921_v62, 5  ;;  %v7928_v50 = vld [vmem:[%s9443_s20 + $0xa8] sm:$0xe]  ;;  %v5344_v1 = vrot.slane %v5342_v9, 4 }
 0x144   : > { %8768 = vmatpush3.bf16.msra.mxu1 %v10216_v25  ;;  %v7963_v58 = vcombine.low %v5280_v49, %v5283_v44  ;;  %v7952_v54 = vrot.slane %v7928_v50, 9  ;;  %v7954_v28 = vrot.slane %v7934_v53, 9 }
 0x145   : > { %8769 = vmatprep.subr.bf16.mxu1 %v9357_v52  ;;  %v5325_v49 = vsel %vm9684_vm6, %v5323_v37, %v5324_v41 }
 0x147   : > { %8655 = vmatmul.mubr.f32.vlgmr.msra.gmra.mrb[32].mxu1 %v6231_v23  ;;  %8574 = vmatmul.mubr.msk.bf16.gmra.mrb[28].mxu0 %vm474_vm0, %v7873_v38  ;;  %v5286_v23 = vrot.slane %v7905_v21, 5  ;;  %v7918_v38 = vld [vmem:[%s9443_s20 + $0x80] sm:$0x1]  ;;  %v7923_v21 = vld [vmem:[%s9443_s20 + $0x94] sm:$0xf] }
 0x148   : > { %8771 = vmatpush3.bf16.msra.mxu1 %v8770_v4  ;;  %8581 = vmatprep.mubr.msk.bf16.mxu0 %vm474_vm0, %v7960_v6  ;;  %v5317_v33 = vrot.slane %v7918_v38, 5  ;;  %v5328_v3 = vrot.slane %v7923_v21, 5 }
 0x149   : > { %8772 = vmatprep.subr.bf16.mxu1 %v9357_v52  ;;  %8665 = vmatprep.mubr.msk.f32.mxu1 %vm9358_vm7, %v9359_v24  ;;  %v5288_v45 = vrot.slane %v5286_v23, 4  ;;  %v5287_v55 = vsel %vm9684_vm6, %v7944_v18, %v5286_v23  ;;  %v7922_v23 = vld [vmem:[%s9443_s20 + $0x90] sm:$0xe] }
 0x14a   : > { %v5318_v26 = vsel %vm9684_vm6, %v5316_v30, %v5317_v33  ;;  %v7950_v14 = vrot.slane %v7922_v23, 9  ;;  %v5330_v18 = vrot.slane %v5328_v3, 4  ;;  %v5359_v30 = vrot.slane %v7936_v27, 5  ;;  %v7938_v33 = vld [vmem:[%s9443_s20 + $0xd0] sm:$0xf] }
 0x14c   : > { %8774 = vmatpush3.bf16.msra.mxu1 %v8773_v40  ;;  %v5308_v40 = vsel %vm9684_vm6, %v7947_v17, %v5307_v5  ;;  %v5343_v5 = vsel %vm9684_vm6, %v7952_v54, %v5342_v9 }
 0x14d   : > { %8775 = vmatprep.subr.bf16.mxu1 %v9357_v52  ;;  %v7967_v35 = vcombine.low %v5308_v40, %v5311_v48  ;;  %v5363_v40 = vrot.slane %v7938_v33, 5  ;;  %v5357_v48 = vsel %vm9684_vm6, %v7954_v28, %v5356_v16 }
 0x14f   : > { %8666 = vmatmul.mubr.f32.vlgmr.msra.gmra.mrb[32].mxu1 %v10352_v20  ;;  %8582 = vmatmul.mubr.msk.bf16.vlgmr.msra.gmra.mrb[0].mxu0 %vm474_vm0, %v7961_v43  ;;  %v7968_v43 = vcombine.low %v5315_v31, %v5318_v26  ;;  %v7937_v31 = vld [vmem:[%s9443_s20 + $0xcc] sm:$0xe]  ;;  %v7939_v26 = vld [vmem:[%s9443_s20 + $0xd4] sm:$0x1]  ;;  %v5365_v23 = vrot.slane %v5363_v40, 4 }
 0x150   : > { %8777 = vmatpush3.bf16.msra.mxu1 %v10150_v39  ;;  %8585 = vmatprep.mubr.msk.bf16.mxu0 %vm474_vm0, %v7962_v60  ;;  %v5290_v39 = vsel %vm9684_vm6, %v5288_v45, %v5289_v36  ;;  %v7949_v60 = vrot.slane %v7919_v12, 9  ;;  %v5331_v45 = vrot.slane %v7924_v42, 5  ;;  %v7926_v36 = vld [vmem:[%s9443_s20 + $0xa0] sm:$0xf]  ;;  %v5366_v42 = vrot.slane %v7939_v26, 5 }
 0x151   : > { %8778 = vmatprep.subr.bf16.mxu1 %v9357_v52  ;;  %8676 = vmatprep.mubr.msk.f32.mxu1 %vm9358_vm7, %v9359_v24  ;;  %v7964_v59 = vcombine.low %v5287_v55, %v5290_v39  ;;  %v5335_v44 = vrot.slane %v7926_v36, 5  ;;  %v7925_v39 = vld [vmem:[%s9443_s20 + $0x9c] sm:$0xe] }
 0x152   : > { %v5322_v13 = vsel %vm9684_vm6, %v7949_v60, %v5321_v61  ;;  %v5332_v55 = vsel %vm9684_vm6, %v5330_v18, %v5331_v45  ;;  %v5360_v61 = vsel %vm9684_vm6, %v5358_v29, %v5359_v30  ;;  %v10700_v30 = vld [vmem:[%s10905_s5] sm:$0xff] }
 0x153   : > { %v7969_v34 = vcombine.low %v5322_v13, %v5325_v49  ;;  %v7974_v62 = vcombine.low %v5357_v48, %v5360_v61 }
 0x154   : > { %8780 = vmatpush3.bf16.msra.mxu1 %v10216_v25  ;;  %v5294_v25 = vsel %vm9684_vm6, %v7945_v63, %v5293_v7  ;;  %v5329_v7 = vsel %vm9684_vm6, %v7950_v14, %v5328_v3  ;;  %v5337_v63 = vrot.slane %v5335_v44, 4  ;;  %v7955_v3 = vrot.slane %v7937_v31, 9 }
 0x155   : > { %8781 = vmatprep.subr.bf16.mxu1 %v9357_v52  ;;  %v7965_v4 = vcombine.low %v5294_v25, %v5297_v8 }
 0x156   : > { %v5339_v25 = vsel %vm9684_vm6, %v5337_v63, %v5338_v0 }
 0x157   : > { %8677 = vmatmul.mubr.f32.vlgmr.msra.gmra.mrb[32].mxu1 %v10352_v20  ;;  %8586 = vmatmul.mubr.msk.bf16.gmra.mrb[4].mxu0 %vm474_vm0, %v7963_v58  ;;  %v5304_v20 = vsel %vm9684_vm6, %v5302_v32, %v5303_v57  ;;  %v7970_v58 = vcombine.low %v5329_v7, %v5332_v55  ;;  %v5345_v32 = vrot.slane %v7930_v51, 5  ;;  %v7932_v57 = vld [vmem:[%s9443_s20 + $0xb8] sm:$0xf] }
 0x158   : > { %8687 = vmatprep.mubr.msk.f32.mxu1 %vm9358_vm7, %v9359_v24  ;;  %8589 = vmatprep.mubr.msk.bf16.mxu0 %vm474_vm0, %v7964_v59  ;;  %v7966_v6 = vcombine.low %v5301_v19, %v5304_v20  ;;  %v7951_v59 = vrot.slane %v7925_v39, 9  ;;  %v5349_v8 = vrot.slane %v7932_v57, 5  ;;  %v7931_v20 = vld [vmem:[%s9443_s20 + $0xb4] sm:$0xe] }
 0x159   : > { %v5346_v19 = vsel %vm9684_vm6, %v5344_v1, %v5345_v32 }
 0x15a   : > { %v5336_v46 = vsel %vm9684_vm6, %v7951_v59, %v5335_v44  ;;  %v5351_v17 = vrot.slane %v5349_v8, 4 }
 0x15b   : > { %v7971_v38 = vcombine.low %v5336_v46, %v5339_v25 }
 0x15c   : > { %v5353_v21 = vsel %vm9684_vm6, %v5351_v17, %v5352_v22 }
 0x15f   : > { %8590 = vmatmul.mubr.msk.bf16.gmra.mrb[8].mxu0 %vm474_vm0, %v7965_v4  ;;  %v7972_v4 = vcombine.low %v5343_v5, %v5346_v19 }
 0x160   : > { %8593 = vmatprep.mubr.msk.bf16.mxu0 %vm474_vm0, %v7966_v6  ;;  %v7953_v6 = vrot.slane %v7931_v20, 9  ;;  %v10692_v20 = vld [vmem:[%s10902_s2] ss:$0 sm:$0xff] }
 0x162   : > { %v5350_v11 = vsel %vm9684_vm6, %v7953_v6, %v5349_v8 }
 0x163   : > { %v7973_v12 = vcombine.low %v5350_v11, %v5353_v21 }
 0x167   : > { %8594 = vmatmul.mubr.msk.bf16.gmra.mrb[12].mxu0 %vm474_vm0, %v7967_v35  ;;  %v5364_v35 = vsel %vm9684_vm6, %v7955_v3, %v5363_v40 }
 0x168   : > { %8597 = vmatprep.mubr.msk.bf16.mxu0 %vm474_vm0, %v7968_v43  ;;  %v5367_v43 = vsel %vm9684_vm6, %v5365_v23, %v5366_v42 }
 0x169   : > { %v7975_v60 = vcombine.low %v5364_v35, %v5367_v43 }
 0x16f   : > { %8598 = vmatmul.mubr.msk.bf16.gmra.mrb[16].mxu0 %vm474_vm0, %v7969_v34 }
 0x170   : > { %8601 = vmatprep.mubr.msk.bf16.mxu0 %vm474_vm0, %v7970_v58 }
 0x177   : > { %8602 = vmatmul.mubr.msk.bf16.gmra.mrb[20].mxu0 %vm474_vm0, %v7971_v38 }
 0x178   : > { %8605 = vmatprep.mubr.msk.bf16.mxu0 %vm474_vm0, %v7972_v4 }
 0x17f   : > { %8606 = vmatmul.mubr.msk.bf16.gmra.mrb[24].mxu0 %vm474_vm0, %v7973_v12 }
 0x180   : > { %8609 = vmatprep.mubr.msk.bf16.mxu0 %vm474_vm0, %v7974_v62 }
 0x187   : > { %8610 = vmatmul.mubr.msk.bf16.gmra.mrb[28].mxu0 %vm474_vm0, %v7975_v60 }
 0x192   : > { %v8367_v37 = vpop.f32.mrb[0].mxu1 }
 0x193   : > { %v1879_v41 = vpop.f32.mrb[1].mxu1 }
 0x194   : > { %v8368_v14 = vpop.f32.mrb[2].mxu1 }
 0x195   : > { %v1882_v18 = vpop.f32.mrb[3].mxu1 }
 0x19a   : > { %v8371_v45 = vpop.f32.mrb[4].mxu1 }
 0x19b   : > { %v1895_v36 = vpop.f32.mrb[5].mxu1 }
 0x19c   : > { %v8372_v2 = vpop.f32.mrb[6].mxu1 }
 0x19d   : > { %v10639_v13 = vpop.f32.mrb[7].mxu1 }
 0x1d2   : > { %v10641_v49 = vpop.f32.mrb[8].mxu1 }
 0x1d3   : > { %v10643_v44 = vpop.f32.mrb[9].mxu1 }
 0x1d4   : > { %v10645_v7 = vpop.f32.mrb[10].mxu1 }
 0x1d5   : > { %v10647_v10 = vpop.f32.mrb[11].mxu1 }
 0x1da   : > { %v10649_v55 = vpop.f32.mrb[12].mxu1 }
 0x1db   : > { %v10651_v39 = vpop.f32.mrb[13].mxu1 }
 0x1dc   : > { %v10653_v47 = vpop.f32.mrb[14].mxu1 }
 0x1dd   : > { %v10655_v9 = vpop.f32.mrb[15].mxu1 }
 0x1e2   : > { %v10657_v50 = vpop.f32.mrb[16].mxu1 }
 0x1e3   : > { %v10659_v51 = vpop.f32.mrb[17].mxu1 }
 0x1e4   : > { %v10661_v34 = vpop.f32.mrb[18].mxu1 }
 0x1e5   : > { %v10663_v58 = vpop.f32.mrb[19].mxu1 }
 0x1ea   : > { %v10665_v59 = vpop.f32.mrb[20].mxu1 }
 0x1eb   : > { %v10667_v63 = vpop.f32.mrb[21].mxu1 }
 0x1ec   : > { %v10669_v0 = vpop.f32.mrb[22].mxu1 }
 0x1ed   : > { %v10671_v54 = vpop.f32.mrb[23].mxu1 }
 0x1f2   : > { %v10673_v1 = vpop.f32.mrb[24].mxu1 }
 0x1f3   : > { %v10675_v32 = vpop.f32.mrb[25].mxu1 }
 0x1f4   : > { %v10677_v57 = vpop.f32.mrb[26].mxu1 }
 0x1f5   : > { %v10679_v56 = vpop.f32.mrb[27].mxu1 }
 0x1fa   : > { %v10681_v46 = vpop.f32.mrb[28].mxu1 }
 0x1fb   : > { %v10683_v25 = vpop.f32.mrb[29].mxu1 }
 0x1fc   : > { %v10685_v8 = vpop.f32.mrb[30].mxu1 }
 0x1fd   : > { %v10687_v5 = vpop.f32.mrb[31].mxu1 }
 0x222   : > { %v8583_v19 = vpop.f32.mrb[0].mxu0 }
 0x223   : > { %v8821_v15 = vadd.f32 %v8583_v19, %v8367_v37  ;;  %v5515_v16 = vpop.f32.mrb[1].mxu0 }
 0x224   : > { %v8822_v53 = vadd.f32 %v5515_v16, %v1879_v41  ;;  %v8584_v27 = vpop.f32.mrb[2].mxu0 }
 0x225   : > { %v5779_v38 = vadd.f32 %v8821_v15, %v10692_v20  ;;  %v8823_v4 = vadd.f32 %v8584_v27, %v8368_v14  ;;  %v5518_v6 = vpop.f32.mrb[3].mxu0 }
 0x226   : > { %v5777_v17 = vadd.f32 %v8822_v53, %v10692_v20  ;;  %v8824_v22 = vadd.f32 %v5518_v6, %v1882_v18 }
 0x227   : > { %v5811_v28 = vsub.f32 0.0, %v5779_v38  ;;  %v5780_v29 = vadd.f32 %v8823_v4, %v10692_v20 }
 0x228   : > { %v5809_v33 = vsub.f32 0.0, %v5777_v17  ;;  %v5778_v11 = vadd.f32 %v8824_v22, %v10692_v20 }
 0x229   : > { %v5845_v21 = vmul.f32 1.442695, %v5811_v28  ;;  %v5812_v40 = vsub.f32 0.0, %v5780_v29 }
 0x22a   : > { %v6641_v48 = vpop.f32.mrb[32].mxu1  ;;  %v5841_v61 = vmul.f32 1.442695, %v5809_v33  ;;  %v5810_v31 = vsub.f32 0.0, %v5778_v11  ;;  %v8587_v26 = vpop.f32.mrb[4].mxu0 }
 0x22b   : > { %v10704_v12 = vadd.f32 %v6641_v48, %v10700_v30  ;;  %v8678_v62 = vpop.f32.mrb[33].mxu1  ;;  %9198 = vpow2.f32 %v5845_v21  ;;  %v5847_v3 = vmul.f32 1.442695, %v5812_v40  ;;  %v8825_v23 = vadd.f32 %v8587_v26, %v8371_v45  ;;  %v5531_v42 = vpop.f32.mrb[5].mxu0 }
 0x22c   : > { %9200 = vpow2.f32 %v5841_v61  ;;  %v5843_v35 = vmul.f32 1.442695, %v5810_v31  ;;  %v8826_v43 = vadd.f32 %v5531_v42, %v1895_v36  ;;  %v8588_v60 = vpop.f32.mrb[6].mxu0 }
 0x22d   : > { %v6646_v37 = vsel %vm6645_vm8, %v10704_v12, 0.0  ;;  %9202 = vpow2.f32 %v5847_v3  ;;  %v5783_v41 = vadd.f32 %v8825_v23, %v10692_v20  ;;  %v8827_v14 = vadd.f32 %v8588_v60, %v8372_v2  ;;  %v5534_v18 = vpop.f32.mrb[7].mxu0 }
 0x22e   : > { %6647 = vadd.xlane.f32.xlu0 %v6646_v37  ;;  %9204 = vpow2.f32 %v5843_v35  ;;  %v5781_v19 = vadd.f32 %v8826_v43, %v10692_v20  ;;  %v8828_v15 = vadd.f32 %v5534_v18, %v10639_v13 }
 0x22f   : > { %v5815_v45 = vsub.f32 0.0, %v5783_v41  ;;  %v5784_v16 = vadd.f32 %v8827_v14, %v10692_v20 }
 0x230   : > { %v5813_v53 = vsub.f32 0.0, %v5781_v19  ;;  %v5782_v36 = vadd.f32 %v8828_v15, %v10692_v20 }
 0x231   : > { %v5853_v27 = vmul.f32 1.442695, %v5815_v45  ;;  %v5816_v38 = vsub.f32 0.0, %v5784_v16 }
 0x232   : > { %v5849_v4 = vmul.f32 1.442695, %v5813_v53  ;;  %v5814_v6 = vsub.f32 0.0, %v5782_v36  ;;  %v8591_v17 = vpop.f32.mrb[8].mxu0 }
 0x233   : > { %9206 = vpow2.f32 %v5853_v27  ;;  %v5855_v2 = vmul.f32 1.442695, %v5816_v38  ;;  %v8829_v22 = vadd.f32 %v8591_v17, %v10641_v49  ;;  %v5547_v28 = vpop.f32.mrb[9].mxu0 }
 0x234   : > { %9208 = vpow2.f32 %v5849_v4  ;;  %v5851_v29 = vmul.f32 1.442695, %v5814_v6  ;;  %v8830_v13 = vadd.f32 %v5547_v28, %v10643_v44  ;;  %v8592_v33 = vpop.f32.mrb[10].mxu0 }
 0x235   : > { %v9199_v11 = vpop.eup %9198  ;;  %9210 = vpow2.f32 %v5855_v2  ;;  %v5787_v21 = vadd.f32 %v8829_v22, %v10692_v20  ;;  %v8831_v40 = vadd.f32 %v8592_v33, %v10645_v7  ;;  %v5550_v48 = vpop.f32.mrb[11].mxu0 }
 0x236   : > { %v9201_v61 = vpop.eup %9200  ;;  %v5907_v31 = vadd.f32 1.0, %v9199_v11  ;;  %9212 = vpow2.f32 %v5851_v29  ;;  %v5785_v26 = vadd.f32 %v8830_v13, %v10692_v20  ;;  %v8832_v49 = vadd.f32 %v5550_v48, %v10647_v10 }
 0x237   : > { %v9203_v62 = vpop.eup %9202  ;;  %v5905_v3 = vadd.f32 1.0, %v9201_v61  ;;  %v5819_v23 = vsub.f32 0.0, %v5787_v21  ;;  %v5788_v44 = vadd.f32 %v8831_v40, %v10692_v20 }
 0x238   : > { %v9205_v42 = vpop.eup %9204  ;;  %9214 = vrcp.f32 %v5907_v31  ;;  %v5908_v35 = vadd.f32 1.0, %v9203_v62  ;;  %v5817_v43 = vsub.f32 0.0, %v5785_v26  ;;  %v5786_v60 = vadd.f32 %v8832_v49, %v10692_v20 }
 0x239   : > { %9216 = vrcp.f32 %v5905_v3  ;;  %v5906_v7 = vadd.f32 1.0, %v9205_v42  ;;  %v5861_v37 = vmul.f32 1.442695, %v5819_v23  ;;  %v5820_v41 = vsub.f32 0.0, %v5788_v44 }
 0x23a   : > { %9218 = vrcp.f32 %v5908_v35  ;;  %v5857_v14 = vmul.f32 1.442695, %v5817_v43  ;;  %v5818_v18 = vsub.f32 0.0, %v5786_v60  ;;  %v8595_v19 = vpop.f32.mrb[12].mxu0 }
 0x23b   : > { %9220 = vrcp.f32 %v5906_v7  ;;  %v5863_v10 = vmul.f32 1.442695, %v5820_v41  ;;  %v8833_v15 = vadd.f32 %v8595_v19, %v10649_v55  ;;  %v5563_v45 = vpop.f32.mrb[13].mxu0 }
 0x23c   : > { %9222 = vpow2.f32 %v5861_v37  ;;  %v5859_v16 = vmul.f32 1.442695, %v5818_v18  ;;  %v8834_v53 = vadd.f32 %v5563_v45, %v10651_v39  ;;  %v8596_v36 = vpop.f32.mrb[14].mxu0 }
 0x23d   : > { %v9207_v27 = vpop.eup %9206  ;;  %9224 = vpow2.f32 %v5857_v14  ;;  %v5791_v38 = vadd.f32 %v8833_v15, %v10692_v20  ;;  %v8835_v4 = vadd.f32 %v8596_v36, %v10653_v47  ;;  %v5566_v6 = vpop.f32.mrb[15].mxu0 }
 0x23e   : > { %v9209_v17 = vpop.eup %9208  ;;  %v5911_v2 = vadd.f32 1.0, %v9207_v27  ;;  %9226 = vpow2.f32 %v5863_v10  ;;  %v5789_v22 = vadd.f32 %v8834_v53, %v10692_v20  ;;  %v8836_v55 = vadd.f32 %v5566_v6, %v10655_v9 }
 0x23f   : > { %v9211_v28 = vpop.eup %9210  ;;  %v5909_v29 = vadd.f32 1.0, %v9209_v17  ;;  %9228 = vpow2.f32 %v5859_v16  ;;  %v5823_v39 = vsub.f32 0.0, %v5791_v38  ;;  %v5792_v13 = vadd.f32 %v8835_v4, %v10692_v20 }
 0x240   : > { %v9213_v33 = vpop.eup %9212  ;;  %9230 = vrcp.f32 %v5911_v2  ;;  %v5912_v11 = vadd.f32 1.0, %v9211_v28  ;;  %v5821_v21 = vsub.f32 0.0, %v5789_v22  ;;  %v5790_v47 = vadd.f32 %v8836_v55, %v10692_v20 }
 0x241   : > { %9232 = vrcp.f32 %v5909_v29  ;;  %v5910_v40 = vadd.f32 1.0, %v9213_v33  ;;  %v5869_v48 = vmul.f32 1.442695, %v5823_v39  ;;  %v5824_v61 = vsub.f32 0.0, %v5792_v13 }
 0x242   : > { %v9215_v31 = vpop.eup %9214  ;;  %9234 = vrcp.f32 %v5912_v11  ;;  %v5865_v9 = vmul.f32 1.442695, %v5821_v21  ;;  %v5822_v26 = vsub.f32 0.0, %v5790_v47  ;;  %v8599_v49 = vpop.f32.mrb[16].mxu0 }
 0x243   : > { %v9217_v62 = vpop.eup %9216  ;;  %v8037_v3 = vpack.c.bf16 %v9215_v31, %v9215_v31  ;;  %9236 = vrcp.f32 %v5910_v40  ;;  %v5871_v23 = vmul.f32 1.442695, %v5824_v61  ;;  %v8837_v44 = vadd.f32 %v8599_v49, %v10657_v50  ;;  %v5579_v42 = vpop.f32.mrb[17].mxu0 }
 0x244   : > { %v9219_v35 = vpop.eup %9218  ;;  %v8035_v43 = vpack.c.bf16 %v9217_v62, %v9217_v62  ;;  %9238 = vpow2.f32 %v5869_v48  ;;  %v5867_v60 = vmul.f32 1.442695, %v5822_v26  ;;  %v8838_v7 = vadd.f32 %v5579_v42, %v10659_v51  ;;  %v8600_v37 = vpop.f32.mrb[18].mxu0 }
 0x245   : > { %v9221_v41 = vpop.eup %9220  ;;  %6100 = vst.msk [vmem:[%s10733_s14 + $0x8] sm:$0xf] %vm6097_vm9, %v8037_v3  ;;  %v8038_v14 = vpack.c.bf16 %v9219_v35, %v9219_v35  ;;  %9240 = vpow2.f32 %v5865_v9  ;;  %v5795_v18 = vadd.f32 %v8837_v44, %v10692_v20  ;;  %v8839_v50 = vadd.f32 %v8600_v37, %v10661_v34  ;;  %v5582_v19 = vpop.f32.mrb[19].mxu0 }
 0x246   : > { %v9223_v10 = vpop.eup %9222  ;;  %6098 = vst.msk [vmem:[%s10733_s14] sm:$0xf] %vm6097_vm9, %v8035_v43  ;;  %v8036_v15 = vpack.c.bf16 %v9221_v41, %v9221_v41  ;;  %9242 = vpow2.f32 %v5871_v23  ;;  %v5793_v51 = vadd.f32 %v8838_v7, %v10692_v20  ;;  %v8840_v45 = vadd.f32 %v5582_v19, %v10663_v58 }
 0x247   : > { %v9225_v16 = vpop.eup %9224  ;;  %6101 = vst.msk [vmem:[%s10733_s14 + $0xc] sm:$0xf] %vm6097_vm9, %v8038_v14  ;;  %v5915_v53 = vadd.f32 1.0, %v9223_v10  ;;  %9244 = vpow2.f32 %v5867_v60  ;;  %v5827_v36 = vsub.f32 0.0, %v5795_v18  ;;  %v5796_v27 = vadd.f32 %v8839_v50, %v10692_v20 }
 0x248   : > { %v9227_v38 = vpop.eup %9226  ;;  %6099 = vst.msk [vmem:[%s10733_s14 + $0x4] sm:$0xf] %vm6097_vm9, %v8036_v15  ;;  %v5913_v34 = vadd.f32 1.0, %v9225_v16  ;;  %v5825_v4 = vsub.f32 0.0, %v5793_v51  ;;  %v5794_v6 = vadd.f32 %v8840_v45, %v10692_v20 }
 0x249   : > { %v9229_v17 = vpop.eup %9228  ;;  %9246 = vrcp.f32 %v5915_v53  ;;  %v5916_v2 = vadd.f32 1.0, %v9227_v38  ;;  %v5877_v22 = vmul.f32 1.442695, %v5827_v36  ;;  %v5828_v58 = vsub.f32 0.0, %v5796_v27 }
 0x24a   : > { %v9231_v55 = vpop.eup %9230  ;;  %9248 = vrcp.f32 %v5913_v34  ;;  %v5914_v28 = vadd.f32 1.0, %v9229_v17  ;;  %v5873_v29 = vmul.f32 1.442695, %v5825_v4  ;;  %v5826_v39 = vsub.f32 0.0, %v5794_v6  ;;  %v8603_v13 = vpop.f32.mrb[20].mxu0 }
 0x24b   : > { %v9233_v33 = vpop.eup %9232  ;;  %v8041_v11 = vpack.c.bf16 %v9231_v55, %v9231_v55  ;;  %9250 = vrcp.f32 %v5916_v2  ;;  %v5879_v21 = vmul.f32 1.442695, %v5828_v58  ;;  %v8841_v47 = vadd.f32 %v8603_v13, %v10665_v59  ;;  %v5595_v40 = vpop.f32.mrb[21].mxu0 }
 0x24c   : > { %v9235_v48 = vpop.eup %9234  ;;  %v8039_v61 = vpack.c.bf16 %v9233_v33, %v9233_v33  ;;  %9252 = vrcp.f32 %v5914_v28  ;;  %v5875_v31 = vmul.f32 1.442695, %v5826_v39  ;;  %v8842_v9 = vadd.f32 %v5595_v40, %v10667_v63  ;;  %v8604_v26 = vpop.f32.mrb[22].mxu0 }
 0x24d   : > { %v9237_v49 = vpop.eup %9236  ;;  %6104 = vst.msk [vmem:[%s10733_s14 + $0x18] sm:$0xf] %vm6097_vm9, %v8041_v11  ;;  %v8042_v62 = vpack.c.bf16 %v9235_v48, %v9235_v48  ;;  %9254 = vpow2.f32 %v5877_v22  ;;  %v5799_v3 = vadd.f32 %v8841_v47, %v10692_v20  ;;  %v8843_v59 = vadd.f32 %v8604_v26, %v10669_v0  ;;  %v5598_v23 = vpop.f32.mrb[23].mxu0 }
 0x24e   : > { %v9239_v44 = vpop.eup %9238  ;;  %6102 = vst.msk [vmem:[%s10733_s14 + $0x10] sm:$0xf] %vm6097_vm9, %v8039_v61  ;;  %v8040_v42 = vpack.c.bf16 %v9237_v49, %v9237_v49  ;;  %9256 = vpow2.f32 %v5873_v29  ;;  %v5797_v63 = vadd.f32 %v8842_v9, %v10692_v20  ;;  %v8844_v35 = vadd.f32 %v5598_v23, %v10671_v54 }
 0x24f   : > { %v9241_v43 = vpop.eup %9240  ;;  %6105 = vst.msk [vmem:[%s10733_s14 + $0x1c] sm:$0xf] %vm6097_vm9, %v8042_v62  ;;  %v5919_v60 = vadd.f32 1.0, %v9239_v44  ;;  %9258 = vpow2.f32 %v5879_v21  ;;  %v5831_v7 = vsub.f32 0.0, %v5799_v3  ;;  %v5800_v37 = vadd.f32 %v8843_v59, %v10692_v20 }
 0x250   : > { %v9243_v41 = vpop.eup %9242  ;;  %6103 = vst.msk [vmem:[%s10733_s14 + $0x14] sm:$0xf] %vm6097_vm9, %v8040_v42  ;;  %v5917_v0 = vadd.f32 1.0, %v9241_v43  ;;  %9260 = vpow2.f32 %v5875_v31  ;;  %v5829_v14 = vsub.f32 0.0, %v5797_v63  ;;  %v5798_v18 = vadd.f32 %v8844_v35, %v10692_v20 }
 0x251   : > { %v9245_v50 = vpop.eup %9244  ;;  %9262 = vrcp.f32 %v5919_v60  ;;  %v5920_v19 = vadd.f32 1.0, %v9243_v41  ;;  %v5885_v54 = vmul.f32 1.442695, %v5831_v7  ;;  %v5832_v10 = vsub.f32 0.0, %v5800_v37 }
 0x252   : > { %9264 = vrcp.f32 %v5917_v0  ;;  %v5918_v15 = vadd.f32 1.0, %v9245_v50  ;;  %v5881_v51 = vmul.f32 1.442695, %v5829_v14  ;;  %v5830_v45 = vsub.f32 0.0, %v5798_v18  ;;  %v8607_v16 = vpop.f32.mrb[24].mxu0 }
 0x253   : > { %v9247_v53 = vpop.eup %9246  ;;  %9266 = vrcp.f32 %v5920_v19  ;;  %v5887_v36 = vmul.f32 1.442695, %v5832_v10  ;;  %v8845_v27 = vadd.f32 %v8607_v16, %v10673_v1  ;;  %v5611_v38 = vpop.f32.mrb[25].mxu0 }
 0x254   : > { %v9249_v34 = vpop.eup %9248  ;;  %v8045_v4 = vpack.c.bf16 %v9247_v53, %v9247_v53  ;;  %9268 = vrcp.f32 %v5918_v15  ;;  %v5883_v6 = vmul.f32 1.442695, %v5830_v45  ;;  %v8846_v17 = vadd.f32 %v5611_v38, %v10675_v32  ;;  %v8608_v2 = vpop.f32.mrb[26].mxu0 }
 0x255   : > { %v9251_v22 = vpop.eup %9250  ;;  %v8043_v58 = vpack.c.bf16 %v9249_v34, %v9249_v34  ;;  %9270 = vpow2.f32 %v5885_v54  ;;  %v5803_v55 = vadd.f32 %v8845_v27, %v10692_v20  ;;  %v8847_v28 = vadd.f32 %v8608_v2, %v10677_v57  ;;  %v5614_v29 = vpop.f32.mrb[27].mxu0 }
 0x256   : > { %v9253_v39 = vpop.eup %9252  ;;  %6108 = vst.msk [vmem:[%s10733_s14 + $0x28] sm:$0xf] %vm6097_vm9, %v8045_v4  ;;  %v8046_v1 = vpack.c.bf16 %v9251_v22, %v9251_v22  ;;  %9272 = vpow2.f32 %v5881_v51  ;;  %v5801_v13 = vadd.f32 %v8846_v17, %v10692_v20  ;;  %v8848_v32 = vadd.f32 %v5614_v29, %v10679_v56 }
 0x257   : > { %v9255_v33 = vpop.eup %9254  ;;  %6106 = vst.msk [vmem:[%s10733_s14 + $0x20] sm:$0xf] %vm6097_vm9, %v8043_v58  ;;  %v8044_v11 = vpack.c.bf16 %v9253_v39, %v9253_v39  ;;  %9274 = vpow2.f32 %v5887_v36  ;;  %v5835_v21 = vsub.f32 0.0, %v5803_v55  ;;  %v5804_v47 = vadd.f32 %v8847_v28, %v10692_v20 }
 0x258   : > { %v9257_v57 = vpop.eup %9256  ;;  %6109 = vst.msk [vmem:[%s10733_s14 + $0x2c] sm:$0xf] %vm6097_vm9, %v8046_v1  ;;  %v5923_v40 = vadd.f32 1.0, %v9255_v33  ;;  %9276 = vpow2.f32 %v5883_v6  ;;  %v5833_v48 = vsub.f32 0.0, %v5801_v13  ;;  %v5802_v61 = vadd.f32 %v8848_v32, %v10692_v20 }
 0x259   : > { %v9259_v31 = vpop.eup %9258  ;;  %6107 = vst.msk [vmem:[%s10733_s14 + $0x24] sm:$0xf] %vm6097_vm9, %v8044_v11  ;;  %v5921_v56 = vadd.f32 1.0, %v9257_v57  ;;  %v5893_v9 = vmul.f32 1.442695, %v5835_v21  ;;  %v5836_v26 = vsub.f32 0.0, %v5804_v47 }
 0x25a   : > { %v9261_v49 = vpop.eup %9260  ;;  %9278 = vrcp.f32 %v5923_v40  ;;  %v5924_v62 = vadd.f32 1.0, %v9259_v31  ;;  %v5889_v3 = vmul.f32 1.442695, %v5833_v48  ;;  %v5834_v59 = vsub.f32 0.0, %v5802_v61  ;;  %v8611_v23 = vpop.f32.mrb[28].mxu0 }
 0x25b   : > { %v9263_v44 = vpop.eup %9262  ;;  %9280 = vrcp.f32 %v5921_v56  ;;  %v5922_v42 = vadd.f32 1.0, %v9261_v49  ;;  %v5895_v63 = vmul.f32 1.442695, %v5836_v26  ;;  %v8849_v35 = vadd.f32 %v8611_v23, %v10681_v46  ;;  %v5627_v43 = vpop.f32.mrb[29].mxu0 }
 0x25c   : > { %v9265_v60 = vpop.eup %9264  ;;  %v8049_v7 = vpack.c.bf16 %v9263_v44, %v9263_v44  ;;  %9282 = vrcp.f32 %v5924_v62  ;;  %v5891_v37 = vmul.f32 1.442695, %v5834_v59  ;;  %v8850_v41 = vadd.f32 %v5627_v43, %v10683_v25  ;;  %v8612_v0 = vpop.f32.mrb[30].mxu0 }
 0x25d   : > { %v9267_v14 = vpop.eup %9266  ;;  %v8047_v18 = vpack.c.bf16 %v9265_v60, %v9265_v60  ;;  %9284 = vrcp.f32 %v5922_v42  ;;  %v5807_v50 = vadd.f32 %v8849_v35, %v10692_v20  ;;  %v8851_v19 = vadd.f32 %v8612_v0, %v10685_v8  ;;  %v5630_v54 = vpop.f32.mrb[31].mxu0 }
 0x25e   : > { %v9269_v10 = vpop.eup %9268  ;;  %6112 = vst.msk [vmem:[%s10733_s14 + $0x38] sm:$0xf] %vm6097_vm9, %v8049_v7  ;;  %v8050_v46 = vpack.c.bf16 %v9267_v14, %v9267_v14  ;;  %9286 = vpow2.f32 %v5893_v9  ;;  %v5805_v15 = vadd.f32 %v8850_v41, %v10692_v20  ;;  %v8852_v25 = vadd.f32 %v5630_v54, %v10687_v5 }
 0x25f   : > { %v9271_v51 = vpop.eup %9270  ;;  %6110 = vst.msk [vmem:[%s10733_s14 + $0x30] sm:$0xf] %vm6097_vm9, %v8047_v18  ;;  %v8048_v45 = vpack.c.bf16 %v9269_v10, %v9269_v10  ;;  %9288 = vpow2.f32 %v5889_v3  ;;  %v5839_v16 = vsub.f32 0.0, %v5807_v50  ;;  %v5808_v53 = vadd.f32 %v8851_v19, %v10692_v20 }
 0x260   : > { %v9273_v8 = vpop.eup %9272  ;;  %6113 = vst.msk [vmem:[%s10733_s14 + $0x3c] sm:$0xf] %vm6097_vm9, %v8050_v46  ;;  %v5927_v36 = vadd.f32 1.0, %v9271_v51  ;;  %9290 = vpow2.f32 %v5895_v63  ;;  %v5837_v27 = vsub.f32 0.0, %v5805_v15  ;;  %v5806_v38 = vadd.f32 %v8852_v25, %v10692_v20 }
 0x261   : > { %v9275_v34 = vpop.eup %9274  ;;  %6111 = vst.msk [vmem:[%s10733_s14 + $0x34] sm:$0xf] %vm6097_vm9, %v8048_v45  ;;  %v5925_v5 = vadd.f32 1.0, %v9273_v8  ;;  %9292 = vpow2.f32 %v5891_v37  ;;  %v5840_v4 = vsub.f32 0.0, %v5808_v53  ;;  %v5901_v2 = vmul.f32 1.442695, %v5839_v16 }
 0x262   : > { %v9277_v6 = vpop.eup %9276  ;;  %9294 = vrcp.f32 %v5927_v36  ;;  %v5928_v17 = vadd.f32 1.0, %v9275_v34  ;;  %v5838_v22 = vsub.f32 0.0, %v5806_v38  ;;  %v5897_v55 = vmul.f32 1.442695, %v5837_v27 }
 0x263   : > { %9296 = vrcp.f32 %v5925_v5  ;;  %v5926_v58 = vadd.f32 1.0, %v9277_v6  ;;  %v5903_v29 = vmul.f32 1.442695, %v5840_v4 }
 0x264   : > { %v9279_v28 = vpop.eup %9278  ;;  %9298 = vrcp.f32 %v5928_v17  ;;  %v5899_v1 = vmul.f32 1.442695, %v5838_v22  ;;  %v8027_v17 = vld [vmem:[%s10904_s4 + $0x20] sm:$0xff]  ;;  %v8029_v22 = vld [vmem:[%s10904_s4 + $0x30] sm:$0xff] }
 0x265   : > { %v9281_v20 = vpop.eup %9280  ;;  %v8053_v39 = vpack.c.bf16 %v9279_v28, %v9279_v28  ;;  %9300 = vrcp.f32 %v5926_v58  ;;  %v6678_v58 = vand.u32 4294901760, %v8027_v17  ;;  %v6684_v28 = vand.u32 4294901760, %v8029_v22 }
 0x266   : > { %v9283_v13 = vpop.eup %9282  ;;  %v8051_v32 = vpack.c.bf16 %v9281_v20, %v9281_v20  ;;  %9302 = vpow2.f32 %v5901_v2  ;;  %v8028_v2 = vld [vmem:[%s10904_s4 + $0x28] sm:$0xff] }
 0x267   : > { %v9285_v33 = vpop.eup %9284  ;;  %6116 = vst.msk [vmem:[%s10733_s14 + $0x48] sm:$0xf] %vm6097_vm9, %v8053_v39  ;;  %v8054_v11 = vpack.c.bf16 %v9283_v13, %v9283_v13  ;;  %9304 = vpow2.f32 %v5897_v55  ;;  %v6681_v55 = vand.u32 4294901760, %v8028_v2  ;;  %v6758_v39 = vsub.f32 %v8027_v17, %v6678_v58 }
 0x268   : > { %v9287_v21 = vpop.eup %9286  ;;  %6114 = vst.msk [vmem:[%s10733_s14 + $0x40] sm:$0xf] %vm6097_vm9, %v8051_v32  ;;  %v8052_v47 = vpack.c.bf16 %v9285_v33, %v9285_v33  ;;  %9306 = vpow2.f32 %v5903_v29  ;;  %v6772_v13 = vsub.f32 %v8029_v22, %v6684_v28  ;;  %v7178_v17 = vrot.slane %v10700_v30, 5 }
 0x269   : > { %v9289_v57 = vpop.eup %9288  ;;  %6117 = vst.msk [vmem:[%s10733_s14 + $0x4c] sm:$0xf] %vm6097_vm9, %v8054_v11  ;;  %v5931_v40 = vadd.f32 1.0, %v9287_v21  ;;  %9308 = vpow2.f32 %v5899_v1  ;;  %v10845_v20 = vpack.c.bf16 %v6681_v55, %v6678_v58  ;;  %v6765_v1 = vsub.f32 %v8028_v2, %v6681_v55 }
 0x26a   : > { %v9291_v48 = vpop.eup %9290  ;;  %6115 = vst.msk [vmem:[%s10733_s14 + $0x44] sm:$0xf] %vm6097_vm9, %v8052_v47  ;;  %v5929_v61 = vadd.f32 1.0, %v9289_v57  ;;  %v6759_v11 = vand.u32 4294901760, %v6758_v39  ;;  %v7181_v22 = vrot.slane %v10700_v30, 6 }
 0x26b   : > { %v9293_v31 = vpop.eup %9292  ;;  %9310 = vrcp.f32 %v5931_v40  ;;  %v5932_v56 = vadd.f32 1.0, %v9291_v48  ;;  %8783 = vmatpush3.bf16.msra.mxu1 %v10845_v20  ;;  %v6766_v21 = vand.u32 4294901760, %v6765_v1 }
 0x26c   : > { %v9295_v9 = vpop.eup %9294  ;;  %9312 = vrcp.f32 %v5929_v61  ;;  %v5930_v26 = vadd.f32 1.0, %v9293_v31  ;;  %8784 = vmatprep.subr.bf16.mxu1 %v9357_v52  ;;  %v6760_v47 = vsub.f32 %v6758_v39, %v6759_v11  ;;  %v6773_v61 = vand.u32 4294901760, %v6772_v13 }
 0x26d   : > { %v9297_v49 = vpop.eup %9296  ;;  %v8057_v62 = vpack.c.bf16 %v9295_v9, %v9295_v9  ;;  %9314 = vrcp.f32 %v5932_v56  ;;  %v6767_v57 = vsub.f32 %v6765_v1, %v6766_v21 }
 0x26e   : > { %v9299_v3 = vpop.eup %9298  ;;  %v8055_v59 = vpack.c.bf16 %v9297_v49, %v9297_v49  ;;  %9316 = vrcp.f32 %v5930_v26  ;;  %v6761_v40 = vand.u32 4294901760, %v6760_v47  ;;  %v6774_v9 = vsub.f32 %v6772_v13, %v6773_v61 }
 0x26f   : > { %v9301_v23 = vpop.eup %9300  ;;  %6120 = vst.msk [vmem:[%s10733_s14 + $0x58] sm:$0xf] %vm6097_vm9, %v8057_v62  ;;  %v8058_v44 = vpack.c.bf16 %v9299_v3, %v9299_v3  ;;  %v6768_v48 = vand.u32 4294901760, %v6767_v57 }
 0x270   : > { %v9303_v42 = vpop.eup %9302  ;;  %6118 = vst.msk [vmem:[%s10733_s14 + $0x50] sm:$0xf] %vm6097_vm9, %v8055_v59  ;;  %v8056_v63 = vpack.c.bf16 %v9301_v23, %v9301_v23  ;;  %v6775_v49 = vand.u32 4294901760, %v6774_v9  ;;  %v8794_v59 = vpack.c.bf16 %v6765_v1, %v6758_v39 }
 0x271   : > { %v9305_v35 = vpop.eup %9304  ;;  %6121 = vst.msk [vmem:[%s10733_s14 + $0x5c] sm:$0xf] %vm6097_vm9, %v8058_v44  ;;  %v5935_v43 = vadd.f32 1.0, %v9303_v42  ;;  %v8788_v56 = vpack.c.bf16 %v6768_v48, %v6761_v40  ;;  %v8806_v44 = vpack.c.bf16 %v6766_v21, %v6759_v11 }
 0x272   : > { %v9307_v60 = vpop.eup %9306  ;;  %6119 = vst.msk [vmem:[%s10733_s14 + $0x54] sm:$0xf] %vm6097_vm9, %v8056_v63  ;;  %v5933_v7 = vadd.f32 1.0, %v9305_v35 }
 0x273   : > { %v9309_v37 = vpop.eup %9308  ;;  %9318 = vrcp.f32 %v5935_v43  ;;  %v5936_v41 = vadd.f32 1.0, %v9307_v60  ;;  %v6661_v60 = vrot.slane %v10700_v30, 1 }
 0x274   : > { %9320 = vrcp.f32 %v5933_v7  ;;  %v5934_v0 = vadd.f32 1.0, %v9309_v37 }
 0x275   : > { %v9311_v14 = vpop.eup %9310  ;;  %9322 = vrcp.f32 %v5936_v41  ;;  %v6664_v41 = vrot.slane %v10700_v30, 2 }
 0x276   : > { %v9313_v18 = vpop.eup %9312  ;;  %v8061_v50 = vpack.c.bf16 %v9311_v14, %v9311_v14  ;;  %9324 = vrcp.f32 %v5934_v0 }
 0x277   : > { %v9315_v19 = vpop.eup %9314  ;;  %v8059_v54 = vpack.c.bf16 %v9313_v18, %v9313_v18 }
 0x278   : > { %v9317_v10 = vpop.eup %9316  ;;  %6124 = vst.msk [vmem:[%s10733_s14 + $0x68] sm:$0xf] %vm6097_vm9, %v8061_v50  ;;  %v8062_v46 = vpack.c.bf16 %v9315_v19, %v9315_v19 }
 0x279   : > { %6122 = vst.msk [vmem:[%s10733_s14 + $0x60] sm:$0xf] %vm6097_vm9, %v8059_v54  ;;  %v8060_v15 = vpack.c.bf16 %v9317_v10, %v9317_v10 }
 0x27a   : > { %6125 = vst.msk [vmem:[%s10733_s14 + $0x6c] sm:$0xf] %vm6097_vm9, %v8062_v46 }
 0x27b   : > { %6123 = vst.msk [vmem:[%s10733_s14 + $0x64] sm:$0xf] %vm6097_vm9, %v8060_v15  ;;  %v6672_v15 = vrot.slane %v10700_v30, 3 }
 0x27d   : > { %v9319_v25 = vpop.eup %9318 }
 0x27e   : > { %v9321_v51 = vpop.eup %9320  ;;  %v8065_v45 = vpack.c.bf16 %v9319_v25, %v9319_v25 }
 0x27f   : > { %v9323_v16 = vpop.eup %9322  ;;  %v8063_v53 = vpack.c.bf16 %v9321_v51, %v9321_v51 }
 0x280   : > { %v9325_v8 = vpop.eup %9324  ;;  %6128 = vst.msk [vmem:[%s10733_s14 + $0x78] sm:$0xf] %vm6097_vm9, %v8065_v45  ;;  %v8066_v36 = vpack.c.bf16 %v9323_v16, %v9323_v16 }
 0x281   : > { %6126 = vst.msk [vmem:[%s10733_s14 + $0x70] sm:$0xf] %vm6097_vm9, %v8063_v53  ;;  %v8064_v27 = vpack.c.bf16 %v9325_v8, %v9325_v8 }
 0x282   : > { %6129 = vst.msk [vmem:[%s10733_s14 + $0x7c] sm:$0xf] %vm6097_vm9, %v8066_v36 }
 0x283   : > { %6127 = vst.msk [vmem:[%s10733_s14 + $0x74] sm:$0xf] %vm6097_vm9, %v8064_v27 }
 0x2bb   : > { %v6648_v38 = vpop.xlane.xlu0 %6647 }
 0x2bc   : > { %v6650_v34 = vmul.f32 0.03125, %v6648_v38 }
 0x2be   : > { %v6651_v5 = vsub.f32 %v10704_v12, %v6650_v34  ;;  %v8030_v12 = vld [vmem:[%s10904_s4 + $0x38] sm:$0xff] }
 0x2bf   : > { %v6687_v29 = vand.u32 4294901760, %v8030_v12 }
 0x2c0   : > { %v6652_v4 = vmul.f32 %v6651_v5, %v6651_v5 }
 0x2c1   : > { %v6779_v32 = vsub.f32 %v8030_v12, %v6687_v29  ;;  %v10848_v33 = vpack.c.bf16 %v6687_v29, %v6684_v28  ;;  %v9360_v28 = vmov 0   ;;  %v7187_v29 = vrot.slane %v10700_v30, 7 }
 0x2c2   : > { %v6653_v6 = vsel %vm6645_vm8, %v6652_v4, 0.0  ;;  %9128 = vset.pattern.permute.xlu1 %v9360_v28  ;;  %9129 = vset.pattern.permute.xlu0 %v9360_v28 }
 0x2c3   : > { %6654 = vadd.xlane.f32.xlu0 %v6653_v6  ;;  %8786 = vmatpush3.bf16.msra.mxu1 %v10848_v33  ;;  %v6780_v31 = vand.u32 4294901760, %v6779_v32  ;;  %v8797_v23 = vpack.c.bf16 %v6779_v32, %v6772_v13 }
 0x2c4   : > { %8787 = vmatprep.subr.bf16.mxu1 %v9357_v52 }
 0x2c5   : > { %v6781_v26 = vsub.f32 %v6779_v32, %v6780_v31  ;;  %v8809_v42 = vpack.c.bf16 %v6780_v31, %v6773_v61 }
 0x2c7   : > { %v6782_v62 = vand.u32 4294901760, %v6781_v26 }
 0x2c9   : > { %v8791_v3 = vpack.c.bf16 %v6782_v62, %v6775_v49 }
 0x350   : > { %v6655_v63 = vpop.xlane.xlu0 %6654 }
 0x351   : > { %v6656_v35 = vmul.f32 0.03125, %v6655_v63 }
 0x353   : > { %v6657_v43 = vadd.f32 1e-05, %v6656_v35 }
 0x355   : > { %9326 = vrsqrt.f32 %v6657_v43 }
 0x35f   : > { %v9327_v7 = vpop.eup %9326 }
 0x360   : > { %v6659_v37 = vmul.f32 %v9327_v7, %v6651_v5  ;;  %v7175_v5 = vrot.slane %v10700_v30, 4 }
 0x362   : > { %v6663_v0 = vmul.f32 %v6661_v60, %v6659_v37 }
 0x364   : > { %v6666_v14 = vadd.f32 %v6664_v41, %v6663_v0 }
 0x366   : > { %v6675_v18 = vsel %vm474_vm0, %v6666_v14, 0 }
 0x367   : > { %v6746_v50 = vand.u32 4294901760, %v6675_v18 }
 0x369   : > { %v6747_v19 = vsub.f32 %v6675_v18, %v6746_v50 }
 0x36b   : > { %v6748_v54 = vand.u32 4294901760, %v6747_v19 }
 0x36d   : > { %v6749_v10 = vsub.f32 %v6747_v19, %v6748_v54 }
 0x36f   : > { %v6750_v46 = vand.u32 4294901760, %v6749_v10 }
 0x371   : > { %8688 = vmatmul.mubr.f32.vlgmr.msra.gmra.mrb[34].mxu1 %v6750_v46 }
 0x372   : > { %8789 = vmatpush3.bf16.msra.mxu1 %v8788_v56  ;;  %8698 = vmatprep.mubr.msk.f32.mxu1 %vm9358_vm7, %v9359_v24 }
 0x373   : > { %8790 = vmatprep.subr.bf16.mxu1 %v9357_v52 }
 0x376   : > { %8792 = vmatpush3.bf16.msra.mxu1 %v8791_v3 }
 0x377   : > { %8793 = vmatprep.subr.bf16.mxu1 %v9357_v52 }
 0x379   : > { %8699 = vmatmul.mubr.f32.vlgmr.msra.gmra.mrb[34].mxu1 %v6746_v50 }
 0x37a   : > { %8795 = vmatpush3.bf16.msra.mxu1 %v8794_v59  ;;  %8709 = vmatprep.mubr.msk.f32.mxu1 %vm9358_vm7, %v9359_v24 }
 0x37b   : > { %8796 = vmatprep.subr.bf16.mxu1 %v9357_v52 }
 0x37e   : > { %8798 = vmatpush3.bf16.msra.mxu1 %v8797_v23 }
 0x37f   : > { %8799 = vmatprep.subr.bf16.mxu1 %v9357_v52 }
 0x381   : > { %8710 = vmatmul.mubr.f32.vlgmr.msra.gmra.mrb[34].mxu1 %v6747_v19 }
 0x382   : > { %8801 = vmatpush3.bf16.msra.mxu1 %v10845_v20  ;;  %8720 = vmatprep.mubr.msk.f32.mxu1 %vm9358_vm7, %v9359_v24 }
 0x383   : > { %8802 = vmatprep.subr.bf16.mxu1 %v9357_v52 }
 0x386   : > { %8804 = vmatpush3.bf16.msra.mxu1 %v10848_v33 }
 0x387   : > { %8805 = vmatprep.subr.bf16.mxu1 %v9357_v52 }
 0x389   : > { %8721 = vmatmul.mubr.f32.vlgmr.msra.gmra.mrb[34].mxu1 %v6748_v54 }
 0x38a   : > { %8807 = vmatpush3.bf16.msra.mxu1 %v8806_v44  ;;  %8731 = vmatprep.mubr.msk.f32.mxu1 %vm9358_vm7, %v9359_v24 }
 0x38b   : > { %8808 = vmatprep.subr.bf16.mxu1 %v9357_v52 }
 0x38e   : > { %8810 = vmatpush3.bf16.msra.mxu1 %v8809_v42 }
 0x38f   : > { %8811 = vmatprep.subr.bf16.mxu1 %v9357_v52 }
 0x391   : > { %8732 = vmatmul.mubr.f32.vlgmr.msra.gmra.mrb[34].mxu1 %v6746_v50 }
 0x392   : > { %8813 = vmatpush3.bf16.msra.mxu1 %v10845_v20  ;;  %8742 = vmatprep.mubr.msk.f32.mxu1 %vm9358_vm7, %v9359_v24 }
 0x393   : > { %8814 = vmatprep.subr.bf16.mxu1 %v9357_v52 }
 0x396   : > { %8816 = vmatpush3.bf16.msra.mxu1 %v10848_v33 }
 0x399   : > { %8743 = vmatmul.mubr.f32.vlgmr.msra.gmra.mrb[34].mxu1 %v6746_v50 }
 0x46c   : > { %v7158_v25 = vpop.f32.mrb[34].mxu1 }
 0x46d   : > { %v8854_v51 = vadd.f32 %v7158_v25, %v6672_v15  ;;  %v8744_v45 = vpop.f32.mrb[35].mxu1 }
 0x46f   : > { %v7162_v16 = vsel %vm6645_vm8, %v8854_v51, 0.0 }
 0x470   : > { %7163 = vadd.xlane.f32.xlu1 %v7162_v16 }
 0x4fd   : > { %v7164_v53 = vpop.xlane.xlu1 %7163 }
 0x4fe   : > { %v7165_v8 = vmul.f32 0.03125, %v7164_v53 }
 0x500   : > { %v7166_v36 = vsub.f32 %v8854_v51, %v7165_v8 }
 0x502   : > { %v7167_v27 = vmul.f32 %v7166_v36, %v7166_v36 }
 0x504   : > { %v7168_v38 = vsel %vm6645_vm8, %v7167_v27, 0.0 }
 0x505   : > { %7169 = vadd.xlane.f32.xlu1 %v7168_v38 }
 0x592   : > { %v7170_v24 = vpop.xlane.xlu1 %7169 }
 0x593   : > { %v7171_v52 = vmul.f32 0.03125, %v7170_v24 }
 0x595   : > { %v7172_v34 = vadd.f32 1e-05, %v7171_v52 }
 0x597   : > { %9328 = vrsqrt.f32 %v7172_v34 }
 0x5a1   : > { %v9329_v4 = vpop.eup %9328 }
 0x5a2   : > { %v7174_v6 = vmul.f32 %v9329_v4, %v7166_v36 }
 0x5a4   : > { %v7177_v2 = vmul.f32 %v7175_v5, %v7174_v6 }
 0x5a6   : > { %v7180_v58 = vadd.f32 %v7178_v17, %v7177_v2 }
 0x5a8   : > { %v7183_v55 = vmul.f32 %v7181_v22, %v7180_v58 }
 0x5aa   : > { %v7184_v12 = vsel %vm6645_vm8, %v7183_v55, 0.0 }
 0x5ab   : > { %7185 = vadd.xlane.f32.xlu0 %v7184_v12 }
 0x638   : > { %v7186_v20 = vpop.xlane.xlu0 %7185 }
 0x639   : > { %v7189_v39 = vadd.f32 %v7187_v29, %v7186_v20 }
 0x63b   : > { %7192 = vperm.xlu1 %9128, %v7189_v39  }
 0x6ba   : > { %v7193_v1 = vpop.permute.xlu1 %7192 }
 0x6bb   : > { %7197 = vst.msk [vmem:[%s340_s30] sm:$0x1] %vm7196_vm10, %v7193_v1 }
 0x6bc PF: > { %s18_s26 = sadd.s32 1, %s9355_s26   ;;  %s10912_s24 = smov %s9351_s25 }
 0x6bd   : > { %p15_p5 = scmp.ge.s32.totalorder %s18_s26, 4   ;;  %s10913_s25 = smov %s10915_s27 }
 0x6bf   :  { %17 = sbr.rel (!%p15_p5) target bundleno = 2 (0x2), region = 101 }

</bundles_post_ra>
